<compile_context>
chip_gen: v6e
topology: v6e:2x2x1
jax: 0.10.0
libtpu: 0.0.40
codegen_flags: <defaults>
</compile_context>

<pallas_src>
import functools

import jax
import jax.numpy as jnp
from jax.experimental import pallas as pl
from jax.experimental.pallas import tpu as pltpu

_LANES = 128
_EPS = 1e-5


def _round_up(n, m):
    return ((n + m - 1) // m) * m


def _silu(v):
    # x * sigmoid(x); the approximate reciprocal runs on the EUP (nearly free slot).
    return v * pl.reciprocal(1.0 + jnp.exp(-v), approx=True)


# ---------------------------------------------------------------------------
# Kernel 1: row-tiled matmul (1x1 conv, or 2x2/s2 conv on channels-last patches)
#           + optional fused input BatchNorm+SiLU prologue (f32 math)
#           + per-tile BatchNorm statistics (f32 sum / sum^2 from the f32 accumulator)
#           output tile stored bf16 (review item: bf16 intermediates)
# ---------------------------------------------------------------------------
def _conv_mm_kernel(*refs, fuse_in, mask_rows, rows_last, mm_dtype):
    if fuse_in:
        a_ref, w_ref, b_ref, sc_ref, sh_ref, y_ref, s_ref, q_ref = refs
    else:
        a_ref, w_ref, b_ref, y_ref, s_ref, q_ref = refs

    a = a_ref[...]
    if fuse_in:
        # BatchNorm (of the previous conv) + SiLU folded into this matmul's input.
        a = _silu(a.astype(jnp.float32) * sc_ref[...] + sh_ref[...]).astype(mm_dtype)
    else:
        a = a.astype(mm_dtype)

    y = jnp.dot(a, w_ref[...], preferred_element_type=jnp.float32) + b_ref[...]
    y_ref[...] = y.astype(y_ref.dtype)          # bf16 intermediate store

    def _stats(yv):
        s_ref[0] = jnp.sum(yv, axis=0, keepdims=True)
        q_ref[0] = jnp.sum(yv * yv, axis=0, keepdims=True)

    if mask_rows:
        # Only the last tile contains padded rows -> gate the iota/select on it.
        last = pl.num_programs(0) - 1

        @pl.when(pl.program_id(0) == last)
        def _():
            row = jax.lax.broadcasted_iota(jnp.int32, (y.shape[0], 1), 0)
            _stats(jnp.where(row < rows_last, y, 0.0))

        @pl.when(pl.program_id(0) != last)
        def _():
            _stats(y)
    else:
        _stats(y)


def _conv_bn_stats(a, w, b, in_scale=None, in_shift=None, *, tile_m=1024):
    """y = [silu(a*scale+shift)] @ w + b  (row tiled, bf16 in / bf16 out, f32 acc),
    plus per-tile BatchNorm partial sums in f32."""
    M, K = a.shape
    Kw, N = w.shape
    assert Kw == K and b.shape == (1, N)

    # Byte-cap the activation block so the double-buffered tile stays well under
    # v5e's 16 MiB scoped-VMEM default even for the K = 4*rh_p conv2 call
    # (review item); v6e/v7x budgets are looser still.
    max_rows = max(16, ((4 << 20) // (K * a.dtype.itemsize)) // 16 * 16)
    tm = min(tile_m, max_rows, _round_up(M, 16))
    n_tiles = pl.cdiv(M, tm)
    Mp = n_tiles * tm
    if Mp != M:
        a = jnp.pad(a, ((0, Mp - M), (0, 0)))
    fuse_in = in_scale is not None
    rows_last = M - (n_tiles - 1) * tm

    kernel = functools.partial(
        _conv_mm_kernel, fuse_in=fuse_in, mask_rows=(Mp != M),
        rows_last=rows_last, mm_dtype=w.dtype)

    in_specs = [
        pl.BlockSpec((tm, K), lambda i: (i, 0)),   # activation row tile
        pl.BlockSpec((K, N), lambda i: (0, 0)),    # weight: constant index -> resident
        pl.BlockSpec((1, N), lambda i: (0, 0)),    # bias
    ]
    args = [a, w, b]
    if fuse_in:
        in_specs += [pl.BlockSpec((1, K), lambda i: (0, 0)),
                     pl.BlockSpec((1, K), lambda i: (0, 0))]
        args += [in_scale, in_shift]

    flops = 2 * Mp * K * N + (10 * Mp * K if fuse_in else 0)
    bytes_accessed = int(a.size * a.dtype.itemsize + w.size * w.dtype.itemsize
                         + 4 * N + 2 * Mp * N + 8 * n_tiles * N)
    y, s, q = pl.pallas_call(
        kernel,
        grid=(n_tiles,),
        in_specs=in_specs,
        out_specs=[
            pl.BlockSpec((tm, N), lambda i: (i, 0)),
            pl.BlockSpec((1, 1, N), lambda i: (i, 0, 0)),
            pl.BlockSpec((1, 1, N), lambda i: (i, 0, 0)),
        ],
        out_shape=[
            jax.ShapeDtypeStruct((Mp, N), jnp.bfloat16),        # bf16 intermediate
            jax.ShapeDtypeStruct((n_tiles, 1, N), jnp.float32),  # BN sum
            jax.ShapeDtypeStruct((n_tiles, 1, N), jnp.float32),  # BN sum of squares
        ],
        compiler_params=pltpu.CompilerParams(dimension_semantics=("parallel",)),
        cost_estimate=pl.CostEstimate(
            flops=int(flops),
            transcendentals=int(Mp * K if fuse_in else 0),
            bytes_accessed=bytes_accessed),
    )(*args)
    if Mp != M:
        y = y[:M]
    return y, s, q


def _bn_scale_shift(s_sum, q_sum, count, gamma, beta, eps=_EPS):
    """Training-mode BatchNorm: fold (mean, biased var, gamma, beta) into scale/shift."""
    # TODO(synk): E[y^2]-E[y]^2 in f32 can cancel for very large B*H*W; switch to
    #             per-tile centered sums / Welford merge before scaling sizes up.
    mean = s_sum / count
    var = jnp.maximum(q_sum / count - mean * mean, 0.0)
    scale = gamma * jax.lax.rsqrt(var + eps)
    shift = beta - mean * scale
    return scale[None, :], shift[None, :]          # (1, N) f32 each


# ---------------------------------------------------------------------------
# Kernel 2: final fusion:  SiLU( BN1(ds_pre) + BN3( bilinear_up_x4(cv2_pre) ) )
#           upsample is separable: row matmul (uh) + column batched matmul (uw)
# ---------------------------------------------------------------------------
def _fuse_out_kernel(ds_ref, y2_ref, uh_ref, uw_ref,
                     s1_ref, t1_ref, s3_ref, t3_ref, o_ref):
    th, W, N = ds_ref.shape[1], ds_ref.shape[2], ds_ref.shape[3]
    Wq = uw_ref.shape[1]

    # separable bilinear x4 (align_corners=True) upsample of the cv branch, bf16 MXU
    ur = jnp.dot(uh_ref[...], y2_ref[0],
                 preferred_element_type=jnp.float32)           # rows: (th, Wq*N)
    ur = ur.reshape(th, Wq, N).astype(jnp.bfloat16)
    uw_b = jnp.broadcast_to(uw_ref[...][None, :, :], (th, W, Wq))
    up = jax.lax.dot_general(                                   # cols: (th, W, N)
        uw_b, ur, dimension_numbers=(((2,), (1,)), ((0,), (0,))),
        preferred_element_type=jnp.float32)

    cv = up * s3_ref[...] + t3_ref[...]                         # BN3 (commutes w/ upsample)
    ds = ds_ref[0].astype(jnp.float32) * s1_ref[...] + t1_ref[...]   # BN1
    o_ref[0] = _silu(ds + cv).astype(o_ref.dtype)


def _fuse_output(ds4, y2w, uh, uw, s1, t1, s3, t3):
    B, H, W, N = ds4.shape
    Hq = y2w.shape[1]
    Wq = uw.shape[1]

    # ~2048 output pixels per grid step (review: bigger tiles), rows multiple of 16.
    th = min(_round_up(H, 16), max(16, _round_up(pl.cdiv(2048, W), 16)))
    n_t = pl.cdiv(H, th)
    Hp = n_t * th
    if Hp != H:
        ds4 = jnp.pad(ds4, ((0, 0), (0, Hp - H), (0, 0), (0, 0)))
        uh = jnp.pad(uh, ((0, Hp - H), (0, 0)))

    out = pl.pallas_call(
        _fuse_out_kernel,
        grid=(B, n_t),
        in_specs=[
            pl.BlockSpec((1, th, W, N), lambda b, m: (b, m, 0, 0)),   # ds branch (pre-BN1)
            pl.BlockSpec((1, Hq, Wq * N), lambda b, m: (b, 0, 0)),    # cv branch (pre-BN3)
            pl.BlockSpec((th, Hq), lambda b, m: (m, 0)),              # row interp weights
            pl.BlockSpec((W, Wq), lambda b, m: (0, 0)),               # col interp weights
            pl.BlockSpec((1, N), lambda b, m: (0, 0)),
            pl.BlockSpec((1, N), lambda b, m: (0, 0)),
            pl.BlockSpec((1, N), lambda b, m: (0, 0)),
            pl.BlockSpec((1, N), lambda b, m: (0, 0)),
        ],
        out_specs=pl.BlockSpec((1, th, W, N), lambda b, m: (b, m, 0, 0)),
        out_shape=jax.ShapeDtypeStruct((B, Hp, W, N), jnp.float32),
        compiler_params=pltpu.CompilerParams(
            dimension_semantics=("parallel", "parallel")),
        cost_estimate=pl.CostEstimate(
            flops=int(B * n_t * (2 * th * Hq * Wq * N + 2 * th * W * Wq * N
                                 + 10 * th * W * N)),
            transcendentals=int(B * Hp * W * N),
            bytes_accessed=int(2 * B * Hp * W * N + 2 * B * Hq * Wq * N
                               + 4 * B * Hp * W * N + 2 * (Hp * Hq + W * Wq))),
    )(ds4, y2w, uh, uw, s1, t1, s3, t3)
    return out[:, :H]


# ---------------------------------------------------------------------------
# interpolation matrices (nn.UpsamplingBilinear2d == bilinear, align_corners=True)
# ---------------------------------------------------------------------------
def _interp_matrix(n_in, n_out):
    if n_in == 1:
        return jnp.ones((n_out, 1), jnp.float32)
    src = jnp.arange(n_out, dtype=jnp.float32) * ((n_in - 1) / (n_out - 1))
    lo = jnp.clip(jnp.floor(src).astype(jnp.int32), 0, n_in - 2)
    frac = src - lo.astype(jnp.float32)
    return (jax.nn.one_hot(lo, n_in, dtype=jnp.float32) * (1.0 - frac)[:, None]
            + jax.nn.one_hot(lo + 1, n_in, dtype=jnp.float32) * frac[:, None])


# ---------------------------------------------------------------------------
# parameters: deterministic init (torch layouts) + one-time matmul-ready re-layout
# ---------------------------------------------------------------------------
def init_params(key, in_ch, hid_ch, ratio=4.0):
    r = int(round(ratio))
    rh = r * hid_ch
    ks = jax.random.split(key, 12)

    def conv_w(k, o, i, kh, kw):
        return jax.random.normal(k, (o, i, kh, kw), jnp.float32) / float((i * kh * kw) ** 0.5)

    def vec(k, n, scale=0.1):
        return scale * jax.random.normal(k, (n,), jnp.float32)

    return dict(
        ds_w=conv_w(ks[0], hid_ch, in_ch, 1, 1), ds_b=vec(ks[1], hid_ch),
        bn1_g=1.0 + vec(ks[2], hid_ch), bn1_b=vec(ks[3], hid_ch),
        cv1_w=conv_w(ks[4], rh, in_ch, 2, 2), cv1_b=vec(ks[5], rh),
        bn2_g=1.0 + vec(ks[6], rh), bn2_b=vec(ks[7], rh),
        cv2_w=conv_w(ks[8], hid_ch, rh, 2, 2), cv2_b=vec(ks[9], rh if False else hid_ch),
        bn3_g=1.0 + vec(ks[10], hid_ch), bn3_b=vec(ks[11], hid_ch),
    )


def prepare_params(raw, in_ch, hid_ch, ratio=4.0):
    """One-time re-layout: weights in matmul (K, N) layout, output channels zero
    padded to a multiple of 128 (lane-dense stores), cast to bf16.  conv1 is laid
    out so one matmul maps a 4x4 input block to its 2x2 output sub-pixels, in the
    exact (sub-pixel, channel) column order conv2 consumes."""
    r = int(round(ratio))
    rh = r * hid_ch
    hid_p = _round_up(hid_ch, _LANES)
    rh_p = _round_up(rh, _LANES)
    C = in_ch

    def pad_vec(v, n, fill=0.0):
        return jnp.full((n,), fill, jnp.float32).at[: v.shape[0]].set(v)

    # ds: 1x1 conv  (hid, C, 1, 1) -> (C, hid_p)
    w_ds = jnp.zeros((C, hid_p), jnp.float32).at[:, :hid_ch].set(raw["ds_w"][:, :, 0, 0].T)

    # cv1: 2x2/s2 conv over 4x4 input blocks -> (16*C, 4*rh_p), out columns (s=p*2+q, oc)
    w1 = jnp.transpose(raw["cv1_w"], (2, 3, 1, 0))              # (kh, kw, C, rh)
    big = jnp.zeros((4, 4, C, 4, rh_p), jnp.float32)
    for p in range(2):
        for q in range(2):
            for kh in range(2):
                for kw in range(2):
                    big = big.at[2 * p + kh, 2 * q + kw, :, p * 2 + q, :rh].set(w1[kh, kw])
    w_cv1 = big.reshape(16 * C, 4 * rh_p)
    b_cv1 = jnp.tile(pad_vec(raw["cv1_b"], rh_p)[None, :], (1, 4))

    # cv2: 2x2/s2 conv over the conv1 grid -> (4*rh_p, hid_p), rows (kh*2+kw, ic)
    w2 = jnp.transpose(raw["cv2_w"], (2, 3, 1, 0))              # (2, 2, rh, hid)
    w2 = jnp.pad(w2, ((0, 0), (0, 0), (0, rh_p - rh), (0, 0))).reshape(4 * rh_p, hid_ch)
    w_cv2 = jnp.zeros((4 * rh_p, hid_p), jnp.float32).at[:, :hid_ch].set(w2)

    # BatchNorm affine params; padded channels get gamma=0 -> BN scale exactly 0.
    return dict(
        w_ds=w_ds.astype(jnp.bfloat16), b_ds=pad_vec(raw["ds_b"], hid_p)[None, :],
        g1=pad_vec(raw["bn1_g"], hid_p), b1=pad_vec(raw["bn1_b"], hid_p),
        w_cv1=w_cv1.astype(jnp.bfloat16), b_cv1=b_cv1,
        g2=pad_vec(raw["bn2_g"], rh_p), b2=pad_vec(raw["bn2_b"], rh_p),
        w_cv2=w_cv2.astype(jnp.bfloat16), b_cv2=pad_vec(raw["cv2_b"], hid_p)[None, :],
        g3=pad_vec(raw["bn3_g"], hid_p), b3=pad_vec(raw["bn3_b"], hid_p),
    )


# ---------------------------------------------------------------------------
# forward pass
# ---------------------------------------------------------------------------
@functools.partial(jax.jit, static_argnums=(2,))
def simple_downsample(x, prep, hid_ch):
    """SimpleDownsample.forward.  x: (B, in_ch, H, W) NCHW (torch layout)."""
    B, C, H, W = x.shape
    assert H % 4 == 0 and W % 4 == 0, "H and W must be multiples of 4"
    hid_p = prep["b_ds"].shape[1]
    rh_p = prep["g2"].shape[0]
    Hq, Wq = H // 4, W // 4

    # Layout transforms touch only the (tiny, in_ch-channel) input; every large
    # intermediate stays in a Pallas-consumable layout end to end (no space_to_depth
    # between conv1 and conv2).  bf16 activations halve conv-kernel input DMA.
    x_pix = (jnp.transpose(x, (0, 2, 3, 1))
             .reshape(B * H * W, C).astype(jnp.bfloat16))
    x_blk = (x.reshape(B, C, Hq, 4, Wq, 4)
             .transpose(0, 2, 4, 3, 5, 1)
             .reshape(B * Hq * Wq, 16 * C).astype(jnp.bfloat16))

    # --- ds branch: 1x1 conv (+ BN1 statistics) -----------------------------
    ds_pre, s1s, q1s = _conv_bn_stats(x_pix, prep["w_ds"], prep["b_ds"])
    s1, t1 = _bn_scale_shift(jnp.sum(s1s, (0, 1)), jnp.sum(q1s, (0, 1)),
                             B * H * W, prep["g1"], prep["b1"])

    # --- cv conv1: 2x2/s2 conv, output directly in conv2's patch order -------
    cv1_pre, s2s, q2s = _conv_bn_stats(x_blk, prep["w_cv1"], prep["b_cv1"])
    s2sum = jnp.sum(s2s, (0, 1)).reshape(4, rh_p).sum(0)
    q2sum = jnp.sum(q2s, (0, 1)).reshape(4, rh_p).sum(0)
    s2, t2 = _bn_scale_shift(s2sum, q2sum, B * (H // 2) * (W // 2),
                             prep["g2"], prep["b2"])

    # --- cv conv2: BN2 + SiLU folded into the matmul's input prologue --------
    cv2_pre, s3s, q3s = _conv_bn_stats(
        cv1_pre, prep["w_cv2"], prep["b_cv2"],
        in_scale=jnp.tile(s2, (1, 4)), in_shift=jnp.tile(t2, (1, 4)))
    s3, t3 = _bn_scale_shift(jnp.sum(s3s, (0, 1)), jnp.sum(q3s, (0, 1)),
                             B * Hq * Wq, prep["g3"], prep["b3"])

    # --- final fusion: BN1 + separable bilinear x4 upsample (BN3 commutes) ---
    uh = _interp_matrix(Hq, H).astype(jnp.bfloat16)
    uw = _interp_matrix(Wq, W).astype(jnp.bfloat16)
    out = _fuse_output(ds_pre.reshape(B, H, W, hid_p),
                       cv2_pre.reshape(B, Hq, Wq * hid_p),
                       uh, uw, s1, t1, s3, t3)
    out = out[:, :, :, :hid_ch]
    # TODO(synk): if the downstream consumer accepts NHWC this final transpose (one
    #             full XLA pass over the output) can be dropped entirely.
    return jnp.transpose(out, (0, 3, 1, 2))                      # (B, hid, H, W)


# ---------------------------------------------------------------------------
# pure-JAX f32 reference (mirrors the PyTorch module, training-mode BN)
# ---------------------------------------------------------------------------
def _reference_forward(x, raw, eps=_EPS):
    def bn(y, g, b):
        mean = y.mean(axis=(0, 2, 3), keepdims=True)
        var = ((y - mean) ** 2).mean(axis=(0, 2, 3), keepdims=True)
        return ((y - mean) * jax.lax.rsqrt(var + eps)
                * g.reshape(1, -1, 1, 1) + b.reshape(1, -1, 1, 1))

    def silu(v):
        return v * jax.nn.sigmoid(v)

    def conv(v, w, b, stride):
        y = jax.lax.conv_general_dilated(
            v, w, (stride, stride), "VALID",
            dimension_numbers=("NCHW", "OIHW", "NCHW"))
        return y + b.reshape(1, -1, 1, 1)

    def upsample4(v):                              # bilinear, align_corners=True
        _, _, h, w = v.shape

        def coords(n_in, n_out):
            src = jnp.arange(n_out, dtype=jnp.float32) * ((n_in - 1) / (n_out - 1))
            lo = jnp.clip(jnp.floor(src).astype(jnp.int32), 0, n_in - 2)
            return lo, lo + 1, src - lo.astype(jnp.float32)

        hl, hh, hf = coords(h, 4 * h)
        wl, wh, wf = coords(w, 4 * w)
        vr = (v[:, :, hl, :] * (1 - hf)[None, None, :, None]
              + v[:, :, hh, :] * hf[None, None, :, None])
        return (vr[:, :, :, wl] * (1 - wf)[None, None, None, :]
                + vr[:, :, :, wh] * wf[None, None, None, :])

    ds = bn(conv(x, raw["ds_w"], raw["ds_b"], 1), raw["bn1_g"], raw["bn1_b"])
    cv = silu(bn(conv(x, raw["cv1_w"], raw["cv1_b"], 2), raw["bn2_g"], raw["bn2_b"]))
    cv = bn(conv(cv, raw["cv2_w"], raw["cv2_b"], 2), raw["bn3_g"], raw["bn3_b"])
    cv = upsample4(cv)
    return silu(ds + cv)


if __name__ == "__main__":
    key = jax.random.PRNGKey(0)
    B, in_ch, hid_ch, ratio = 2, 4, 32, 4.0
    H = W = 16

    k_x, k_p = jax.random.split(key)
    x = jax.random.normal(k_x, (B, in_ch, H, W), dtype=jnp.float32)
    raw = init_params(k_p, in_ch, hid_ch, ratio)
    prep = prepare_params(raw, in_ch, hid_ch, ratio)   # one-time weight re-layout

    out = jax.block_until_ready(simple_downsample(x, prep, hid_ch))
    ref = _reference_forward(x, raw)

    assert out.shape == ref.shape == (B, hid_ch, H, W)
    assert bool(jnp.all(jnp.isfinite(out)))
    # bf16 activations / intermediates / MXU inputs -> compare against the f32
    # reference with a matching tolerance.
    err = float(jnp.max(jnp.abs(out - ref)))
    assert bool(jnp.allclose(out, ref, atol=5e-2, rtol=5e-2)), err
    print("KERNEL_OK")
</pallas_src>

<mosaic_0001>
module attributes {stable_mosaic.version = 11 : i64} {
  func.func @_conv_mm_kernel(%arg0: i32, %arg1: memref<32x64xbf16, #tpu.memory_space<vmem>>, %arg2: memref<64x512xbf16, #tpu.memory_space<vmem>>, %arg3: memref<1x512xf32, #tpu.memory_space<vmem>>, %arg4: memref<32x512xbf16, #tpu.memory_space<vmem>>, %arg5: memref<1x1x512xf32, #tpu.memory_space<vmem>>, %arg6: memref<1x1x512xf32, #tpu.memory_space<vmem>>) attributes {dimension_semantics = [#tpu.dimension_semantics<parallel>], iteration_bounds = array<i64: 1>, scalar_prefetch = 0 : i64, scratch_operands = 0 : i64, tpu.core_type = #tpu.core_type<tc>, window_params = [{transform_indices = @transform_0, window_bounds = array<i64: 32, 64>}, {pipeline_mode = #tpu.pipeline_mode<synchronous>, transform_indices = @transform_1, window_bounds = array<i64: 64, 512>}, {pipeline_mode = #tpu.pipeline_mode<synchronous>, transform_indices = @transform_2, window_bounds = array<i64: 1, 512>}, {transform_indices = @transform_3, window_bounds = array<i64: 32, 512>}, {transform_indices = @transform_4, window_bounds = array<i64: 1, 1, 512>}, {transform_indices = @transform_5, window_bounds = array<i64: 1, 1, 512>}]} {
    %c0 = arith.constant 0 : index
    %c0_0 = arith.constant 0 : index
    %0 = vector.load %arg1[%c0, %c0_0] : memref<32x64xbf16, #tpu.memory_space<vmem>>, vector<32x64xbf16>
    %c0_1 = arith.constant 0 : index
    %c0_2 = arith.constant 0 : index
    %1 = vector.load %arg2[%c0_1, %c0_2] : memref<64x512xbf16, #tpu.memory_space<vmem>>, vector<64x512xbf16>
    %cst = arith.constant dense<0.000000e+00> : vector<32x512xf32>
    %2 = tpu.matmul %0, %1, %cst {dimension_numbers = #tpu.dot_dimension_numbers<[1], [0], [0], [1], [0, 0, 1, 1], [], []>} : vector<32x64xbf16>, vector<64x512xbf16>, vector<32x512xf32> -> vector<32x512xf32>
    %c0_3 = arith.constant 0 : index
    %c0_4 = arith.constant 0 : index
    %3 = vector.load %arg3[%c0_3, %c0_4] : memref<1x512xf32, #tpu.memory_space<vmem>>, vector<1x512xf32>
    %4 = vector.broadcast %3 : vector<1x512xf32> to vector<32x512xf32>
    %5 = arith.addf %2, %4 : vector<32x512xf32>
    %6 = arith.truncf %5 : vector<32x512xf32> to vector<32x512xbf16>
    %c0_5 = arith.constant 0 : index
    %c0_6 = arith.constant 0 : index
    %7 = vector.load %arg4[%c0_5, %c0_6] : memref<32x512xbf16, #tpu.memory_space<vmem>>, vector<32x512xbf16>
    tpu.vector_store %arg4[%c0_5, %c0_6], %6 {strides = array<i32>} : memref<32x512xbf16, #tpu.memory_space<vmem>>, vector<32x512xbf16>,
    %cst_7 = arith.constant dense<0.000000e+00> : vector<512xf32>
    %8 = vector.multi_reduction <add>, %5, %cst_7 [0] : vector<32x512xf32> to vector<512xf32>
    %9 = vector.shape_cast %8 : vector<512xf32> to vector<1x512xf32>
    %c0_8 = arith.constant 0 : index
    %c0_9 = arith.constant 0 : index
    %c0_10 = arith.constant 0 : index
    %10 = vector.load %arg5[%c0_8, %c0_9, %c0_10] : memref<1x1x512xf32, #tpu.memory_space<vmem>>, vector<1x1x512xf32>
    %11 = vector.shape_cast %10 : vector<1x1x512xf32> to vector<1x512xf32>
    %12 = vector.shape_cast %9 : vector<1x512xf32> to vector<1x1x512xf32>
    tpu.vector_store %arg5[%c0_8, %c0_9, %c0_10], %12 {strides = array<i32>} : memref<1x1x512xf32, #tpu.memory_space<vmem>>, vector<1x1x512xf32>,
    %13 = arith.mulf %5, %5 : vector<32x512xf32>
    %cst_11 = arith.constant dense<0.000000e+00> : vector<512xf32>
    %14 = vector.multi_reduction <add>, %13, %cst_11 [0] : vector<32x512xf32> to vector<512xf32>
    %15 = vector.shape_cast %14 : vector<512xf32> to vector<1x512xf32>
    %c0_12 = arith.constant 0 : index
    %c0_13 = arith.constant 0 : index
    %c0_14 = arith.constant 0 : index
    %16 = vector.load %arg6[%c0_12, %c0_13, %c0_14] : memref<1x1x512xf32, #tpu.memory_space<vmem>>, vector<1x1x512xf32>
    %17 = vector.shape_cast %16 : vector<1x1x512xf32> to vector<1x512xf32>
    %18 = vector.shape_cast %15 : vector<1x512xf32> to vector<1x1x512xf32>
    tpu.vector_store %arg6[%c0_12, %c0_13, %c0_14], %18 {strides = array<i32>} : memref<1x1x512xf32, #tpu.memory_space<vmem>>, vector<1x1x512xf32>,
    return
  }
  func.func @transform_0(%arg0: i32) -> (i32, i32) {
    %c0_i32 = arith.constant 0 : i32
    %c0_i32_0 = arith.constant 0 : i32
    return %arg0, %c0_i32 : i32, i32
  }
  func.func @transform_1(%arg0: i32) -> (i32, i32) {
    %c0_i32 = arith.constant 0 : i32
    %c0_i32_0 = arith.constant 0 : i32
    %c0_i32_1 = arith.constant 0 : i32
    return %c0_i32, %c0_i32_0 : i32, i32
  }
  func.func @transform_2(%arg0: i32) -> (i32, i32) {
    %c0_i32 = arith.constant 0 : i32
    %c0_i32_0 = arith.constant 0 : i32
    %c0_i32_1 = arith.constant 0 : i32
    return %c0_i32, %c0_i32_0 : i32, i32
  }
  func.func @transform_3(%arg0: i32) -> (i32, i32) {
    %c0_i32 = arith.constant 0 : i32
    %c0_i32_0 = arith.constant 0 : i32
    return %arg0, %c0_i32 : i32, i32
  }
  func.func @transform_4(%arg0: i32) -> (i32, i32, i32) {
    %c0_i32 = arith.constant 0 : i32
    %c0_i32_0 = arith.constant 0 : i32
    %c0_i32_1 = arith.constant 0 : i32
    return %arg0, %c0_i32, %c0_i32_0 : i32, i32, i32
  }
  func.func @transform_5(%arg0: i32) -> (i32, i32, i32) {
    %c0_i32 = arith.constant 0 : i32
    %c0_i32_0 = arith.constant 0 : i32
    %c0_i32_1 = arith.constant 0 : i32
    return %arg0, %c0_i32, %c0_i32_0 : i32, i32, i32
  }
}

module attributes {stable_mosaic.version = 11 : i64} {
  func.func @_conv_mm_kernel(%arg0: i32, %arg1: memref<32x512xbf16, #tpu.memory_space<vmem>>, %arg2: memref<512x128xbf16, #tpu.memory_space<vmem>>, %arg3: memref<1x128xf32, #tpu.memory_space<vmem>>, %arg4: memref<1x512xf32, #tpu.memory_space<vmem>>, %arg5: memref<1x512xf32, #tpu.memory_space<vmem>>, %arg6: memref<32x128xbf16, #tpu.memory_space<vmem>>, %arg7: memref<1x1x128xf32, #tpu.memory_space<vmem>>, %arg8: memref<1x1x128xf32, #tpu.memory_space<vmem>>) attributes {dimension_semantics = [#tpu.dimension_semantics<parallel>], iteration_bounds = array<i64: 1>, scalar_prefetch = 0 : i64, scratch_operands = 0 : i64, tpu.core_type = #tpu.core_type<tc>, window_params = [{transform_indices = @transform_0, window_bounds = array<i64: 32, 512>}, {pipeline_mode = #tpu.pipeline_mode<synchronous>, transform_indices = @transform_1, window_bounds = array<i64: 512, 128>}, {pipeline_mode = #tpu.pipeline_mode<synchronous>, transform_indices = @transform_2, window_bounds = array<i64: 1, 128>}, {pipeline_mode = #tpu.pipeline_mode<synchronous>, transform_indices = @transform_3, window_bounds = array<i64: 1, 512>}, {pipeline_mode = #tpu.pipeline_mode<synchronous>, transform_indices = @transform_4, window_bounds = array<i64: 1, 512>}, {transform_indices = @transform_5, window_bounds = array<i64: 32, 128>}, {transform_indices = @transform_6, window_bounds = array<i64: 1, 1, 128>}, {transform_indices = @transform_7, window_bounds = array<i64: 1, 1, 128>}]} {
    %c0 = arith.constant 0 : index
    %c0_0 = arith.constant 0 : index
    %0 = vector.load %arg1[%c0, %c0_0] : memref<32x512xbf16, #tpu.memory_space<vmem>>, vector<32x512xbf16>
    %1 = arith.extf %0 : vector<32x512xbf16> to vector<32x512xf32>
    %c0_1 = arith.constant 0 : index
    %c0_2 = arith.constant 0 : index
    %2 = vector.load %arg4[%c0_1, %c0_2] : memref<1x512xf32, #tpu.memory_space<vmem>>, vector<1x512xf32>
    %3 = vector.broadcast %2 : vector<1x512xf32> to vector<32x512xf32>
    %4 = arith.mulf %1, %3 : vector<32x512xf32>
    %c0_3 = arith.constant 0 : index
    %c0_4 = arith.constant 0 : index
    %5 = vector.load %arg5[%c0_3, %c0_4] : memref<1x512xf32, #tpu.memory_space<vmem>>, vector<1x512xf32>
    %6 = vector.broadcast %5 : vector<1x512xf32> to vector<32x512xf32>
    %7 = arith.addf %4, %6 : vector<32x512xf32>
    %cst = arith.constant 0.000000e+00 : f32
    %8 = vector.broadcast %cst : f32 to vector<32x512xf32>
    %9 = arith.subf %8, %7 : vector<32x512xf32>
    %10 = math.exp %9 : vector<32x512xf32>
    %cst_5 = arith.constant 1.000000e+00 : f32
    %11 = vector.broadcast %cst_5 : f32 to vector<32x512xf32>
    %12 = arith.addf %11, %10 : vector<32x512xf32>
    %13 = tpu.reciprocal %12 {approx = true} : vector<32x512xf32> -> vector<32x512xf32>
    %14 = arith.mulf %7, %13 : vector<32x512xf32>
    %15 = arith.truncf %14 : vector<32x512xf32> to vector<32x512xbf16>
    %c0_6 = arith.constant 0 : index
    %c0_7 = arith.constant 0 : index
    %16 = vector.load %arg2[%c0_6, %c0_7] : memref<512x128xbf16, #tpu.memory_space<vmem>>, vector<512x128xbf16>
    %cst_8 = arith.constant dense<0.000000e+00> : vector<32x128xf32>
    %17 = tpu.matmul %15, %16, %cst_8 {dimension_numbers = #tpu.dot_dimension_numbers<[1], [0], [0], [1], [0, 0, 1, 1], [], []>} : vector<32x512xbf16>, vector<512x128xbf16>, vector<32x128xf32> -> vector<32x128xf32>
    %c0_9 = arith.constant 0 : index
    %c0_10 = arith.constant 0 : index
    %18 = vector.load %arg3[%c0_9, %c0_10] : memref<1x128xf32, #tpu.memory_space<vmem>>, vector<1x128xf32>
    %19 = vector.broadcast %18 : vector<1x128xf32> to vector<32x128xf32>
    %20 = arith.addf %17, %19 : vector<32x128xf32>
    %21 = arith.truncf %20 : vector<32x128xf32> to vector<32x128xbf16>
    %c0_11 = arith.constant 0 : index
    %c0_12 = arith.constant 0 : index
    %22 = vector.load %arg6[%c0_11, %c0_12] : memref<32x128xbf16, #tpu.memory_space<vmem>>, vector<32x128xbf16>
    tpu.vector_store %arg6[%c0_11, %c0_12], %21 {strides = array<i32>} : memref<32x128xbf16, #tpu.memory_space<vmem>>, vector<32x128xbf16>,
    %cst_13 = arith.constant dense<0.000000e+00> : vector<128xf32>
    %23 = vector.multi_reduction <add>, %20, %cst_13 [0] : vector<32x128xf32> to vector<128xf32>
    %24 = vector.shape_cast %23 : vector<128xf32> to vector<1x128xf32>
    %c0_14 = arith.constant 0 : index
    %c0_15 = arith.constant 0 : index
    %c0_16 = arith.constant 0 : index
    %25 = vector.load %arg7[%c0_14, %c0_15, %c0_16] : memref<1x1x128xf32, #tpu.memory_space<vmem>>, vector<1x1x128xf32>
    %26 = vector.shape_cast %25 : vector<1x1x128xf32> to vector<1x128xf32>
    %27 = vector.shape_cast %24 : vector<1x128xf32> to vector<1x1x128xf32>
    tpu.vector_store %arg7[%c0_14, %c0_15, %c0_16], %27 {strides = array<i32>} : memref<1x1x128xf32, #tpu.memory_space<vmem>>, vector<1x1x128xf32>,
    %28 = arith.mulf %20, %20 : vector<32x128xf32>
    %cst_17 = arith.constant dense<0.000000e+00> : vector<128xf32>
    %29 = vector.multi_reduction <add>, %28, %cst_17 [0] : vector<32x128xf32> to vector<128xf32>
    %30 = vector.shape_cast %29 : vector<128xf32> to vector<1x128xf32>
    %c0_18 = arith.constant 0 : index
    %c0_19 = arith.constant 0 : index
    %c0_20 = arith.constant 0 : index
    %31 = vector.load %arg8[%c0_18, %c0_19, %c0_20] : memref<1x1x128xf32, #tpu.memory_space<vmem>>, vector<1x1x128xf32>
    %32 = vector.shape_cast %31 : vector<1x1x128xf32> to vector<1x128xf32>
    %33 = vector.shape_cast %30 : vector<1x128xf32> to vector<1x1x128xf32>
    tpu.vector_store %arg8[%c0_18, %c0_19, %c0_20], %33 {strides = array<i32>} : memref<1x1x128xf32, #tpu.memory_space<vmem>>, vector<1x1x128xf32>,
    return
  }
  func.func @transform_0(%arg0: i32) -> (i32, i32) {
    %c0_i32 = arith.constant 0 : i32
    %c0_i32_0 = arith.constant 0 : i32
    return %arg0, %c0_i32 : i32, i32
  }
  func.func @transform_1(%arg0: i32) -> (i32, i32) {
    %c0_i32 = arith.constant 0 : i32
    %c0_i32_0 = arith.constant 0 : i32
    %c0_i32_1 = arith.constant 0 : i32
    return %c0_i32, %c0_i32_0 : i32, i32
  }
  func.func @transform_2(%arg0: i32) -> (i32, i32) {
    %c0_i32 = arith.constant 0 : i32
    %c0_i32_0 = arith.constant 0 : i32
    %c0_i32_1 = arith.constant 0 : i32
    return %c0_i32, %c0_i32_0 : i32, i32
  }
  func.func @transform_3(%arg0: i32) -> (i32, i32) {
    %c0_i32 = arith.constant 0 : i32
    %c0_i32_0 = arith.constant 0 : i32
    %c0_i32_1 = arith.constant 0 : i32
    return %c0_i32, %c0_i32_0 : i32, i32
  }
  func.func @transform_4(%arg0: i32) -> (i32, i32) {
    %c0_i32 = arith.constant 0 : i32
    %c0_i32_0 = arith.constant 0 : i32
    %c0_i32_1 = arith.constant 0 : i32
    return %c0_i32, %c0_i32_0 : i32, i32
  }
  func.func @transform_5(%arg0: i32) -> (i32, i32) {
    %c0_i32 = arith.constant 0 : i32
    %c0_i32_0 = arith.constant 0 : i32
    return %arg0, %c0_i32 : i32, i32
  }
  func.func @transform_6(%arg0: i32) -> (i32, i32, i32) {
    %c0_i32 = arith.constant 0 : i32
    %c0_i32_0 = arith.constant 0 : i32
    %c0_i32_1 = arith.constant 0 : i32
    return %arg0, %c0_i32, %c0_i32_0 : i32, i32, i32
  }
  func.func @transform_7(%arg0: i32) -> (i32, i32, i32) {
    %c0_i32 = arith.constant 0 : i32
    %c0_i32_0 = arith.constant 0 : i32
    %c0_i32_1 = arith.constant 0 : i32
    return %arg0, %c0_i32, %c0_i32_0 : i32, i32, i32
  }
}

module attributes {stable_mosaic.version = 11 : i64} {
  func.func @_conv_mm_kernel(%arg0: i32, %arg1: memref<512x4xbf16, #tpu.memory_space<vmem>>, %arg2: memref<4x128xbf16, #tpu.memory_space<vmem>>, %arg3: memref<1x128xf32, #tpu.memory_space<vmem>>, %arg4: memref<512x128xbf16, #tpu.memory_space<vmem>>, %arg5: memref<1x1x128xf32, #tpu.memory_space<vmem>>, %arg6: memref<1x1x128xf32, #tpu.memory_space<vmem>>) attributes {dimension_semantics = [#tpu.dimension_semantics<parallel>], iteration_bounds = array<i64: 1>, scalar_prefetch = 0 : i64, scratch_operands = 0 : i64, tpu.core_type = #tpu.core_type<tc>, window_params = [{transform_indices = @transform_0, window_bounds = array<i64: 512, 4>}, {pipeline_mode = #tpu.pipeline_mode<synchronous>, transform_indices = @transform_1, window_bounds = array<i64: 4, 128>}, {pipeline_mode = #tpu.pipeline_mode<synchronous>, transform_indices = @transform_2, window_bounds = array<i64: 1, 128>}, {transform_indices = @transform_3, window_bounds = array<i64: 512, 128>}, {transform_indices = @transform_4, window_bounds = array<i64: 1, 1, 128>}, {transform_indices = @transform_5, window_bounds = array<i64: 1, 1, 128>}]} {
    %c0 = arith.constant 0 : index
    %c0_0 = arith.constant 0 : index
    %0 = vector.load %arg1[%c0, %c0_0] : memref<512x4xbf16, #tpu.memory_space<vmem>>, vector<512x4xbf16>
    %c0_1 = arith.constant 0 : index
    %c0_2 = arith.constant 0 : index
    %1 = vector.load %arg2[%c0_1, %c0_2] : memref<4x128xbf16, #tpu.memory_space<vmem>>, vector<4x128xbf16>
    %cst = arith.constant dense<0.000000e+00> : vector<512x128xf32>
    %2 = tpu.matmul %0, %1, %cst {dimension_numbers = #tpu.dot_dimension_numbers<[1], [0], [0], [1], [0, 0, 1, 1], [], []>} : vector<512x4xbf16>, vector<4x128xbf16>, vector<512x128xf32> -> vector<512x128xf32>
    %c0_3 = arith.constant 0 : index
    %c0_4 = arith.constant 0 : index
    %3 = vector.load %arg3[%c0_3, %c0_4] : memref<1x128xf32, #tpu.memory_space<vmem>>, vector<1x128xf32>
    %4 = vector.broadcast %3 : vector<1x128xf32> to vector<512x128xf32>
    %5 = arith.addf %2, %4 : vector<512x128xf32>
    %6 = arith.truncf %5 : vector<512x128xf32> to vector<512x128xbf16>
    %c0_5 = arith.constant 0 : index
    %c0_6 = arith.constant 0 : index
    %7 = vector.load %arg4[%c0_5, %c0_6] : memref<512x128xbf16, #tpu.memory_space<vmem>>, vector<512x128xbf16>
    tpu.vector_store %arg4[%c0_5, %c0_6], %6 {strides = array<i32>} : memref<512x128xbf16, #tpu.memory_space<vmem>>, vector<512x128xbf16>,
    %cst_7 = arith.constant dense<0.000000e+00> : vector<128xf32>
    %8 = vector.multi_reduction <add>, %5, %cst_7 [0] : vector<512x128xf32> to vector<128xf32>
    %9 = vector.shape_cast %8 : vector<128xf32> to vector<1x128xf32>
    %c0_8 = arith.constant 0 : index
    %c0_9 = arith.constant 0 : index
    %c0_10 = arith.constant 0 : index
    %10 = vector.load %arg5[%c0_8, %c0_9, %c0_10] : memref<1x1x128xf32, #tpu.memory_space<vmem>>, vector<1x1x128xf32>
    %11 = vector.shape_cast %10 : vector<1x1x128xf32> to vector<1x128xf32>
    %12 = vector.shape_cast %9 : vector<1x128xf32> to vector<1x1x128xf32>
    tpu.vector_store %arg5[%c0_8, %c0_9, %c0_10], %12 {strides = array<i32>} : memref<1x1x128xf32, #tpu.memory_space<vmem>>, vector<1x1x128xf32>,
    %13 = arith.mulf %5, %5 : vector<512x128xf32>
    %cst_11 = arith.constant dense<0.000000e+00> : vector<128xf32>
    %14 = vector.multi_reduction <add>, %13, %cst_11 [0] : vector<512x128xf32> to vector<128xf32>
    %15 = vector.shape_cast %14 : vector<128xf32> to vector<1x128xf32>
    %c0_12 = arith.constant 0 : index
    %c0_13 = arith.constant 0 : index
    %c0_14 = arith.constant 0 : index
    %16 = vector.load %arg6[%c0_12, %c0_13, %c0_14] : memref<1x1x128xf32, #tpu.memory_space<vmem>>, vector<1x1x128xf32>
    %17 = vector.shape_cast %16 : vector<1x1x128xf32> to vector<1x128xf32>
    %18 = vector.shape_cast %15 : vector<1x128xf32> to vector<1x1x128xf32>
    tpu.vector_store %arg6[%c0_12, %c0_13, %c0_14], %18 {strides = array<i32>} : memref<1x1x128xf32, #tpu.memory_space<vmem>>, vector<1x1x128xf32>,
    return
  }
  func.func @transform_0(%arg0: i32) -> (i32, i32) {
    %c0_i32 = arith.constant 0 : i32
    %c0_i32_0 = arith.constant 0 : i32
    return %arg0, %c0_i32 : i32, i32
  }
  func.func @transform_1(%arg0: i32) -> (i32, i32) {
    %c0_i32 = arith.constant 0 : i32
    %c0_i32_0 = arith.constant 0 : i32
    %c0_i32_1 = arith.constant 0 : i32
    return %c0_i32, %c0_i32_0 : i32, i32
  }
  func.func @transform_2(%arg0: i32) -> (i32, i32) {
    %c0_i32 = arith.constant 0 : i32
    %c0_i32_0 = arith.constant 0 : i32
    %c0_i32_1 = arith.constant 0 : i32
    return %c0_i32, %c0_i32_0 : i32, i32
  }
  func.func @transform_3(%arg0: i32) -> (i32, i32) {
    %c0_i32 = arith.constant 0 : i32
    %c0_i32_0 = arith.constant 0 : i32
    return %arg0, %c0_i32 : i32, i32
  }
  func.func @transform_4(%arg0: i32) -> (i32, i32, i32) {
    %c0_i32 = arith.constant 0 : i32
    %c0_i32_0 = arith.constant 0 : i32
    %c0_i32_1 = arith.constant 0 : i32
    return %arg0, %c0_i32, %c0_i32_0 : i32, i32, i32
  }
  func.func @transform_5(%arg0: i32) -> (i32, i32, i32) {
    %c0_i32 = arith.constant 0 : i32
    %c0_i32_0 = arith.constant 0 : i32
    %c0_i32_1 = arith.constant 0 : i32
    return %arg0, %c0_i32, %c0_i32_0 : i32, i32, i32
  }
}

module attributes {stable_mosaic.version = 11 : i64} {
  func.func @_fuse_out_kernel(%arg0: i32, %arg1: i32, %arg2: memref<1x16x16x128xbf16, #tpu.memory_space<vmem>>, %arg3: memref<1x4x512xbf16, #tpu.memory_space<vmem>>, %arg4: memref<16x4xbf16, #tpu.memory_space<vmem>>, %arg5: memref<16x4xbf16, #tpu.memory_space<vmem>>, %arg6: memref<1x128xf32, #tpu.memory_space<vmem>>, %arg7: memref<1x128xf32, #tpu.memory_space<vmem>>, %arg8: memref<1x128xf32, #tpu.memory_space<vmem>>, %arg9: memref<1x128xf32, #tpu.memory_space<vmem>>, %arg10: memref<1x16x16x128xf32, #tpu.memory_space<vmem>>) attributes {dimension_semantics = [#tpu.dimension_semantics<parallel>, #tpu.dimension_semantics<parallel>], iteration_bounds = array<i64: 2, 1>, scalar_prefetch = 0 : i64, scratch_operands = 0 : i64, tpu.core_type = #tpu.core_type<tc>, window_params = [{transform_indices = @transform_0, window_bounds = array<i64: 1, 16, 16, 128>}, {transform_indices = @transform_1, window_bounds = array<i64: 1, 4, 512>}, {transform_indices = @transform_2, window_bounds = array<i64: 16, 4>}, {pipeline_mode = #tpu.pipeline_mode<synchronous>, transform_indices = @transform_3, window_bounds = array<i64: 16, 4>}, {pipeline_mode = #tpu.pipeline_mode<synchronous>, transform_indices = @transform_4, window_bounds = array<i64: 1, 128>}, {pipeline_mode = #tpu.pipeline_mode<synchronous>, transform_indices = @transform_5, window_bounds = array<i64: 1, 128>}, {pipeline_mode = #tpu.pipeline_mode<synchronous>, transform_indices = @transform_6, window_bounds = array<i64: 1, 128>}, {pipeline_mode = #tpu.pipeline_mode<synchronous>, transform_indices = @transform_7, window_bounds = array<i64: 1, 128>}, {transform_indices = @transform_8, window_bounds = array<i64: 1, 16, 16, 128>}]} {
    %c0 = arith.constant 0 : index
    %c0_0 = arith.constant 0 : index
    %0 = vector.load %arg4[%c0, %c0_0] : memref<16x4xbf16, #tpu.memory_space<vmem>>, vector<16x4xbf16>
    %c0_1 = arith.constant 0 : index
    %c0_2 = arith.constant 0 : index
    %c0_3 = arith.constant 0 : index
    %1 = vector.load %arg3[%c0_1, %c0_2, %c0_3] : memref<1x4x512xbf16, #tpu.memory_space<vmem>>, vector<1x4x512xbf16>
    %2 = vector.shape_cast %1 : vector<1x4x512xbf16> to vector<4x512xbf16>
    %cst = arith.constant dense<0.000000e+00> : vector<16x512xf32>
    %3 = tpu.matmul %0, %2, %cst {dimension_numbers = #tpu.dot_dimension_numbers<[1], [0], [0], [1], [0, 0, 1, 1], [], []>} : vector<16x4xbf16>, vector<4x512xbf16>, vector<16x512xf32> -> vector<16x512xf32>
    %4 = vector.shape_cast %3 : vector<16x512xf32> to vector<16x4x128xf32>
    %5 = arith.truncf %4 : vector<16x4x128xf32> to vector<16x4x128xbf16>
    %c0_4 = arith.constant 0 : index
    %c0_5 = arith.constant 0 : index
    %6 = vector.load %arg5[%c0_4, %c0_5] : memref<16x4xbf16, #tpu.memory_space<vmem>>, vector<16x4xbf16>
    %7 = vector.shape_cast %6 : vector<16x4xbf16> to vector<1x16x4xbf16>
    %8 = vector.shape_cast %7 : vector<1x16x4xbf16> to vector<1x16x4xbf16>
    %9 = vector.broadcast %8 : vector<1x16x4xbf16> to vector<16x16x4xbf16>
    %cst_6 = arith.constant dense<0.000000e+00> : vector<16x16x128xf32>
    %10 = tpu.matmul %9, %5, %cst_6 {dimension_numbers = #tpu.dot_dimension_numbers<[2], [1], [1], [2], [0, 0, 0, 1, 1, 2], [0], [0]>} : vector<16x16x4xbf16>, vector<16x4x128xbf16>, vector<16x16x128xf32> -> vector<16x16x128xf32>
    %c0_7 = arith.constant 0 : index
    %c0_8 = arith.constant 0 : index
    %11 = vector.load %arg8[%c0_7, %c0_8] : memref<1x128xf32, #tpu.memory_space<vmem>>, vector<1x128xf32>
    %12 = vector.shape_cast %11 : vector<1x128xf32> to vector<1x1x128xf32>
    %13 = vector.broadcast %12 : vector<1x1x128xf32> to vector<16x16x128xf32>
    %14 = arith.mulf %10, %13 : vector<16x16x128xf32>
    %c0_9 = arith.constant 0 : index
    %c0_10 = arith.constant 0 : index
    %15 = vector.load %arg9[%c0_9, %c0_10] : memref<1x128xf32, #tpu.memory_space<vmem>>, vector<1x128xf32>
    %16 = vector.shape_cast %15 : vector<1x128xf32> to vector<1x1x128xf32>
    %17 = vector.broadcast %16 : vector<1x1x128xf32> to vector<16x16x128xf32>
    %18 = arith.addf %14, %17 : vector<16x16x128xf32>
    %c0_11 = arith.constant 0 : index
    %c0_12 = arith.constant 0 : index
    %c0_13 = arith.constant 0 : index
    %c0_14 = arith.constant 0 : index
    %19 = vector.load %arg2[%c0_11, %c0_12, %c0_13, %c0_14] : memref<1x16x16x128xbf16, #tpu.memory_space<vmem>>, vector<1x16x16x128xbf16>
    %20 = vector.shape_cast %19 : vector<1x16x16x128xbf16> to vector<16x16x128xbf16>
    %21 = arith.extf %20 : vector<16x16x128xbf16> to vector<16x16x128xf32>
    %c0_15 = arith.constant 0 : index
    %c0_16 = arith.constant 0 : index
    %22 = vector.load %arg6[%c0_15, %c0_16] : memref<1x128xf32, #tpu.memory_space<vmem>>, vector<1x128xf32>
    %23 = vector.shape_cast %22 : vector<1x128xf32> to vector<1x1x128xf32>
    %24 = vector.broadcast %23 : vector<1x1x128xf32> to vector<16x16x128xf32>
    %25 = arith.mulf %21, %24 : vector<16x16x128xf32>
    %c0_17 = arith.constant 0 : index
    %c0_18 = arith.constant 0 : index
    %26 = vector.load %arg7[%c0_17, %c0_18] : memref<1x128xf32, #tpu.memory_space<vmem>>, vector<1x128xf32>
    %27 = vector.shape_cast %26 : vector<1x128xf32> to vector<1x1x128xf32>
    %28 = vector.broadcast %27 : vector<1x1x128xf32> to vector<16x16x128xf32>
    %29 = arith.addf %25, %28 : vector<16x16x128xf32>
    %30 = arith.addf %29, %18 : vector<16x16x128xf32>
    %cst_19 = arith.constant 0.000000e+00 : f32
    %31 = vector.broadcast %cst_19 : f32 to vector<16x16x128xf32>
    %32 = arith.subf %31, %30 : vector<16x16x128xf32>
    %33 = math.exp %32 : vector<16x16x128xf32>
    %cst_20 = arith.constant 1.000000e+00 : f32
    %34 = vector.broadcast %cst_20 : f32 to vector<16x16x128xf32>
    %35 = arith.addf %34, %33 : vector<16x16x128xf32>
    %36 = tpu.reciprocal %35 {approx = true} : vector<16x16x128xf32> -> vector<16x16x128xf32>
    %37 = arith.mulf %30, %36 : vector<16x16x128xf32>
    %c0_21 = arith.constant 0 : index
    %c0_22 = arith.constant 0 : index
    %c0_23 = arith.constant 0 : index
    %c0_24 = arith.constant 0 : index
    %38 = vector.load %arg10[%c0_21, %c0_22, %c0_23, %c0_24] : memref<1x16x16x128xf32, #tpu.memory_space<vmem>>, vector<1x16x16x128xf32>
    %39 = vector.shape_cast %38 : vector<1x16x16x128xf32> to vector<16x16x128xf32>
    %40 = vector.shape_cast %37 : vector<16x16x128xf32> to vector<1x16x16x128xf32>
    tpu.vector_store %arg10[%c0_21, %c0_22, %c0_23, %c0_24], %40 {strides = array<i32>} : memref<1x16x16x128xf32, #tpu.memory_space<vmem>>, vector<1x16x16x128xf32>,
    return
  }
  func.func @transform_0(%arg0: i32, %arg1: i32) -> (i32, i32, i32, i32) {
    %c0_i32 = arith.constant 0 : i32
    %c0_i32_0 = arith.constant 0 : i32
    %c0_i32_1 = arith.constant 0 : i32
    return %arg0, %arg1, %c0_i32, %c0_i32_0 : i32, i32, i32, i32
  }
  func.func @transform_1(%arg0: i32, %arg1: i32) -> (i32, i32, i32) {
    %c0_i32 = arith.constant 0 : i32
    %c0_i32_0 = arith.constant 0 : i32
    %c0_i32_1 = arith.constant 0 : i32
    return %arg0, %c0_i32, %c0_i32_0 : i32, i32, i32
  }
  func.func @transform_2(%arg0: i32, %arg1: i32) -> (i32, i32) {
    %c0_i32 = arith.constant 0 : i32
    %c0_i32_0 = arith.constant 0 : i32
    return %arg1, %c0_i32 : i32, i32
  }
  func.func @transform_3(%arg0: i32, %arg1: i32) -> (i32, i32) {
    %c0_i32 = arith.constant 0 : i32
    %c0_i32_0 = arith.constant 0 : i32
    %c0_i32_1 = arith.constant 0 : i32
    return %c0_i32, %c0_i32_0 : i32, i32
  }
  func.func @transform_4(%arg0: i32, %arg1: i32) -> (i32, i32) {
    %c0_i32 = arith.constant 0 : i32
    %c0_i32_0 = arith.constant 0 : i32
    %c0_i32_1 = arith.constant 0 : i32
    return %c0_i32, %c0_i32_0 : i32, i32
  }
  func.func @transform_5(%arg0: i32, %arg1: i32) -> (i32, i32) {
    %c0_i32 = arith.constant 0 : i32
    %c0_i32_0 = arith.constant 0 : i32
    %c0_i32_1 = arith.constant 0 : i32
    return %c0_i32, %c0_i32_0 : i32, i32
  }
  func.func @transform_6(%arg0: i32, %arg1: i32) -> (i32, i32) {
    %c0_i32 = arith.constant 0 : i32
    %c0_i32_0 = arith.constant 0 : i32
    %c0_i32_1 = arith.constant 0 : i32
    return %c0_i32, %c0_i32_0 : i32, i32
  }
  func.func @transform_7(%arg0: i32, %arg1: i32) -> (i32, i32) {
    %c0_i32 = arith.constant 0 : i32
    %c0_i32_0 = arith.constant 0 : i32
    %c0_i32_1 = arith.constant 0 : i32
    return %c0_i32, %c0_i32_0 : i32, i32
  }
  func.func @transform_8(%arg0: i32, %arg1: i32) -> (i32, i32, i32, i32) {
    %c0_i32 = arith.constant 0 : i32
    %c0_i32_0 = arith.constant 0 : i32
    %c0_i32_1 = arith.constant 0 : i32
    return %arg0, %arg1, %c0_i32, %c0_i32_0 : i32, i32, i32, i32
  }
}

</mosaic_0001>

<bundles_post_ra>
// kernel: simple_downsample.5
= control target key start
LH: loop header
LB: loop body
LE: loop exit
PB: predicated region body
PF: predicated region fallthrough
CT: control target
= control target key end

     0   :  { %v549_v1 = vmov 0   ;;  %vm150_vm0 = vcmask 523264   ;;  %v40_v19 = vlaneseq  ;;  %v550_v34 = vmov 1966171168   ;;  %s706_s1 = inlined_call_operand.vmem [shape: bf16[64,512], index: 1, kind: input, shape index: {}]   ;;  %s707_s0 = inlined_call_operand.vmem [shape: bf16[32,64], index: 0, kind: input, shape index: {}]   ;;  %s708_s2 = inlined_call_operand.vmem [shape: f32[1,512], index: 2, kind: input, shape index: {}]   ;;  %s709_s3 = inlined_call_operand.vmem [shape: bf16[32,512], index: 3, kind: output, shape index: {0}]   ;;  %s710_s4 = inlined_call_operand.vmem [shape: f32[1,1,512], index: 4, kind: output, shape index: {1}]   ;;  %s711_s5 = inlined_call_operand.vmem [shape: f32[1,1,512], index: 5, kind: output, shape index: {2}]  }
   0x1   :  { %v523_v0 = vld [vmem:[%s706_s1 + $0x64] ss:$16 sps:$4 sm:$0xff]   ;;  %189 = vmatprep.mubr.bf16.mxu0 %v549_v1  ;;  %242 = vmatprep.mubr.bf16.mxu1 %v549_v1  ;;  %v525_v2 = vld [vmem:[%s706_s1 + $0x6c] ss:$16 sps:$4 sm:$0xff]   ;;  %v527_v3 = vld [vmem:[%s706_s1 + $0x60] ss:$16 sps:$4 sm:$0xff]   ;;  %v653_v35 = vunpack.c.l.s4 %v550_v34 }
   0x2   :  { %165 = vmatprep.subr.bf16.mxu0 %v523_v0  ;;  %v528_v4 = vld [vmem:[%s706_s1 + $0x68] ss:$16 sps:$4 sm:$0xff]   ;;  %218 = vmatprep.subr.bf16.mxu1 %v525_v2  ;;  %v529_v5 = vld [vmem:[%s706_s1 + $0x44] ss:$16 sps:$4 sm:$0xff]   ;;  %v531_v6 = vld [vmem:[%s706_s1 + $0x4c] ss:$16 sps:$4 sm:$0xff]  }
   0x3   :  { %166 = vmatpush1.bf16.msra.mxu0 %v527_v3  ;;  %219 = vmatpush1.bf16.msra.mxu1 %v528_v4  ;;  %v533_v7 = vld [vmem:[%s706_s1 + $0x40] ss:$16 sps:$4 sm:$0xff]   ;;  %v534_v8 = vld [vmem:[%s706_s1 + $0x48] ss:$16 sps:$4 sm:$0xff]   ;;  %v535_v9 = vld [vmem:[%s706_s1 + $0x24] ss:$16 sps:$4 sm:$0xff]   ;;  %v363_v50 = vunpack.c.0.s8 %v653_v35 }
   0x4   :  { %167 = vmatprep.subr.bf16.mxu0 %v529_v5  ;;  %220 = vmatprep.subr.bf16.mxu1 %v531_v6  ;;  %v537_v10 = vld [vmem:[%s706_s1 + $0x2c] ss:$16 sps:$4 sm:$0xff]   ;;  %v539_v11 = vld [vmem:[%s706_s1 + $0x20] ss:$16 sps:$4 sm:$0xff]   ;;  %v540_v12 = vld [vmem:[%s706_s1 + $0x28] ss:$16 sps:$4 sm:$0xff]  }
   0x5   :  { %v541_v13 = vld [vmem:[%s706_s1 + $0x4] ss:$16 sps:$4 sm:$0xff]   ;;  %v543_v14 = vld [vmem:[%s706_s1 + $0xc] ss:$16 sps:$4 sm:$0xff]   ;;  %v545_v15 = vld [vmem:[%s706_s1] ss:$16 sps:$4 sm:$0xff]  }
   0x6   :  { %v546_v16 = vld [vmem:[%s706_s1 + $0x8] ss:$16 sps:$4 sm:$0xff]   ;;  %v547_v17 = vld [vmem:[%s707_s0] sm:$0xff]   ;;  %v636_v20 = vshrl.u32 %v40_v19, 7  ;;  %vm386_vm1 = vcmp.lt.s32.totalorder %v40_v19, 512 }
   0x7   :  { %168 = vmatpush1.bf16.msra.mxu0 %v533_v7  ;;  %221 = vmatpush1.bf16.msra.mxu1 %v534_v8  ;;  %v548_v18 = vld [vmem:[%s707_s0 + $0x8] sm:$0xff]   ;;  %v38_v22 = vld [vmem:[%s708_s2] sm:$0xf] }
   0x8   :  { %169 = vmatprep.subr.bf16.mxu0 %v535_v9  ;;  %222 = vmatprep.subr.bf16.mxu1 %v537_v10  ;;  %v42_v21 = vsub.s32 0, %v636_v20  ;;  %v50_v23 = vsub.s32 2, %v636_v20  ;;  %v46_v24 = vsub.s32 1, %v636_v20  ;;  %v54_v25 = vsub.s32 3, %v636_v20 }
   0xa   :  { %v645_v26 = vrot.slane %v38_v22, %v42_v21  ;;  %v647_v27 = vrot.slane %v38_v22, %v50_v23  ;;  %v649_v28 = vrot.slane %v38_v22, %v46_v24  ;;  %v651_v29 = vrot.slane %v38_v22, %v54_v25 }
   0xb   :  { %170 = vmatpush1.bf16.msra.mxu0 %v539_v11  ;;  %223 = vmatpush1.bf16.msra.mxu1 %v540_v12 }
   0xc   :  { %171 = vmatprep.subr.bf16.mxu0 %v541_v13  ;;  %224 = vmatprep.subr.bf16.mxu1 %v543_v14 }
   0xf   :  { %172 = vmatpush1.bf16.msra.mxu0 %v545_v15  ;;  %225 = vmatpush1.bf16.msra.mxu1 %v546_v16 }
  0x12   :  { %501 = vmatmul.mubr.msk.bf16.vlgmr.msra.gmra.mxu0 %vm150_vm0, %v547_v17  ;;  %503 = vmatmul.mubr.msk.bf16.vlgmr.msra.gmra.mxu1 %vm150_vm0, %v547_v17 }
  0x13   :  { %199 = vmatprep.mubr.bf16.mxu0 %v549_v1  ;;  %252 = vmatprep.mubr.bf16.mxu1 %v549_v1 }
  0x1a   :  { %502 = vmatmul.mubr.msk.bf16.gmra.mxu0 %vm150_vm0, %v548_v18  ;;  %504 = vmatmul.mubr.msk.bf16.gmra.mxu1 %vm150_vm0, %v548_v18 }
  0xd2   :  { %v191_v30 = vpop.f32.mrf.mxu0  ;;  %v244_v31 = vpop.f32.mrf.mxu1 }
  0xd3   :  { %v192_v36 = vadd.f32 %v191_v30, %v645_v26  ;;  %v245_v37 = vadd.f32 %v244_v31, %v647_v27 }
  0xd4   :  { %v193_v32 = vpop.f32.mrf.mxu0  ;;  %v246_v33 = vpop.f32.mrf.mxu1 }
  0xd5   :  { %v194_v38 = vadd.f32 %v193_v32, %v649_v28  ;;  %v247_v39 = vadd.f32 %v246_v33, %v651_v29  ;;  %v389_v51 = vmul.f32 %v192_v36, %v192_v36  ;;  %v391_v52 = vmul.f32 %v245_v37, %v245_v37 }
  0xd6   :  { %v195_v40 = vpop.f32.mrf.mxu0  ;;  %v248_v41 = vpop.f32.mrf.mxu1 }
  0xd7   :  { %v513_v42 = vpack.c.bf16 %v194_v38, %v192_v36  ;;  %v514_v43 = vpack.c.bf16 %v247_v39, %v245_v37  ;;  %v196_v44 = vadd.f32 %v195_v40, %v645_v26  ;;  %v249_v45 = vadd.f32 %v248_v41, %v647_v27 }
  0xd8   :  { %v197_v46 = vpop.f32.mrf.mxu0  ;;  %v250_v47 = vpop.f32.mrf.mxu1  ;;  %v390_v57 = vmul.f32 %v194_v38, %v194_v38  ;;  %v392_v61 = vmul.f32 %v247_v39, %v247_v39 }
  0xd9   :  { %311 = vst [vmem:[%s709_s3] sm:$0xff] %v513_v42  ;;  %312 = vst [vmem:[%s709_s3 + $0x8] sm:$0xff] %v514_v43  ;;  %v198_v48 = vadd.f32 %v197_v46, %v649_v28  ;;  %v251_v49 = vadd.f32 %v250_v47, %v651_v29  ;;  %v393_v53 = vmul.f32 %v196_v44, %v196_v44 }
  0xda   :  { %v395_v54 = vmul.f32 %v249_v45, %v249_v45  ;;  %v201_v55 = vpop.f32.mrf.mxu0  ;;  %v254_v56 = vpop.f32.mrf.mxu1  ;;  %v319_v62 = vadd.f32 %v196_v44, %v192_v36  ;;  %v337_v63 = vadd.f32 %v249_v45, %v245_v37 }
  0xdb   :  { %v515_v58 = vpack.c.bf16 %v198_v48, %v196_v44  ;;  %v394_v59 = vmul.f32 %v198_v48, %v198_v48  ;;  %v516_v60 = vpack.c.bf16 %v251_v49, %v249_v45  ;;  %v396_v0 = vmul.f32 %v251_v49, %v251_v49 }
  0xdc   :  { %v203_v1 = vpop.f32.mrf.mxu0  ;;  %v256_v2 = vpop.f32.mrf.mxu1  ;;  %v328_v3 = vadd.f32 %v198_v48, %v194_v38  ;;  %v202_v4 = vadd.f32 %v201_v55, %v645_v26  ;;  %v255_v5 = vadd.f32 %v254_v56, %v647_v27  ;;  %v405_v7 = vadd.f32 %v393_v53, %v389_v51 }
  0xdd   :  { %313 = vst [vmem:[%s709_s3 + $0x10] sm:$0xff] %v515_v58  ;;  %314 = vst [vmem:[%s709_s3 + $0x18] sm:$0xff] %v516_v60  ;;  %v204_v6 = vadd.f32 %v203_v1, %v649_v28  ;;  %v423_v8 = vadd.f32 %v395_v54, %v391_v52  ;;  %v346_v9 = vadd.f32 %v251_v49, %v247_v39 }
  0xde   :  { %v257_v10 = vadd.f32 %v256_v2, %v651_v29  ;;  %v205_v11 = vpop.f32.mrf.mxu0  ;;  %v258_v12 = vpop.f32.mrf.mxu1  ;;  %v414_v13 = vadd.f32 %v394_v59, %v390_v57  ;;  %v432_v14 = vadd.f32 %v396_v0, %v392_v61  ;;  %v397_v15 = vmul.f32 %v202_v4, %v202_v4 }
  0xdf   :  { %v399_v16 = vmul.f32 %v255_v5, %v255_v5  ;;  %v320_v17 = vadd.f32 %v319_v62, %v202_v4  ;;  %v517_v18 = vpack.c.bf16 %v204_v6, %v202_v4  ;;  %v398_v21 = vmul.f32 %v204_v6, %v204_v6 }
  0xe0   :  { %v518_v22 = vpack.c.bf16 %v257_v10, %v255_v5  ;;  %v207_v23 = vpop.f32.mrf.mxu0  ;;  %v260_v24 = vpop.f32.mrf.mxu1  ;;  %v406_v25 = vadd.f32 %v405_v7, %v397_v15  ;;  %v338_v30 = vadd.f32 %v337_v63, %v255_v5  ;;  %v329_v31 = vadd.f32 %v328_v3, %v204_v6 }
  0xe1   :  { %v400_v32 = vmul.f32 %v257_v10, %v257_v10  ;;  %v424_v33 = vadd.f32 %v423_v8, %v399_v16  ;;  %315 = vst [vmem:[%s709_s3 + $0x20] sm:$0xff] %v517_v18  ;;  %v206_v34 = vadd.f32 %v205_v11, %v645_v26  ;;  %v259_v36 = vadd.f32 %v258_v12, %v647_v27 }
  0xe2   :  { %316 = vst [vmem:[%s709_s3 + $0x28] sm:$0xff] %v518_v22  ;;  %v208_v37 = vadd.f32 %v207_v23, %v649_v28  ;;  %v415_v38 = vadd.f32 %v414_v13, %v398_v21  ;;  %v347_v39 = vadd.f32 %v346_v9, %v257_v10  ;;  %v261_v41 = vadd.f32 %v260_v24, %v651_v29 }
  0xe3   :  { %v433_v40 = vadd.f32 %v432_v14, %v400_v32  ;;  %v321_v42 = vadd.f32 %v320_v17, %v206_v34  ;;  %v401_v43 = vmul.f32 %v206_v34, %v206_v34  ;;  %v339_v44 = vadd.f32 %v338_v30, %v259_v36 }
  0xe4   :  { %v403_v45 = vmul.f32 %v259_v36, %v259_v36  ;;  %v519_v46 = vpack.c.bf16 %v208_v37, %v206_v34  ;;  %v330_v47 = vadd.f32 %v329_v31, %v208_v37  ;;  %v402_v48 = vmul.f32 %v208_v37, %v208_v37 }
  0xe5   :  { %v520_v49 = vpack.c.bf16 %v261_v41, %v259_v36  ;;  %v322_v51 = vrot.slane %v321_v42, 4  ;;  %v407_v52 = vadd.f32 %v406_v25, %v401_v43  ;;  %v340_v26 = vrot.slane %v339_v44, 4 }
  0xe6   :  { %v425_v53 = vadd.f32 %v424_v33, %v403_v45  ;;  %317 = vst [vmem:[%s709_s3 + $0x30] sm:$0xff] %v519_v46  ;;  %v331_v27 = vrot.slane %v330_v47, 4  ;;  %v416_v28 = vadd.f32 %v415_v38, %v402_v48  ;;  %v348_v29 = vadd.f32 %v347_v39, %v261_v41 }
  0xe7   :  { %318 = vst [vmem:[%s709_s3 + $0x38] sm:$0xff] %v520_v49  ;;  %v404_v54 = vmul.f32 %v261_v41, %v261_v41  ;;  %v323_v55 = vadd.f32 %v322_v51, %v321_v42  ;;  %v408_v56 = vrot.slane %v407_v52, 4  ;;  %v341_v57 = vadd.f32 %v340_v26, %v339_v44 }
  0xe8   :  { %v426_v58 = vrot.slane %v425_v53, 4  ;;  %v332_v59 = vadd.f32 %v331_v27, %v330_v47  ;;  %v417_v60 = vrot.slane %v416_v28, 4  ;;  %v349_v61 = vrot.slane %v348_v29, 4 }
  0xe9   :  { %v434_v62 = vadd.f32 %v433_v40, %v404_v54  ;;  %v324_v63 = vrot.slane %v323_v55, 2  ;;  %v409_v0 = vadd.f32 %v408_v56, %v407_v52  ;;  %v342_v1 = vrot.slane %v341_v57, 2 }
  0xea   :  { %v427_v2 = vadd.f32 %v426_v58, %v425_v53  ;;  %v333_v3 = vrot.slane %v332_v59, 2  ;;  %v418_v4 = vadd.f32 %v417_v60, %v416_v28  ;;  %v350_v5 = vadd.f32 %v349_v61, %v348_v29 }
  0xeb   :  { %v435_v6 = vrot.slane %v434_v62, 4  ;;  %v325_v7 = vadd.f32 %v324_v63, %v323_v55  ;;  %v410_v8 = vrot.slane %v409_v0, 2  ;;  %v343_v9 = vadd.f32 %v342_v1, %v341_v57 }
  0xec   :  { %v428_v10 = vrot.slane %v427_v2, 2  ;;  %v334_v11 = vadd.f32 %v333_v3, %v332_v59  ;;  %v419_v12 = vrot.slane %v418_v4, 2  ;;  %v351_v13 = vrot.slane %v350_v5, 2 }
  0xed   :  { %v436_v14 = vadd.f32 %v435_v6, %v434_v62  ;;  %v326_v15 = vrot.slane %v325_v7, 1  ;;  %v411_v16 = vadd.f32 %v410_v8, %v409_v0  ;;  %v344_v17 = vrot.slane %v343_v9, 1 }
  0xee   :  { %v429_v18 = vadd.f32 %v428_v10, %v427_v2  ;;  %v335_v21 = vrot.slane %v334_v11, 1  ;;  %v420_v22 = vadd.f32 %v419_v12, %v418_v4  ;;  %v352_v23 = vadd.f32 %v351_v13, %v350_v5 }
  0xef   :  { %v437_v24 = vrot.slane %v436_v14, 2  ;;  %v327_v25 = vadd.f32 %v326_v15, %v325_v7  ;;  %v412_v30 = vrot.slane %v411_v16, 1  ;;  %v366_v32 = vsub.s32 %v363_v50, %v636_v20 }
  0xf0   :  { %v430_v31 = vrot.slane %v429_v18, 1  ;;  %v336_v33 = vadd.f32 %v335_v21, %v334_v11  ;;  %v421_v34 = vrot.slane %v420_v22, 1  ;;  %v353_v36 = vrot.slane %v352_v23, 1 }
  0xf1   :  { %v438_v37 = vadd.f32 %v437_v24, %v436_v14  ;;  %v413_v38 = vadd.f32 %v412_v30, %v411_v16  ;;  %v345_v39 = vadd.f32 %v344_v17, %v343_v9 }
  0xf2   :  { %v359_v40 = vcombine.low %v327_v25, %v336_v33  ;;  %v422_v41 = vadd.f32 %v421_v34, %v420_v22  ;;  %v354_v42 = vadd.f32 %v353_v36, %v352_v23  ;;  %v431_v44 = vadd.f32 %v430_v31, %v429_v18 }
  0xf3   :  { %v439_v43 = vrot.slane %v438_v37, 1 }
  0xf4   :  { %v367_v45 = vrot.slane %v359_v40, %v366_v32  ;;  %v445_v46 = vcombine.low %v413_v38, %v422_v41  ;;  %v360_v47 = vcombine.low %v345_v39, %v354_v42 }
  0xf5   :  { %v440_v48 = vadd.f32 %v439_v43, %v438_v37 }
  0xf6   :  { %v453_v49 = vrot.slane %v445_v46, %v366_v32  ;;  %v374_v51 = vrot.slane %v360_v47, %v366_v32 }
  0xf7   :  { %v446_v52 = vcombine.low %v431_v44, %v440_v48 }
  0xf8   :  { %v375_v35 = vcombine.low %v367_v45, %v374_v51 }
  0xf9   :  { %v460_v20 = vrot.slane %v446_v52, %v366_v32 }
  0xfa   :  { %v382_v50 = vrot.slane %v375_v35, %v366_v32 }
  0xfb   :  { %v461_v26 = vcombine.low %v453_v49, %v460_v20 }
  0xfc   :  { %388 = vst.msk [vmem:[%s710_s4] sm:$0xf] %vm386_vm1, %v382_v50 }
  0xfd   :  { %v468_v53 = vrot.slane %v461_v26, %v366_v32 }
  0xff   :  { %470 = vst.msk [vmem:[%s711_s5] sm:$0xf] %vm386_vm1, %v468_v53 }

// kernel: simple_downsample.6
= control target key start
LH: loop header
LB: loop body
LE: loop exit
PB: predicated region body
PF: predicated region fallthrough
CT: control target
= control target key end

     0   :  { %v50_v23 = vlaneseq  ;;  %s1124_s1 = inlined_call_operand.vmem [shape: bf16[512,128], index: 1, kind: input, shape index: {}]   ;;  %s1125_s0 = inlined_call_operand.vmem [shape: bf16[32,512], index: 0, kind: input, shape index: {}]   ;;  %s1126_s3 = inlined_call_operand.vmem [shape: f32[1,512], index: 3, kind: input, shape index: {}]   ;;  %s1127_s4 = inlined_call_operand.vmem [shape: f32[1,512], index: 4, kind: input, shape index: {}]   ;;  %s1128_s2 = inlined_call_operand.vmem [shape: f32[1,128], index: 2, kind: input, shape index: {}]   ;;  %s1129_s5 = inlined_call_operand.vmem [shape: bf16[32,128], index: 5, kind: output, shape index: {0}]   ;;  %s1130_s6 = inlined_call_operand.vmem [shape: f32[1,1,128], index: 6, kind: output, shape index: {1}]   ;;  %s1131_s7 = inlined_call_operand.vmem [shape: f32[1,1,128], index: 7, kind: output, shape index: {2}]  }
   0x1   :  { %v753_v0 = vld [vmem:[%s1124_s1 + $0x78] sm:$0xff]   ;;  %v757_v4 = vld [vmem:[%s1124_s1 + $0x70] sm:$0xff]   ;;  %v761_v8 = vld [vmem:[%s1124_s1 + $0x68] sm:$0xff]  }
   0x2   :  { %v754_v1 = vld [vmem:[%s1124_s1 + $0xf8] sm:$0xff]   ;;  %697 = vmatprep.subr.bf16.mxu0 %v753_v0  ;;  %v758_v5 = vld [vmem:[%s1124_s1 + $0xf0] sm:$0xff]   ;;  %v762_v9 = vld [vmem:[%s1124_s1 + $0xe8] sm:$0xff]   ;;  %v51_v28 = vshrl.u32 %v50_v23, 7 }
   0x3   :  { %v755_v2 = vld [vmem:[%s1124_s1 + $0x38] sm:$0xff]   ;;  %725 = vmatprep.subr.bf16.mxu1 %v754_v1  ;;  %v759_v6 = vld [vmem:[%s1124_s1 + $0x30] sm:$0xff]   ;;  %v763_v10 = vld [vmem:[%s1124_s1 + $0x28] sm:$0xff]  }
   0x4   :  { %v756_v3 = vld [vmem:[%s1124_s1 + $0xb8] sm:$0xff]   ;;  %698 = vmatpush3.bf16.msra.mxu0 %v755_v2  ;;  %v760_v7 = vld [vmem:[%s1124_s1 + $0xb0] sm:$0xff]   ;;  %v764_v11 = vld [vmem:[%s1124_s1 + $0xa8] sm:$0xff]   ;;  %v56_v33 = vsub.s32 1, %v51_v28  ;;  %v64_v35 = vsub.s32 3, %v51_v28  ;;  %v52_v39 = vsub.s32 0, %v51_v28 }
   0x5   :  { %726 = vmatpush3.bf16.msra.mxu1 %v756_v3  ;;  %699 = vmatprep.subr.bf16.mxu0 %v757_v4  ;;  %v765_v12 = vld [vmem:[%s1124_s1 + $0x60] sm:$0xff]   ;;  %v769_v16 = vld [vmem:[%s1124_s1 + $0x58] sm:$0xff]   ;;  %v773_v20 = vld [vmem:[%s1124_s1 + $0x50] sm:$0xff]   ;;  %v60_v40 = vsub.s32 2, %v51_v28 }
   0x6   :  { %727 = vmatprep.subr.bf16.mxu1 %v758_v5  ;;  %v766_v13 = vld [vmem:[%s1124_s1 + $0xe0] sm:$0xff]   ;;  %v770_v17 = vld [vmem:[%s1124_s1 + $0xd8] sm:$0xff]   ;;  %v774_v21 = vld [vmem:[%s1124_s1 + $0xd0] sm:$0xff]  }
   0x7   :  { %v767_v14 = vld [vmem:[%s1124_s1 + $0x20] sm:$0xff]   ;;  %v771_v18 = vld [vmem:[%s1124_s1 + $0x18] sm:$0xff]   ;;  %v775_v22 = vld [vmem:[%s1124_s1 + $0x10] sm:$0xff]  }
   0x8   :  { %700 = vmatpush3.bf16.msra.mxu0 %v759_v6  ;;  %v768_v15 = vld [vmem:[%s1124_s1 + $0xa0] sm:$0xff]   ;;  %v772_v19 = vld [vmem:[%s1124_s1 + $0x98] sm:$0xff]   ;;  %v776_v24 = vld [vmem:[%s1124_s1 + $0x90] sm:$0xff]  }
   0x9   :  { %728 = vmatpush3.bf16.msra.mxu1 %v760_v7  ;;  %701 = vmatprep.subr.bf16.mxu0 %v761_v8  ;;  %v777_v25 = vld [vmem:[%s1124_s1 + $0x48] sm:$0xff]   ;;  %v781_v30 = vld [vmem:[%s1124_s1 + $0x40] sm:$0xff]   ;;  %v26_v37 = vld [vmem:[%s1125_s0 + $0x10] sm:$0xff] }
   0xa   :  { %729 = vmatprep.subr.bf16.mxu1 %v762_v9  ;;  %v778_v26 = vld [vmem:[%s1124_s1 + $0xc8] sm:$0xff]   ;;  %v782_v31 = vld [vmem:[%s1124_s1 + $0xc0] sm:$0xff]   ;;  %v36_v43 = vunpack.c.l.bf16 %v26_v37  ;;  %v37_v44 = vunpack.c.h.bf16 %v26_v37  ;;  %v27_v47 = vld [vmem:[%s1125_s0 + $0x18] sm:$0xff] }
   0xb   :  { %v779_v27 = vld [vmem:[%s1124_s1 + $0x8] sm:$0xff]   ;;  %v783_v32 = vld [vmem:[%s1124_s1] sm:$0xff]   ;;  %v38_v52 = vunpack.c.l.bf16 %v27_v47  ;;  %v39_v53 = vunpack.c.h.bf16 %v27_v47 }
   0xc   :  { %702 = vmatpush3.bf16.msra.mxu0 %v763_v10  ;;  %v780_v29 = vld [vmem:[%s1124_s1 + $0x88] sm:$0xff]   ;;  %v784_v34 = vld [vmem:[%s1124_s1 + $0x80] sm:$0xff]  }
   0xd   :  { %730 = vmatpush3.bf16.msra.mxu1 %v764_v11  ;;  %703 = vmatprep.subr.bf16.mxu0 %v765_v12  ;;  %v24_v36 = vld [vmem:[%s1125_s0] sm:$0xff]  ;;  %v25_v46 = vld [vmem:[%s1125_s0 + $0x8] sm:$0xff] }
   0xe   :  { %731 = vmatprep.subr.bf16.mxu1 %v766_v13  ;;  %v48_v38 = vld [vmem:[%s1126_s3] sm:$0xf]  ;;  %v32_v41 = vunpack.c.l.bf16 %v24_v36  ;;  %v33_v42 = vunpack.c.h.bf16 %v24_v36  ;;  %v34_v50 = vunpack.c.l.bf16 %v25_v46  ;;  %v35_v51 = vunpack.c.h.bf16 %v25_v46 }
   0xf   :  { %v86_v45 = vld [vmem:[%s1127_s4] sm:$0xf]  ;;  %v57_v48 = vrot.slane %v48_v38, %v56_v33  ;;  %v65_v54 = vrot.slane %v48_v38, %v64_v35  ;;  %v53_v58 = vrot.slane %v48_v38, %v52_v39  ;;  %v1009_v62 = vrot.slane %v48_v38, %v60_v40 }
  0x10   :  { %704 = vmatpush3.bf16.msra.mxu0 %v767_v14  ;;  %v1003_v49 = vrot.slane %v86_v45, %v56_v33  ;;  %v1005_v55 = vrot.slane %v86_v45, %v64_v35  ;;  %v1007_v59 = vrot.slane %v86_v45, %v52_v39  ;;  %v1011_v63 = vrot.slane %v86_v45, %v60_v40  ;;  %v28_v12 = vld [vmem:[%s1125_s0 + $0x20] sm:$0xff] }
  0x11   :  { %732 = vmatpush3.bf16.msra.mxu1 %v768_v15  ;;  %705 = vmatprep.subr.bf16.mxu0 %v769_v16  ;;  %v71_v56 = vmul.f32 %v57_v48, %v33_v42  ;;  %v75_v57 = vmul.f32 %v57_v48, %v37_v44  ;;  %v73_v60 = vmul.f32 %v65_v54, %v35_v51  ;;  %v40_v38 = vunpack.c.l.bf16 %v28_v12 }
  0x12   :  { %733 = vmatprep.subr.bf16.mxu1 %v770_v17  ;;  %v77_v61 = vmul.f32 %v65_v54, %v39_v53  ;;  %v70_v2 = vmul.f32 %v53_v58, %v32_v41  ;;  %v74_v3 = vmul.f32 %v53_v58, %v36_v43  ;;  %v72_v6 = vmul.f32 %v1009_v62, %v34_v50  ;;  %v30_v17 = vld [vmem:[%s1125_s0 + $0x30] sm:$0xff] }
  0x13   :  { %v1014_v0 = vadd.f32 %v1003_v49, %v71_v56  ;;  %v1017_v1 = vadd.f32 %v1003_v49, %v75_v57  ;;  %v1020_v4 = vadd.f32 %v1005_v55, %v73_v60  ;;  %v76_v7 = vmul.f32 %v1009_v62, %v38_v52 }
  0x14   :  { %706 = vmatpush3.bf16.msra.mxu0 %v771_v18  ;;  %v1023_v5 = vadd.f32 %v1005_v55, %v77_v61  ;;  %v1030_v10 = vadd.f32 %v1007_v59, %v70_v2  ;;  %v1033_v11 = vadd.f32 %v1007_v59, %v74_v3  ;;  %v1041_v15 = vadd.f32 %v1011_v63, %v72_v6  ;;  %v29_v18 = vld [vmem:[%s1125_s0 + $0x28] sm:$0xff] }
  0x15   :  { %734 = vmatpush3.bf16.msra.mxu1 %v772_v19  ;;  %707 = vmatprep.subr.bf16.mxu0 %v773_v20  ;;  %v125_v8 = vsub.f32 0.0, %v1014_v0  ;;  %v129_v9 = vsub.f32 0.0, %v1017_v1  ;;  %v127_v13 = vsub.f32 0.0, %v1020_v4  ;;  %v1044_v16 = vadd.f32 %v1011_v63, %v76_v7  ;;  %v31_v19 = vld [vmem:[%s1125_s0 + $0x38] sm:$0xff] }
  0x16   :  { %735 = vmatprep.subr.bf16.mxu1 %v774_v21  ;;  %v131_v14 = vsub.f32 0.0, %v1023_v5  ;;  %v128_v23 = vsub.f32 0.0, %v1033_v11  ;;  %v45_v33 = vunpack.c.h.bf16 %v30_v17  ;;  %v43_v35 = vunpack.c.h.bf16 %v29_v18 }
  0x17   :  { %v142_v20 = vmul.f32 1.442695, %v125_v8  ;;  %v150_v21 = vmul.f32 1.442695, %v129_v9  ;;  %v47_v36 = vunpack.c.h.bf16 %v31_v19  ;;  %v44_v39 = vunpack.c.l.bf16 %v30_v17 }
  0x18   :  { %708 = vmatpush3.bf16.msra.mxu0 %v775_v22  ;;  %v124_v22 = vsub.f32 0.0, %v1030_v10  ;;  %v83_v37 = vmul.f32 %v57_v48, %v45_v33  ;;  %v81_v41 = vmul.f32 %v65_v54, %v43_v35  ;;  %v78_v44 = vmul.f32 %v53_v58, %v40_v38 }
  0x19   :  { %736 = vmatpush3.bf16.msra.mxu1 %v776_v24  ;;  %709 = vmatprep.subr.bf16.mxu0 %v777_v25  ;;  %v146_v24 = vmul.f32 1.442695, %v127_v13  ;;  %v154_v25 = vmul.f32 1.442695, %v131_v14  ;;  %785 = vpow2.f32 %v142_v20  ;;  %v85_v42 = vmul.f32 %v65_v54, %v47_v36 }
  0x1a   :  { %737 = vmatprep.subr.bf16.mxu1 %v778_v26  ;;  %v126_v26 = vsub.f32 0.0, %v1041_v15  ;;  %v140_v28 = vmul.f32 1.442695, %v124_v22  ;;  %787 = vpow2.f32 %v150_v21  ;;  %v1063_v43 = vadd.f32 %v1003_v49, %v83_v37 }
  0x1b   :  { %789 = vpow2.f32 %v146_v24  ;;  %v82_v45 = vmul.f32 %v53_v58, %v44_v39  ;;  %v1067_v47 = vadd.f32 %v1005_v55, %v81_v41  ;;  %v1074_v51 = vadd.f32 %v1007_v59, %v78_v44 }
  0x1c   :  { %710 = vmatpush3.bf16.msra.mxu0 %v779_v27  ;;  %v130_v27 = vsub.f32 0.0, %v1044_v16  ;;  %791 = vpow2.f32 %v154_v25  ;;  %v137_v50 = vsub.f32 0.0, %v1063_v43  ;;  %v42_v56 = vunpack.c.l.bf16 %v29_v18 }
  0x1d   :  { %738 = vmatpush3.bf16.msra.mxu1 %v780_v29  ;;  %711 = vmatprep.subr.bf16.mxu0 %v781_v30  ;;  %v148_v29 = vmul.f32 1.442695, %v128_v23  ;;  %v41_v30 = vunpack.c.h.bf16 %v28_v12  ;;  %793 = vpow2.f32 %v140_v28  ;;  %v135_v53 = vsub.f32 0.0, %v1067_v47 }
  0x1e   :  { %739 = vmatprep.subr.bf16.mxu1 %v782_v31  ;;  %v144_v31 = vmul.f32 1.442695, %v126_v26  ;;  %v166_v57 = vmul.f32 1.442695, %v137_v50  ;;  %v132_v58 = vsub.f32 0.0, %v1074_v51  ;;  %v46_v60 = vunpack.c.l.bf16 %v31_v19 }
  0x1f   :  { %795 = vpow2.f32 %v148_v29  ;;  %v162_v61 = vmul.f32 1.442695, %v135_v53  ;;  %v80_v3 = vmul.f32 %v1009_v62, %v42_v56 }
  0x20   :  { %712 = vmatpush3.bf16.msra.mxu0 %v783_v32  ;;  %v152_v32 = vmul.f32 1.442695, %v130_v27  ;;  %797 = vpow2.f32 %v144_v31  ;;  %v84_v7 = vmul.f32 %v1009_v62, %v46_v60 }
  0x21   :  { %740 = vmatpush3.bf16.msra.mxu1 %v784_v34  ;;  %v79_v34 = vmul.f32 %v57_v48, %v41_v30  ;;  %v1070_v48 = vadd.f32 %v1005_v55, %v85_v42  ;;  %v1086_v8 = vadd.f32 %v1011_v63, %v80_v3 }
  0x22   :  { %799 = vpow2.f32 %v152_v32  ;;  %v1089_v12 = vadd.f32 %v1011_v63, %v84_v7 }
  0x23   :  { %v1060_v40 = vadd.f32 %v1003_v49, %v79_v34  ;;  %v1077_v49 = vadd.f32 %v1007_v59, %v82_v45  ;;  %v139_v54 = vsub.f32 0.0, %v1070_v48  ;;  %v156_v59 = vmul.f32 1.442695, %v132_v58 }
  0x24   :  { %v134_v62 = vsub.f32 0.0, %v1086_v8  ;;  %v138_v23 = vsub.f32 0.0, %v1089_v12 }
  0x25   :  { %v133_v46 = vsub.f32 0.0, %v1060_v40  ;;  %v136_v55 = vsub.f32 0.0, %v1077_v49  ;;  %v170_v2 = vmul.f32 1.442695, %v139_v54 }
  0x26   :  { %v786_v9 = vpop.eup %785  ;;  %v160_v29 = vmul.f32 1.442695, %v134_v62  ;;  %v168_v31 = vmul.f32 1.442695, %v138_v23 }
  0x27   :  { %v158_v52 = vmul.f32 1.442695, %v133_v46  ;;  %v164_v6 = vmul.f32 1.442695, %v136_v55  ;;  %v788_v13 = vpop.eup %787  ;;  %v173_v14 = vadd.f32 1.0, %v786_v9 }
  0x28   :  { %v790_v17 = vpop.eup %789  ;;  %v177_v18 = vadd.f32 1.0, %v788_v13 }
  0x29   :  { %801 = vpow2.f32 %v158_v52  ;;  %v792_v19 = vpop.eup %791  ;;  %v175_v20 = vadd.f32 1.0, %v790_v17 }
  0x2a   :  { %803 = vpow2.f32 %v166_v57  ;;  %v794_v21 = vpop.eup %793  ;;  %v179_v22 = vadd.f32 1.0, %v792_v19 }
  0x2b   :  { %805 = vpow2.f32 %v162_v61  ;;  %v172_v63 = vadd.f32 1.0, %v794_v21 }
  0x2c   :  { %807 = vpow2.f32 %v170_v2  ;;  %v796_v24 = vpop.eup %795 }
  0x2d   :  { %809 = vpow2.f32 %v156_v59  ;;  %v798_v25 = vpop.eup %797  ;;  %v176_v26 = vadd.f32 1.0, %v796_v24 }
  0x2e   :  { %811 = vpow2.f32 %v164_v6  ;;  %v174_v28 = vadd.f32 1.0, %v798_v25 }
  0x2f   :  { %813 = vrcp.f32 %v173_v14  ;;  %v800_v27 = vpop.eup %799 }
  0x30   :  { %815 = vrcp.f32 %v177_v18  ;;  %v178_v30 = vadd.f32 1.0, %v800_v27 }
  0x31   :  { %817 = vrcp.f32 %v175_v20 }
  0x32   :  { %819 = vrcp.f32 %v179_v22 }
  0x33   :  { %821 = vrcp.f32 %v172_v63 }
  0x34   :  { %823 = vrcp.f32 %v176_v26 }
  0x35   :  { %825 = vrcp.f32 %v174_v28 }
  0x36   :  { %v802_v32 = vpop.eup %801  ;;  %827 = vrcp.f32 %v178_v30 }
  0x37   :  { %v804_v33 = vpop.eup %803  ;;  %v181_v34 = vadd.f32 1.0, %v802_v32  ;;  %829 = vpow2.f32 %v160_v29 }
  0x38   :  { %v806_v35 = vpop.eup %805  ;;  %v185_v36 = vadd.f32 1.0, %v804_v33  ;;  %831 = vpow2.f32 %v168_v31 }
  0x39   :  { %v808_v37 = vpop.eup %807  ;;  %833 = vrcp.f32 %v181_v34  ;;  %v183_v38 = vadd.f32 1.0, %v806_v35 }
  0x3a   :  { %v810_v39 = vpop.eup %809  ;;  %835 = vrcp.f32 %v185_v36  ;;  %v187_v41 = vadd.f32 1.0, %v808_v37 }
  0x3b   :  { %v812_v42 = vpop.eup %811  ;;  %837 = vrcp.f32 %v183_v38  ;;  %v180_v44 = vadd.f32 1.0, %v810_v39 }
  0x3c   :  { %v814_v45 = vpop.eup %813  ;;  %839 = vrcp.f32 %v187_v41  ;;  %v184_v46 = vadd.f32 1.0, %v812_v42 }
  0x3d   :  { %v816_v50 = vpop.eup %815  ;;  %v205_v52 = vmul.f32 %v814_v45, %v1014_v0  ;;  %841 = vrcp.f32 %v180_v44 }
  0x3e   :  { %v818_v53 = vpop.eup %817  ;;  %v209_v54 = vmul.f32 %v816_v50, %v1017_v1  ;;  %843 = vrcp.f32 %v184_v46 }
  0x3f   :  { %v820_v56 = vpop.eup %819  ;;  %v207_v57 = vmul.f32 %v818_v53, %v1020_v4 }
  0x40   :  { %v822_v58 = vpop.eup %821  ;;  %v221_v55 = vpack.c.bf16 %v209_v54, %v205_v52  ;;  %v211_v60 = vmul.f32 %v820_v56, %v1023_v5 }
  0x41   :  { %v824_v61 = vpop.eup %823  ;;  %v204_v2 = vmul.f32 %v822_v58, %v1030_v10 }
  0x42   :  { %v826_v3 = vpop.eup %825  ;;  %523 = vmatprep.mubr.bf16.mxu0 %v221_v55  ;;  %v223_v59 = vpack.c.bf16 %v211_v60, %v207_v57  ;;  %v208_v0 = vmul.f32 %v824_v61, %v1033_v11 }
  0x43   :  { %v828_v6 = vpop.eup %827  ;;  %v206_v7 = vmul.f32 %v826_v3, %v1041_v15 }
  0x44   :  { %v830_v1 = vpop.eup %829  ;;  %572 = vmatprep.mubr.bf16.mxu1 %v223_v59  ;;  %v220_v9 = vpack.c.bf16 %v208_v0, %v204_v2  ;;  %v210_v4 = vmul.f32 %v828_v6, %v1044_v16 }
  0x45   :  { %v832_v13 = vpop.eup %831  ;;  %v182_v14 = vadd.f32 1.0, %v830_v1 }
  0x46   :  { %v834_v17 = vpop.eup %833  ;;  %524 = vmatmul.mubr.bf16.vlgmr.msra.gmra.mxu0 %v220_v9  ;;  %v222_v5 = vpack.c.bf16 %v210_v4, %v206_v7  ;;  %v186_v18 = vadd.f32 1.0, %v832_v13 }
  0x47   :  { %v836_v10 = vpop.eup %835  ;;  %v213_v19 = vmul.f32 %v834_v17, %v1060_v40  ;;  %845 = vrcp.f32 %v182_v14 }
  0x48   :  { %v838_v20 = vpop.eup %837  ;;  %573 = vmatmul.mubr.bf16.vlgmr.msra.gmra.mxu1 %v222_v5  ;;  %v217_v11 = vmul.f32 %v836_v10, %v1063_v43  ;;  %847 = vrcp.f32 %v186_v18 }
  0x49   :  { %v840_v15 = vpop.eup %839  ;;  %v215_v62 = vmul.f32 %v838_v20, %v1067_v47 }
  0x4a   :  { %v842_v21 = vpop.eup %841  ;;  %v225_v16 = vpack.c.bf16 %v217_v11, %v213_v19  ;;  %v219_v22 = vmul.f32 %v840_v15, %v1070_v48 }
  0x4b   :  { %v844_v23 = vpop.eup %843  ;;  %v212_v24 = vmul.f32 %v842_v21, %v1074_v51  ;;  %v645_v51 = vld [vmem:[%s1128_s2] ss:$0 sm:$0xff] }
  0x4c   :  { %531 = vmatprep.mubr.bf16.mxu0 %v225_v16  ;;  %v227_v63 = vpack.c.bf16 %v219_v22, %v215_v62  ;;  %v216_v40 = vmul.f32 %v844_v23, %v1077_v49 }
  0x4e   :  { %580 = vmatprep.mubr.bf16.mxu1 %v227_v63  ;;  %v224_v25 = vpack.c.bf16 %v216_v40, %v212_v24 }
  0x50   :  { %532 = vmatmul.mubr.bf16.gmra.mxu0 %v224_v25 }
  0x54   :  { %v846_v26 = vpop.eup %845 }
  0x55   :  { %v848_v43 = vpop.eup %847  ;;  %v214_v27 = vmul.f32 %v846_v26, %v1086_v8 }
  0x56   :  { %v218_v47 = vmul.f32 %v848_v43, %v1089_v12 }
  0x58   :  { %v226_v28 = vpack.c.bf16 %v218_v47, %v214_v27 }
  0x5a   :  { %581 = vmatmul.mubr.bf16.gmra.mxu1 %v226_v28 }
 0x106   :  { %v713_v29 = vpop.f32.mrf.mxu0 }
 0x108   :  { %v741_v48 = vpop.f32.mrf.mxu1  ;;  %v714_v30 = vpop.f32.mrf.mxu0 }
 0x109   :  { %v715_v31 = vadd.f32 %v714_v30, %v713_v29 }
 0x10a   :  { %v742_v49 = vpop.f32.mrf.mxu1  ;;  %v716_v32 = vpop.f32.mrf.mxu0 }
 0x10b   :  { %v526_v35 = vadd.f32 %v715_v31, %v645_v51  ;;  %v743_v8 = vadd.f32 %v742_v49, %v741_v48 }
 0x10c   :  { %v744_v33 = vpop.f32.mrf.mxu1  ;;  %v717_v34 = vpop.f32.mrf.mxu0 }
 0x10d   :  { %v718_v36 = vadd.f32 %v717_v34, %v716_v32  ;;  %v575_v41 = vadd.f32 %v743_v8, %v526_v35 }
 0x10e   :  { %v745_v37 = vpop.f32.mrf.mxu1 }
 0x10f   :  { %v529_v38 = vadd.f32 %v718_v36, %v645_v51  ;;  %v746_v12 = vadd.f32 %v745_v37, %v744_v33  ;;  %v619_v59 = vmul.f32 %v575_v41, %v575_v41 }
 0x110   :  { %v719_v39 = vpop.f32.mrf.mxu0 }
 0x111   :  { %v578_v42 = vadd.f32 %v746_v12, %v529_v38 }
 0x112   :  { %v720_v44 = vpop.f32.mrf.mxu0 }
 0x113   :  { %v689_v45 = vpack.c.bf16 %v578_v42, %v575_v41  ;;  %v721_v50 = vadd.f32 %v720_v44, %v719_v39  ;;  %v620_v60 = vmul.f32 %v578_v42, %v578_v42  ;;  %v609_v0 = vadd.f32 %v578_v42, %v575_v41 }
 0x114   :  { %v722_v46 = vpop.f32.mrf.mxu0 }
 0x115   :  { %690 = vst [vmem:[%s1129_s5] sm:$0xff] %v689_v45   ;;  %v534_v54 = vadd.f32 %v721_v50, %v645_v51  ;;  %v623_v1 = vadd.f32 %v620_v60, %v619_v59 }
 0x116   :  { %v723_v52 = vpop.f32.mrf.mxu0 }
 0x117   :  { %v724_v56 = vadd.f32 %v723_v52, %v722_v46 }
 0x119   :  { %v537_v2 = vadd.f32 %v724_v56, %v645_v51 }
 0x11a   :  { %v747_v53 = vpop.f32.mrf.mxu1 }
 0x11c   :  { %v748_v57 = vpop.f32.mrf.mxu1 }
 0x11d   :  { %v749_v58 = vadd.f32 %v748_v57, %v747_v53 }
 0x11e   :  { %v750_v55 = vpop.f32.mrf.mxu1 }
 0x11f   :  { %v583_v61 = vadd.f32 %v749_v58, %v534_v54 }
 0x120   :  { %v751_v3 = vpop.f32.mrf.mxu1 }
 0x121   :  { %v621_v6 = vmul.f32 %v583_v61, %v583_v61  ;;  %v752_v7 = vadd.f32 %v751_v3, %v750_v55  ;;  %v610_v9 = vadd.f32 %v609_v0, %v583_v61 }
 0x123   :  { %v586_v4 = vadd.f32 %v752_v7, %v537_v2  ;;  %v624_v13 = vadd.f32 %v623_v1, %v621_v6 }
 0x125   :  { %v694_v14 = vpack.c.bf16 %v586_v4, %v583_v61  ;;  %v611_v17 = vadd.f32 %v610_v9, %v586_v4  ;;  %v622_v5 = vmul.f32 %v586_v4, %v586_v4 }
 0x127   :  { %696 = vst [vmem:[%s1129_s5 + $0x8] sm:$0xff] %v694_v14   ;;  %v612_v18 = vrot.slane %v611_v17, 4  ;;  %v625_v10 = vadd.f32 %v624_v13, %v622_v5 }
 0x129   :  { %v613_v19 = vadd.f32 %v612_v18, %v611_v17  ;;  %v626_v20 = vrot.slane %v625_v10, 4 }
 0x12b   :  { %v614_v11 = vrot.slane %v613_v19, 2  ;;  %v627_v15 = vadd.f32 %v626_v20, %v625_v10 }
 0x12d   :  { %v615_v62 = vadd.f32 %v614_v11, %v613_v19  ;;  %v628_v21 = vrot.slane %v627_v15, 2 }
 0x12f   :  { %v616_v16 = vrot.slane %v615_v62, 1  ;;  %v629_v22 = vadd.f32 %v628_v21, %v627_v15 }
 0x131   :  { %v617_v23 = vadd.f32 %v616_v16, %v615_v62  ;;  %v630_v24 = vrot.slane %v629_v22, 1 }
 0x133   :  { %618 = vst [vmem:[%s1130_s6] sm:$0x1] %v617_v23  ;;  %v631_v63 = vadd.f32 %v630_v24, %v629_v22 }
 0x135   :  { %632 = vst [vmem:[%s1131_s7] sm:$0x1] %v631_v63 }

// kernel: simple_downsample.4
= control target key start
LH: loop header
LB: loop body
LE: loop exit
PB: predicated region body
PF: predicated region fallthrough
CT: control target
= control target key end

     0   :  { %vm347_vm0 = vcmask 1041408   ;;  %vm250_vm1 = vcmask 31744   ;;  %s2219_s1 = inlined_call_operand.vmem [shape: bf16[4,128], index: 1, kind: input, shape index: {}]   ;;  %s2220_s0 = inlined_call_operand.vmem [shape: bf16[512,4], index: 0, kind: input, shape index: {}]   ;;  %s2221_s2 = inlined_call_operand.vmem [shape: f32[1,128], index: 2, kind: input, shape index: {}]   ;;  %s2222_s3 = inlined_call_operand.vmem [shape: bf16[512,128], index: 3, kind: output, shape index: {0}]   ;;  %s2223_s4 = inlined_call_operand.vmem [shape: f32[1,1,128], index: 4, kind: output, shape index: {1}]   ;;  %s2224_s5 = inlined_call_operand.vmem [shape: f32[1,1,128], index: 5, kind: output, shape index: {2}]  }
   0x1   :  { %v82_v0 = vld [vmem:[%s2219_s1] sm:$0x3]  ;;  %v1664_v3 = vld [vmem:[%s2220_s0 + $0x8] sm:$0xff]   ;;  %v1665_v4 = vld [vmem:[%s2220_s0 + $0x10] sm:$0xff]  }
   0x2   :  { %1661 = vmatprep.subr.msk.bf16.mxu0 %vm347_vm0, %v82_v0  ;;  %v349_v1 = vsel %vm347_vm0, %v82_v0, 0  ;;  %v1663_v2 = vld [vmem:[%s2220_s0] sm:$0xff]   ;;  %1662 = vmatprep.subr.msk.bf16.mxu1 %vm347_vm0, %v82_v0  ;;  %v1666_v5 = vld [vmem:[%s2220_s0 + $0x18] sm:$0xff]   ;;  %v1668_v7 = vld [vmem:[%s2220_s0 + $0x28] sm:$0xff]  }
   0x3   :  { %1594 = vmatpush3.bf16.msra.mxu0 %v349_v1  ;;  %1660 = vmatpush3.bf16.msra.mxu1 %v349_v1  ;;  %v1667_v6 = vld [vmem:[%s2220_s0 + $0x20] sm:$0xff]   ;;  %v1669_v8 = vld [vmem:[%s2220_s0 + $0x30] sm:$0xff]   ;;  %v1680_v10 = vld [vmem:[%s2220_s0 + $0x88] sm:$0xff]  }
   0x4   :  { %1595 = vmatprep.mubr.msk.bf16.mxu0 %vm250_vm1, %v1663_v2  ;;  %v1679_v9 = vld [vmem:[%s2220_s0 + $0x80] sm:$0xff]   ;;  %v1681_v11 = vld [vmem:[%s2220_s0 + $0x90] sm:$0xff]   ;;  %v1670_v12 = vld [vmem:[%s2220_s0 + $0x38] sm:$0xff]  }
   0x5   :  { %1627 = vmatprep.mubr.msk.bf16.mxu1 %vm250_vm1, %v1679_v9  ;;  %v1682_v13 = vld [vmem:[%s2220_s0 + $0x98] sm:$0xff]   ;;  %v1683_v14 = vld [vmem:[%s2220_s0 + $0xa0] sm:$0xff]   ;;  %v1684_v16 = vld [vmem:[%s2220_s0 + $0xa8] sm:$0xff]  }
   0x6   :  { %1596 = vmatmul.mubr.msk.bf16.vlgmr.msra.gmra.mxu0 %vm250_vm1, %v1664_v3  ;;  %1628 = vmatmul.mubr.msk.bf16.vlgmr.msra.gmra.mxu1 %vm250_vm1, %v1680_v10  ;;  %v1671_v15 = vld [vmem:[%s2220_s0 + $0x40] sm:$0xff]   ;;  %v1672_v17 = vld [vmem:[%s2220_s0 + $0x48] sm:$0xff]   ;;  %v1685_v18 = vld [vmem:[%s2220_s0 + $0xb0] sm:$0xff]  }
   0x7   :  { %1599 = vmatprep.mubr.msk.bf16.mxu0 %vm250_vm1, %v1665_v4  ;;  %1631 = vmatprep.mubr.msk.bf16.mxu1 %vm250_vm1, %v1681_v11  ;;  %v1673_v19 = vld [vmem:[%s2220_s0 + $0x50] sm:$0xff]   ;;  %v1686_v20 = vld [vmem:[%s2220_s0 + $0xb8] sm:$0xff]   ;;  %v1687_v22 = vld [vmem:[%s2220_s0 + $0xc0] sm:$0xff]  }
   0x8   :  { %v1674_v21 = vld [vmem:[%s2220_s0 + $0x58] sm:$0xff]   ;;  %v1675_v23 = vld [vmem:[%s2220_s0 + $0x60] sm:$0xff]   ;;  %v1688_v24 = vld [vmem:[%s2220_s0 + $0xc8] sm:$0xff]  }
   0x9   :  { %v1676_v25 = vld [vmem:[%s2220_s0 + $0x68] sm:$0xff]   ;;  %v1689_v26 = vld [vmem:[%s2220_s0 + $0xd0] sm:$0xff]   ;;  %v1690_v28 = vld [vmem:[%s2220_s0 + $0xd8] sm:$0xff]  }
   0xa   :  { %v1677_v27 = vld [vmem:[%s2220_s0 + $0x70] sm:$0xff]   ;;  %v1678_v29 = vld [vmem:[%s2220_s0 + $0x78] sm:$0xff]   ;;  %v1691_v30 = vld [vmem:[%s2220_s0 + $0xe0] sm:$0xff]  }
   0xb   :  { %v1692_v31 = vld [vmem:[%s2220_s0 + $0xe8] sm:$0xff]   ;;  %v1693_v32 = vld [vmem:[%s2220_s0 + $0xf0] sm:$0xff]   ;;  %v1694_v33 = vld [vmem:[%s2220_s0 + $0xf8] sm:$0xff]  }
   0xc   :  { %v1859_v35 = vld [vmem:[%s2221_s2] ss:$0 sm:$0xff] }
   0xe   :  { %1600 = vmatmul.mubr.msk.bf16.gmra.mxu0 %vm250_vm1, %v1666_v5  ;;  %1632 = vmatmul.mubr.msk.bf16.gmra.mxu1 %vm250_vm1, %v1682_v13 }
   0xf   :  { %1603 = vmatprep.mubr.msk.bf16.mxu0 %vm250_vm1, %v1667_v6  ;;  %1635 = vmatprep.mubr.msk.bf16.mxu1 %vm250_vm1, %v1683_v14 }
  0x16   :  { %1604 = vmatmul.mubr.msk.bf16.gmra.mxu0 %vm250_vm1, %v1668_v7  ;;  %1636 = vmatmul.mubr.msk.bf16.gmra.mxu1 %vm250_vm1, %v1684_v16 }
  0x17   :  { %1607 = vmatprep.mubr.msk.bf16.mxu0 %vm250_vm1, %v1669_v8  ;;  %1639 = vmatprep.mubr.msk.bf16.mxu1 %vm250_vm1, %v1685_v18 }
  0x1e   :  { %1608 = vmatmul.mubr.msk.bf16.gmra.mxu0 %vm250_vm1, %v1670_v12  ;;  %1640 = vmatmul.mubr.msk.bf16.gmra.mxu1 %vm250_vm1, %v1686_v20 }
  0x1f   :  { %1611 = vmatprep.mubr.msk.bf16.mxu0 %vm250_vm1, %v1671_v15  ;;  %1643 = vmatprep.mubr.msk.bf16.mxu1 %vm250_vm1, %v1687_v22 }
  0x26   :  { %1612 = vmatmul.mubr.msk.bf16.gmra.mxu0 %vm250_vm1, %v1672_v17  ;;  %1644 = vmatmul.mubr.msk.bf16.gmra.mxu1 %vm250_vm1, %v1688_v24 }
  0x27   :  { %1615 = vmatprep.mubr.msk.bf16.mxu0 %vm250_vm1, %v1673_v19  ;;  %1647 = vmatprep.mubr.msk.bf16.mxu1 %vm250_vm1, %v1689_v26 }
  0x2e   :  { %1616 = vmatmul.mubr.msk.bf16.gmra.mxu0 %vm250_vm1, %v1674_v21  ;;  %1648 = vmatmul.mubr.msk.bf16.gmra.mxu1 %vm250_vm1, %v1690_v28 }
  0x2f   :  { %1619 = vmatprep.mubr.msk.bf16.mxu0 %vm250_vm1, %v1675_v23  ;;  %1651 = vmatprep.mubr.msk.bf16.mxu1 %vm250_vm1, %v1691_v30 }
  0x36   :  { %1620 = vmatmul.mubr.msk.bf16.gmra.mxu0 %vm250_vm1, %v1676_v25  ;;  %1652 = vmatmul.mubr.msk.bf16.gmra.mxu1 %vm250_vm1, %v1692_v31 }
  0x37   :  { %1623 = vmatprep.mubr.msk.bf16.mxu0 %vm250_vm1, %v1677_v27  ;;  %1655 = vmatprep.mubr.msk.bf16.mxu1 %vm250_vm1, %v1693_v32 }
  0x3e   :  { %1624 = vmatmul.mubr.msk.bf16.gmra.mxu0 %vm250_vm1, %v1678_v29  ;;  %1656 = vmatmul.mubr.msk.bf16.gmra.mxu1 %vm250_vm1, %v1694_v33 }
  0xc6   :  { %v1597_v34 = vpop.f32.mrf.mxu0  ;;  %v1629_v1 = vpop.f32.mrf.mxu1 }
  0xc7   :  { %v394_v38 = vadd.f32 %v1597_v34, %v1859_v35  ;;  %v1879_v10 = vadd.f32 %v1629_v1, %v1859_v35 }
  0xc8   :  { %v385_v36 = vpop.f32.mrf.mxu0  ;;  %v513_v5 = vpop.f32.mrf.mxu1 }
  0xc9   :  { %v386_v39 = vadd.f32 %v1859_v35, %v385_v36  ;;  %v1032_v50 = vmul.f32 %v394_v38, %v394_v38  ;;  %v1891_v20 = vadd.f32 %v1859_v35, %v513_v5 }
  0xca   :  { %v1598_v37 = vpop.f32.mrf.mxu0  ;;  %v1630_v12 = vpop.f32.mrf.mxu1 }
  0xcb   :  { %v397_v40 = vadd.f32 %v1598_v37, %v1859_v35  ;;  %v1030_v45 = vmul.f32 %v386_v39, %v386_v39  ;;  %v1886_v17 = vadd.f32 %v1630_v12, %v1859_v35 }
  0xcc   :  { %v388_v41 = vpop.f32.mrf.mxu0  ;;  %v516_v21 = vpop.f32.mrf.mxu1 }
  0xcd   :  { %v1377_v42 = vpack.c.bf16 %v397_v40, %v394_v38  ;;  %v389_v43 = vadd.f32 %v1859_v35, %v388_v41  ;;  %v1033_v54 = vmul.f32 %v397_v40, %v397_v40  ;;  %v1457_v26 = vpack.c.bf16 %v1886_v17, %v1879_v10 }
  0xce   :  { %v1601_v44 = vpop.f32.mrf.mxu0  ;;  %v1897_v29 = vadd.f32 %v1859_v35, %v516_v21  ;;  %v1633_v30 = vpop.f32.mrf.mxu1 }
  0xcf   :  { %1529 = vst [vmem:[%s2222_s3 + $0x8] sm:$0xff] %v1377_v42   ;;  %v1372_v46 = vpack.c.bf16 %v389_v43, %v386_v39  ;;  %v960_v47 = vadd.f32 %v389_v43, %v386_v39  ;;  %v1031_v48 = vmul.f32 %v389_v43, %v389_v43  ;;  %v410_v57 = vadd.f32 %v1601_v44, %v1859_v35 }
  0xd0   :  { %v401_v49 = vpop.f32.mrf.mxu0  ;;  %1545 = vst [vmem:[%s2222_s3 + $0x88] sm:$0xff] %v1457_v26   ;;  %v529_v39 = vpop.f32.mrf.mxu1  ;;  %v1908_v43 = vadd.f32 %v1633_v30, %v1859_v35 }
  0xd1   :  { %1373 = vst [vmem:[%s2222_s3] sm:$0xff] %v1372_v46   ;;  %v961_v51 = vadd.f32 %v960_v47, %v394_v38  ;;  %v1094_v52 = vadd.f32 %v1031_v48, %v1030_v45  ;;  %v402_v53 = vadd.f32 %v1859_v35, %v401_v49  ;;  %v1036_v11 = vmul.f32 %v410_v57, %v410_v57 }
  0xd2   :  { %v1602_v55 = vpop.f32.mrf.mxu0  ;;  %v1452_v38 = vpack.c.bf16 %v1897_v29, %v1891_v20  ;;  %v1634_v45 = vpop.f32.mrf.mxu1 }
  0xd3   :  { %v1095_v56 = vadd.f32 %v1094_v52, %v1032_v50  ;;  %v962_v58 = vadd.f32 %v961_v51, %v397_v40  ;;  %v413_v59 = vadd.f32 %v1602_v55, %v1859_v35  ;;  %v1034_v62 = vmul.f32 %v402_v53, %v402_v53 }
  0xd4   :  { %v404_v60 = vpop.f32.mrf.mxu0  ;;  %1544 = vst [vmem:[%s2222_s3 + $0x80] sm:$0xff] %v1452_v38   ;;  %v1918_v50 = vadd.f32 %v1634_v45, %v1859_v35 }
  0xd5   :  { %v963_v61 = vadd.f32 %v962_v58, %v402_v53  ;;  %v1096_v63 = vadd.f32 %v1095_v56, %v1033_v54  ;;  %v1387_v0 = vpack.c.bf16 %v413_v59, %v410_v57  ;;  %v405_v2 = vadd.f32 %v1859_v35, %v404_v60  ;;  %v532_v54 = vpop.f32.mrf.mxu1 }
  0xd6   :  { %v1605_v3 = vpop.f32.mrf.mxu0  ;;  %v1037_v22 = vmul.f32 %v413_v59, %v413_v59 }
  0xd7   :  { %v1097_v4 = vadd.f32 %v1096_v63, %v1034_v62  ;;  %1531 = vst [vmem:[%s2222_s3 + $0x18] sm:$0xff] %v1387_v0   ;;  %v1382_v6 = vpack.c.bf16 %v405_v2, %v402_v53  ;;  %v964_v7 = vadd.f32 %v963_v61, %v405_v2  ;;  %v1035_v8 = vmul.f32 %v405_v2, %v405_v2  ;;  %v1637_v63 = vpop.f32.mrf.mxu1 }
  0xd8   :  { %v417_v9 = vpop.f32.mrf.mxu0  ;;  %v426_v18 = vadd.f32 %v1605_v3, %v1859_v35  ;;  %v1923_v53 = vadd.f32 %v1859_v35, %v529_v39  ;;  %v1929_v62 = vadd.f32 %v1859_v35, %v532_v54  ;;  %v1940_v12 = vadd.f32 %v1637_v63, %v1859_v35 }
  0xd9   :  { %1530 = vst [vmem:[%s2222_s3 + $0x10] sm:$0xff] %v1382_v6   ;;  %v965_v13 = vadd.f32 %v964_v7, %v410_v57  ;;  %v1098_v14 = vadd.f32 %v1097_v4, %v1035_v8  ;;  %v418_v15 = vadd.f32 %v1859_v35, %v417_v9  ;;  %v545_v7 = vpop.f32.mrf.mxu1 }
  0xda   :  { %v1606_v16 = vpop.f32.mrf.mxu0  ;;  %v1040_v44 = vmul.f32 %v426_v18, %v426_v18  ;;  %v1462_v6 = vpack.c.bf16 %v1929_v62, %v1923_v53 }
  0xdb   :  { %v429_v19 = vadd.f32 %v1606_v16, %v1859_v35  ;;  %v1099_v23 = vadd.f32 %v1098_v14, %v1036_v11  ;;  %v966_v24 = vadd.f32 %v965_v13, %v413_v59  ;;  %v1038_v32 = vmul.f32 %v418_v15, %v418_v15  ;;  %v1638_v14 = vpop.f32.mrf.mxu1 }
  0xdc   :  { %v420_v25 = vpop.f32.mrf.mxu0  ;;  %v1467_v59 = vpack.c.bf16 %v1918_v50, %v1908_v43  ;;  %1546 = vst [vmem:[%s2222_s3 + $0x90] sm:$0xff] %v1462_v6   ;;  %v1950_v21 = vadd.f32 %v1638_v14, %v1859_v35 }
  0xdd   :  { %v1397_v27 = vpack.c.bf16 %v429_v19, %v426_v18  ;;  %v421_v28 = vadd.f32 %v1859_v35, %v420_v25  ;;  %v967_v31 = vadd.f32 %v966_v24, %v418_v15  ;;  %v1100_v33 = vadd.f32 %v1099_v23, %v1037_v22  ;;  %v548_v25 = vpop.f32.mrf.mxu1 }
  0xde   :  { %v1609_v34 = vpop.f32.mrf.mxu0  ;;  %v1041_v55 = vmul.f32 %v429_v19, %v429_v19  ;;  %1547 = vst [vmem:[%s2222_s3 + $0x98] sm:$0xff] %v1467_v59   ;;  %v1955_v24 = vadd.f32 %v1859_v35, %v545_v7 }
  0xdf   :  { %1533 = vst [vmem:[%s2222_s3 + $0x28] sm:$0xff] %v1397_v27   ;;  %v1392_v36 = vpack.c.bf16 %v421_v28, %v418_v15  ;;  %v1039_v37 = vmul.f32 %v421_v28, %v421_v28  ;;  %v1101_v40 = vadd.f32 %v1100_v33, %v1038_v32  ;;  %v968_v41 = vadd.f32 %v967_v31, %v421_v28 }
  0xe0   :  { %v433_v42 = vpop.f32.mrf.mxu0  ;;  %v442_v51 = vadd.f32 %v1609_v34, %v1859_v35  ;;  %v1477_v31 = vpack.c.bf16 %v1950_v21, %v1940_v12  ;;  %v1961_v34 = vadd.f32 %v1859_v35, %v548_v25 }
  0xe1   :  { %1532 = vst [vmem:[%s2222_s3 + $0x20] sm:$0xff] %v1392_v36   ;;  %v969_v46 = vadd.f32 %v968_v41, %v426_v18  ;;  %v1102_v47 = vadd.f32 %v1101_v40, %v1039_v37  ;;  %v434_v48 = vadd.f32 %v1859_v35, %v433_v42  ;;  %v1641_v36 = vpop.f32.mrf.mxu1 }
  0xe2   :  { %v1610_v49 = vpop.f32.mrf.mxu0  ;;  %v1044_v13 = vmul.f32 %v442_v51, %v442_v51  ;;  %1549 = vst [vmem:[%s2222_s3 + $0xa8] sm:$0xff] %v1477_v31  }
  0xe3   :  { %v445_v52 = vadd.f32 %v1610_v49, %v1859_v35  ;;  %v1103_v56 = vadd.f32 %v1102_v47, %v1040_v44  ;;  %v970_v57 = vadd.f32 %v969_v46, %v429_v19  ;;  %v1042_v1 = vmul.f32 %v434_v48, %v434_v48  ;;  %v561_v45 = vpop.f32.mrf.mxu1 }
  0xe4   :  { %v436_v58 = vpop.f32.mrf.mxu0  ;;  %v1472_v44 = vpack.c.bf16 %v1961_v34, %v1955_v24  ;;  %v1972_v49 = vadd.f32 %v1641_v36, %v1859_v35 }
  0xe5   :  { %v1407_v60 = vpack.c.bf16 %v445_v52, %v442_v51  ;;  %v437_v61 = vadd.f32 %v1859_v35, %v436_v58  ;;  %v971_v0 = vadd.f32 %v970_v57, %v434_v48  ;;  %v1104_v2 = vadd.f32 %v1103_v56, %v1041_v55 }
  0xe6   :  { %v1613_v3 = vpop.f32.mrf.mxu0  ;;  %v1045_v26 = vmul.f32 %v445_v52, %v445_v52  ;;  %1548 = vst [vmem:[%s2222_s3 + $0xa0] sm:$0xff] %v1472_v44  }
  0xe7   :  { %1535 = vst [vmem:[%s2222_s3 + $0x38] sm:$0xff] %v1407_v60   ;;  %v1402_v4 = vpack.c.bf16 %v437_v61, %v434_v48  ;;  %v1043_v5 = vmul.f32 %v437_v61, %v437_v61  ;;  %v1105_v8 = vadd.f32 %v1104_v2, %v1042_v1  ;;  %v972_v9 = vadd.f32 %v971_v0, %v437_v61 }
  0xe8   :  { %v449_v11 = vpop.f32.mrf.mxu0  ;;  %v458_v22 = vadd.f32 %v1613_v3, %v1859_v35  ;;  %v1987_v61 = vadd.f32 %v1859_v35, %v561_v45 }
  0xe9   :  { %1534 = vst [vmem:[%s2222_s3 + $0x30] sm:$0xff] %v1402_v4   ;;  %v973_v15 = vadd.f32 %v972_v9, %v442_v51  ;;  %v1106_v16 = vadd.f32 %v1105_v8, %v1043_v5  ;;  %v450_v18 = vadd.f32 %v1859_v35, %v449_v11 }
  0xea   :  { %v1614_v19 = vpop.f32.mrf.mxu0  ;;  %v1048_v51 = vmul.f32 %v458_v22, %v458_v22 }
  0xeb   :  { %v461_v23 = vadd.f32 %v1614_v19, %v1859_v35  ;;  %v1107_v27 = vadd.f32 %v1106_v16, %v1044_v13  ;;  %v974_v28 = vadd.f32 %v973_v15, %v445_v52  ;;  %v1046_v38 = vmul.f32 %v450_v18, %v450_v18  ;;  %v1642_v52 = vpop.f32.mrf.mxu1 }
  0xec   :  { %v452_v30 = vpop.f32.mrf.mxu0  ;;  %v1982_v58 = vadd.f32 %v1642_v52, %v1859_v35 }
  0xed   :  { %v1417_v32 = vpack.c.bf16 %v461_v23, %v458_v22  ;;  %v453_v33 = vadd.f32 %v1859_v35, %v452_v30  ;;  %v975_v37 = vadd.f32 %v974_v28, %v450_v18  ;;  %v1108_v39 = vadd.f32 %v1107_v27, %v1045_v26  ;;  %v564_v63 = vpop.f32.mrf.mxu1 }
  0xee   :  { %v1617_v40 = vpop.f32.mrf.mxu0  ;;  %v1049_v0 = vmul.f32 %v461_v23, %v461_v23  ;;  %v1487_v4 = vpack.c.bf16 %v1982_v58, %v1972_v49  ;;  %v1993_v7 = vadd.f32 %v1859_v35, %v564_v63 }
  0xef   :  { %1537 = vst [vmem:[%s2222_s3 + $0x48] sm:$0xff] %v1417_v32   ;;  %v1412_v41 = vpack.c.bf16 %v453_v33, %v450_v18  ;;  %v1047_v42 = vmul.f32 %v453_v33, %v453_v33  ;;  %v1109_v46 = vadd.f32 %v1108_v39, %v1046_v38  ;;  %v976_v47 = vadd.f32 %v975_v37, %v453_v33  ;;  %v1645_v8 = vpop.f32.mrf.mxu1 }
  0xf0   :  { %v465_v48 = vpop.f32.mrf.mxu0  ;;  %v474_v59 = vadd.f32 %v1617_v40, %v1859_v35  ;;  %1551 = vst [vmem:[%s2222_s3 + $0xb8] sm:$0xff] %v1487_v4   ;;  %v1482_v18 = vpack.c.bf16 %v1993_v7, %v1987_v61  ;;  %v2004_v26 = vadd.f32 %v1645_v8, %v1859_v35 }
  0xf1   :  { %1536 = vst [vmem:[%s2222_s3 + $0x40] sm:$0xff] %v1412_v41   ;;  %v977_v54 = vadd.f32 %v976_v47, %v458_v22  ;;  %v1110_v55 = vadd.f32 %v1109_v46, %v1047_v42  ;;  %v466_v56 = vadd.f32 %v1859_v35, %v465_v48  ;;  %v577_v19 = vpop.f32.mrf.mxu1 }
  0xf2   :  { %v1618_v57 = vpop.f32.mrf.mxu0  ;;  %v1052_v27 = vmul.f32 %v474_v59, %v474_v59  ;;  %1550 = vst [vmem:[%s2222_s3 + $0xb0] sm:$0xff] %v1482_v18   ;;  %v2019_v39 = vadd.f32 %v1859_v35, %v577_v19 }
  0xf3   :  { %v477_v60 = vadd.f32 %v1618_v57, %v1859_v35  ;;  %v1111_v1 = vadd.f32 %v1110_v55, %v1048_v51  ;;  %v978_v2 = vadd.f32 %v977_v54, %v461_v23  ;;  %v1050_v11 = vmul.f32 %v466_v56, %v466_v56  ;;  %v1646_v28 = vpop.f32.mrf.mxu1 }
  0xf4   :  { %v468_v3 = vpop.f32.mrf.mxu0  ;;  %v2014_v36 = vadd.f32 %v1646_v28, %v1859_v35 }
  0xf5   :  { %v1427_v5 = vpack.c.bf16 %v477_v60, %v474_v59  ;;  %v469_v6 = vadd.f32 %v1859_v35, %v468_v3  ;;  %v979_v9 = vadd.f32 %v978_v2, %v466_v56  ;;  %v1112_v13 = vadd.f32 %v1111_v1, %v1049_v0  ;;  %v580_v40 = vpop.f32.mrf.mxu1 }
  0xf6   :  { %v1621_v14 = vpop.f32.mrf.mxu0  ;;  %v1053_v41 = vmul.f32 %v477_v60, %v477_v60  ;;  %v1497_v46 = vpack.c.bf16 %v2014_v36, %v2004_v26  ;;  %v2025_v51 = vadd.f32 %v1859_v35, %v580_v40 }
  0xf7   :  { %1539 = vst [vmem:[%s2222_s3 + $0x58] sm:$0xff] %v1427_v5   ;;  %v1422_v15 = vpack.c.bf16 %v469_v6, %v466_v56  ;;  %v1051_v16 = vmul.f32 %v469_v6, %v469_v6  ;;  %v1113_v22 = vadd.f32 %v1112_v13, %v1050_v11  ;;  %v980_v23 = vadd.f32 %v979_v9, %v469_v6  ;;  %v1649_v52 = vpop.f32.mrf.mxu1 }
  0xf8   :  { %v481_v25 = vpop.f32.mrf.mxu0  ;;  %v490_v37 = vadd.f32 %v1621_v14, %v1859_v35  ;;  %1553 = vst [vmem:[%s2222_s3 + $0xc8] sm:$0xff] %v1497_v46   ;;  %v1492_v63 = vpack.c.bf16 %v2025_v51, %v2019_v39  ;;  %v2036_v4 = vadd.f32 %v1649_v52, %v1859_v35 }
  0xf9   :  { %1538 = vst [vmem:[%s2222_s3 + $0x50] sm:$0xff] %v1422_v15   ;;  %v981_v30 = vadd.f32 %v980_v23, %v474_v59  ;;  %v1114_v31 = vadd.f32 %v1113_v22, %v1051_v16  ;;  %v482_v32 = vadd.f32 %v1859_v35, %v481_v25  ;;  %v593_v0 = vpop.f32.mrf.mxu1 }
  0xfa   :  { %v1622_v33 = vpop.f32.mrf.mxu0  ;;  %v1056_v5 = vmul.f32 %v490_v37, %v490_v37  ;;  %1552 = vst [vmem:[%s2222_s3 + $0xc0] sm:$0xff] %v1492_v63   ;;  %v2051_v18 = vadd.f32 %v1859_v35, %v593_v0 }
  0xfb   :  { %v493_v38 = vadd.f32 %v1622_v33, %v1859_v35  ;;  %v1115_v42 = vadd.f32 %v1114_v31, %v1052_v27  ;;  %v982_v44 = vadd.f32 %v981_v30, %v477_v60  ;;  %v1054_v55 = vmul.f32 %v482_v32, %v482_v32  ;;  %v1650_v6 = vpop.f32.mrf.mxu1 }
  0xfc   :  { %v484_v45 = vpop.f32.mrf.mxu0  ;;  %v2046_v14 = vadd.f32 %v1650_v6, %v1859_v35  ;;  %v1062_v6 = vmul.f32 %v1891_v20, %v1891_v20 }
  0xfd   :  { %v1437_v47 = vpack.c.bf16 %v493_v38, %v490_v37  ;;  %v485_v48 = vadd.f32 %v1859_v35, %v484_v45  ;;  %v983_v54 = vadd.f32 %v982_v44, %v482_v32  ;;  %v1116_v56 = vadd.f32 %v1115_v42, %v1053_v41  ;;  %v596_v19 = vpop.f32.mrf.mxu1 }
  0xfe   :  { %v1625_v57 = vpop.f32.mrf.mxu0  ;;  %v1057_v22 = vmul.f32 %v493_v38, %v493_v38  ;;  %v1507_v28 = vpack.c.bf16 %v2046_v14, %v2036_v4 }
  0xff   :  { %1541 = vst [vmem:[%s2222_s3 + $0x68] sm:$0xff] %v1437_v47   ;;  %v1432_v59 = vpack.c.bf16 %v485_v48, %v482_v32  ;;  %v1055_v60 = vmul.f32 %v485_v48, %v485_v48  ;;  %v1117_v1 = vadd.f32 %v1116_v56, %v1054_v55  ;;  %v984_v2 = vadd.f32 %v983_v54, %v485_v48  ;;  %v1653_v33 = vpop.f32.mrf.mxu1 }
 0x100   :  { %v497_v3 = vpop.f32.mrf.mxu0  ;;  %v506_v15 = vadd.f32 %v1625_v57, %v1859_v35  ;;  %v2057_v32 = vadd.f32 %v1859_v35, %v596_v19  ;;  %1555 = vst [vmem:[%s2222_s3 + $0xd8] sm:$0xff] %v1507_v28   ;;  %v2068_v48 = vadd.f32 %v1653_v33, %v1859_v35 }
 0x101   :  { %1540 = vst [vmem:[%s2222_s3 + $0x60] sm:$0xff] %v1432_v59   ;;  %v985_v8 = vadd.f32 %v984_v2, %v490_v37  ;;  %v1118_v9 = vadd.f32 %v1117_v1, %v1055_v60  ;;  %v498_v11 = vadd.f32 %v1859_v35, %v497_v3  ;;  %v609_v45 = vpop.f32.mrf.mxu1 }
 0x102   :  { %v1626_v13 = vpop.f32.mrf.mxu0  ;;  %v1502_v44 = vpack.c.bf16 %v2057_v32, %v2051_v18  ;;  %v1060_v54 = vmul.f32 %v506_v15, %v506_v15  ;;  %v2080_v59 = vadd.f32 %v1859_v35, %v609_v45 }
 0x103   :  { %v509_v16 = vadd.f32 %v1626_v13, %v1859_v35  ;;  %v1119_v23 = vadd.f32 %v1118_v9, %v1056_v5  ;;  %v986_v25 = vadd.f32 %v985_v8, %v493_v38  ;;  %v1058_v40 = vmul.f32 %v498_v11, %v498_v11  ;;  %v1654_v52 = vpop.f32.mrf.mxu1 }
 0x104   :  { %v500_v27 = vpop.f32.mrf.mxu0  ;;  %1554 = vst [vmem:[%s2222_s3 + $0xd0] sm:$0xff] %v1502_v44   ;;  %v2077_v57 = vadd.f32 %v1654_v52, %v1859_v35  ;;  %v1069_v52 = vmul.f32 %v1918_v50, %v1918_v50 }
 0x105   :  { %v1447_v30 = vpack.c.bf16 %v509_v16, %v506_v15  ;;  %v501_v31 = vadd.f32 %v1859_v35, %v500_v27  ;;  %v987_v37 = vadd.f32 %v986_v25, %v498_v11  ;;  %v1120_v41 = vadd.f32 %v1119_v23, %v1057_v22  ;;  %v612_v60 = vpop.f32.mrf.mxu1 }
 0x106   :  { %v1061_v63 = vmul.f32 %v509_v16, %v509_v16  ;;  %v1517_v2 = vpack.c.bf16 %v2077_v57, %v2068_v48  ;;  %v2085_v3 = vadd.f32 %v1859_v35, %v612_v60  ;;  %v1064_v23 = vmul.f32 %v1879_v10, %v1879_v10 }
 0x107   :  { %1543 = vst [vmem:[%s2222_s3 + $0x78] sm:$0xff] %v1447_v30   ;;  %v1442_v38 = vpack.c.bf16 %v501_v31, %v498_v11  ;;  %v1059_v42 = vmul.f32 %v501_v31, %v501_v31  ;;  %v1121_v46 = vadd.f32 %v1120_v41, %v1058_v40  ;;  %v988_v47 = vadd.f32 %v987_v37, %v501_v31  ;;  %v1657_v5 = vpop.f32.mrf.mxu1 }
 0x108   :  { %1557 = vst [vmem:[%s2222_s3 + $0xe8] sm:$0xff] %v1517_v2   ;;  %v1512_v11 = vpack.c.bf16 %v2085_v3, %v2080_v59  ;;  %v2099_v22 = vadd.f32 %v1657_v5, %v1859_v35  ;;  %v1065_v31 = vmul.f32 %v1886_v17, %v1886_v17 }
 0x109   :  { %1542 = vst [vmem:[%s2222_s3 + $0x70] sm:$0xff] %v1442_v38   ;;  %v989_v55 = vadd.f32 %v988_v47, %v506_v15  ;;  %v1122_v56 = vadd.f32 %v1121_v46, %v1059_v42  ;;  %v625_v13 = vpop.f32.mrf.mxu1  ;;  %v1066_v38 = vmul.f32 %v1923_v53, %v1923_v53 }
 0x10a   :  { %1556 = vst [vmem:[%s2222_s3 + $0xe0] sm:$0xff] %v1512_v11  }
 0x10b   :  { %v1123_v0 = vadd.f32 %v1122_v56, %v1060_v54  ;;  %v990_v1 = vadd.f32 %v989_v55, %v509_v16  ;;  %v1063_v16 = vmul.f32 %v1897_v29, %v1897_v29 }
 0x10d   :  { %v991_v8 = vadd.f32 %v990_v1, %v1891_v20  ;;  %v1124_v9 = vadd.f32 %v1123_v0, %v1061_v63  ;;  %v1658_v20 = vpop.f32.mrf.mxu1  ;;  %v1071_v1 = vmul.f32 %v1961_v34, %v1961_v34 }
 0x10e   :  { %v2108_v28 = vadd.f32 %v1658_v20, %v1859_v35 }
 0x10f   :  { %v992_v15 = vadd.f32 %v991_v8, %v1897_v29  ;;  %v1125_v19 = vadd.f32 %v1124_v9, %v1062_v6  ;;  %v2111_v29 = vadd.f32 %v1859_v35, %v625_v13  ;;  %v628_v30 = vpop.f32.mrf.mxu1  ;;  %v1074_v9 = vmul.f32 %v1987_v61, %v1987_v61 }
 0x110   :  { %v1527_v40 = vpack.c.bf16 %v2108_v28, %v2099_v22  ;;  %v2119_v41 = vadd.f32 %v1859_v35, %v628_v30  ;;  %v1067_v35 = vmul.f32 %v1929_v62, %v1929_v62 }
 0x111   :  { %v993_v25 = vadd.f32 %v992_v15, %v1879_v10  ;;  %v1126_v27 = vadd.f32 %v1125_v19, %v1063_v16  ;;  %v1075_v15 = vmul.f32 %v1993_v7, %v1993_v7 }
 0x112   :  { %1559 = vst [vmem:[%s2222_s3 + $0xf8] sm:$0xff] %v1527_v40   ;;  %v1522_v44 = vpack.c.bf16 %v2119_v41, %v2111_v29 }
 0x113   :  { %v1127_v33 = vadd.f32 %v1126_v27, %v1064_v23  ;;  %v994_v37 = vadd.f32 %v993_v25, %v1886_v17  ;;  %v1078_v25 = vmul.f32 %v2019_v39, %v2019_v39 }
 0x114   :  { %1558 = vst [vmem:[%s2222_s3 + $0xf0] sm:$0xff] %v1522_v44  }
 0x115   :  { %v995_v10 = vadd.f32 %v994_v37, %v1923_v53  ;;  %v1128_v42 = vadd.f32 %v1127_v33, %v1065_v31  ;;  %v1068_v53 = vmul.f32 %v1908_v43, %v1908_v43  ;;  %v1079_v31 = vmul.f32 %v2025_v51, %v2025_v51 }
 0x117   :  { %v1129_v17 = vadd.f32 %v1128_v42, %v1066_v38  ;;  %v996_v45 = vadd.f32 %v995_v10, %v1929_v62  ;;  %v1070_v62 = vmul.f32 %v1955_v24, %v1955_v24  ;;  %v1082_v38 = vmul.f32 %v2051_v18, %v2051_v18 }
 0x119   :  { %v997_v46 = vadd.f32 %v996_v45, %v1908_v43  ;;  %v1130_v47 = vadd.f32 %v1129_v17, %v1067_v35  ;;  %v1072_v43 = vmul.f32 %v1940_v12, %v1940_v12  ;;  %v1083_v17 = vmul.f32 %v2057_v32, %v2057_v32 }
 0x11b   :  { %v1131_v54 = vadd.f32 %v1130_v47, %v1068_v53  ;;  %v998_v55 = vadd.f32 %v997_v46, %v1918_v50  ;;  %v1073_v50 = vmul.f32 %v1950_v21, %v1950_v21  ;;  %v1086_v47 = vmul.f32 %v2080_v59, %v2080_v59 }
 0x11d   :  { %v999_v56 = vadd.f32 %v998_v55, %v1955_v24  ;;  %v1132_v60 = vadd.f32 %v1131_v54, %v1069_v52  ;;  %v1087_v55 = vmul.f32 %v2085_v3, %v2085_v3 }
 0x11f   :  { %v1133_v63 = vadd.f32 %v1132_v60, %v1070_v62  ;;  %v1000_v0 = vadd.f32 %v999_v56, %v1961_v34 }
 0x121   :  { %v1001_v2 = vadd.f32 %v1000_v0, %v1940_v12  ;;  %v1134_v5 = vadd.f32 %v1133_v63, %v1071_v1  ;;  %v1076_v12 = vmul.f32 %v1972_v49, %v1972_v49  ;;  %v1090_v0 = vmul.f32 %v2111_v29, %v2111_v29 }
 0x123   :  { %v1135_v6 = vadd.f32 %v1134_v5, %v1072_v43  ;;  %v1002_v8 = vadd.f32 %v1001_v2, %v1950_v21  ;;  %v1077_v21 = vmul.f32 %v1982_v58, %v1982_v58  ;;  %v1091_v2 = vmul.f32 %v2119_v41, %v2119_v41 }
 0x125   :  { %v1003_v24 = vadd.f32 %v1002_v8, %v1987_v61  ;;  %v1136_v11 = vadd.f32 %v1135_v6, %v1073_v50 }
 0x127   :  { %v1137_v13 = vadd.f32 %v1136_v11, %v1074_v9  ;;  %v1004_v34 = vadd.f32 %v1003_v24, %v1993_v7 }
 0x129   :  { %v1005_v16 = vadd.f32 %v1004_v34, %v1972_v49  ;;  %v1138_v19 = vadd.f32 %v1137_v13, %v1075_v15  ;;  %v1080_v49 = vmul.f32 %v2004_v26, %v2004_v26 }
 0x12b   :  { %v1139_v20 = vadd.f32 %v1138_v19, %v1076_v12  ;;  %v1006_v23 = vadd.f32 %v1005_v16, %v1982_v58  ;;  %v1081_v58 = vmul.f32 %v2014_v36, %v2014_v36 }
 0x12d   :  { %v1007_v61 = vadd.f32 %v1006_v23, %v2019_v39  ;;  %v1140_v27 = vadd.f32 %v1139_v20, %v1077_v21 }
 0x12f   :  { %v1141_v30 = vadd.f32 %v1140_v27, %v1078_v25  ;;  %v1008_v7 = vadd.f32 %v1007_v61, %v2025_v51 }
 0x131   :  { %v1009_v33 = vadd.f32 %v1008_v7, %v2004_v26  ;;  %v1142_v37 = vadd.f32 %v1141_v30, %v1079_v31  ;;  %v1084_v26 = vmul.f32 %v2036_v4, %v2036_v4 }
 0x133   :  { %v1143_v40 = vadd.f32 %v1142_v37, %v1080_v49  ;;  %v1010_v10 = vadd.f32 %v1009_v33, %v2014_v36  ;;  %v1085_v36 = vmul.f32 %v2046_v14, %v2046_v14 }
 0x135   :  { %v1011_v39 = vadd.f32 %v1010_v10, %v2051_v18  ;;  %v1144_v42 = vadd.f32 %v1143_v40, %v1081_v58 }
 0x137   :  { %v1145_v44 = vadd.f32 %v1144_v42, %v1082_v38  ;;  %v1012_v51 = vadd.f32 %v1011_v39, %v2057_v32 }
 0x139   :  { %v1013_v45 = vadd.f32 %v1012_v51, %v2036_v4  ;;  %v1146_v35 = vadd.f32 %v1145_v44, %v1083_v17  ;;  %v1088_v4 = vmul.f32 %v2068_v48, %v2068_v48 }
 0x13b   :  { %v1147_v53 = vadd.f32 %v1146_v35, %v1084_v26  ;;  %v1014_v46 = vadd.f32 %v1013_v45, %v2046_v14  ;;  %v1089_v14 = vmul.f32 %v2077_v57, %v2077_v57 }
 0x13d   :  { %v1015_v18 = vadd.f32 %v1014_v46, %v2080_v59  ;;  %v1148_v52 = vadd.f32 %v1147_v53, %v1085_v36 }
 0x13f   :  { %v1149_v54 = vadd.f32 %v1148_v52, %v1086_v47  ;;  %v1016_v32 = vadd.f32 %v1015_v18, %v2085_v3 }
 0x141   :  { %v1017_v56 = vadd.f32 %v1016_v32, %v2068_v48  ;;  %v1150_v62 = vadd.f32 %v1149_v54, %v1087_v55  ;;  %v1092_v48 = vmul.f32 %v2099_v22, %v2099_v22 }
 0x143   :  { %v1151_v60 = vadd.f32 %v1150_v62, %v1088_v4  ;;  %v1018_v63 = vadd.f32 %v1017_v56, %v2077_v57  ;;  %v1093_v57 = vmul.f32 %v2108_v28, %v2108_v28 }
 0x145   :  { %v1019_v59 = vadd.f32 %v1018_v63, %v2111_v29  ;;  %v1152_v1 = vadd.f32 %v1151_v60, %v1089_v14 }
 0x147   :  { %v1153_v43 = vadd.f32 %v1152_v1, %v1090_v0  ;;  %v1020_v3 = vadd.f32 %v1019_v59, %v2119_v41 }
 0x149   :  { %v1021_v5 = vadd.f32 %v1020_v3, %v2099_v22  ;;  %v1154_v50 = vadd.f32 %v1153_v43, %v1091_v2 }
 0x14b   :  { %v1022_v6 = vadd.f32 %v1021_v5, %v2108_v28  ;;  %v1155_v8 = vadd.f32 %v1154_v50, %v1092_v48 }
 0x14d   :  { %v1023_v29 = vrot.slane %v1022_v6, 4  ;;  %v1156_v24 = vadd.f32 %v1155_v8, %v1093_v57 }
 0x14f   :  { %v1024_v9 = vadd.f32 %v1023_v29, %v1022_v6  ;;  %v1157_v11 = vrot.slane %v1156_v24, 4 }
 0x151   :  { %v1025_v13 = vrot.slane %v1024_v9, 2  ;;  %v1158_v34 = vadd.f32 %v1157_v11, %v1156_v24 }
 0x153   :  { %v1026_v15 = vadd.f32 %v1025_v13, %v1024_v9  ;;  %v1159_v41 = vrot.slane %v1158_v34, 2 }
 0x155   :  { %v1027_v12 = vrot.slane %v1026_v15, 1  ;;  %v1160_v16 = vadd.f32 %v1159_v41, %v1158_v34 }
 0x157   :  { %v1028_v19 = vadd.f32 %v1027_v12, %v1026_v15  ;;  %v1161_v21 = vrot.slane %v1160_v16, 1 }
 0x159   :  { %1029 = vst [vmem:[%s2223_s4] sm:$0x1] %v1028_v19  ;;  %v1162_v22 = vadd.f32 %v1161_v21, %v1160_v16 }
 0x15b   :  { %1163 = vst [vmem:[%s2224_s5] sm:$0x1] %v1162_v22 }

// kernel: simple_downsample.7
= control target key start
LH: loop header
LB: loop body
LE: loop exit
PB: predicated region body
PF: predicated region fallthrough
CT: control target
= control target key end

     0   :  { %s2471_s27 = smov 0   ;;  %s2473_s28 = smov 0   ;;  %s3097_s0 = inlined_call_operand.vmem [shape: bf16[2,16,16,128], index: 0, kind: input, shape index: {}]   ;;  %s3098_s1 = inlined_call_operand.vmem [shape: bf16[2,4,512], index: 1, kind: input, shape index: {}]   ;;  %s3099_s2 = inlined_call_operand.vmem [shape: bf16[16,4], index: 2, kind: input, shape index: {}, may-alias: {2,3}]   ;;  %s3100_s3 = inlined_call_operand.vmem [shape: bf16[16,4], index: 3, kind: input, shape index: {}, may-alias: {2,3}]   ;;  %s3101_s4 = inlined_call_operand.vmem [shape: f32[1,128], index: 4, kind: input, shape index: {}]   ;;  %s3102_s5 = inlined_call_operand.vmem [shape: f32[1,128], index: 5, kind: input, shape index: {}]   ;;  %s3103_s6 = inlined_call_operand.vmem [shape: f32[1,128], index: 6, kind: input, shape index: {}]   ;;  %s3104_s7 = inlined_call_operand.vmem [shape: f32[1,128], index: 7, kind: input, shape index: {}]   ;;  %s3105_s8 = inlined_call_operand.vmem [shape: f32[2,16,16,128], index: 8, kind: output, shape index: {}]  }
   0x1   :  { %s2475_s29 = smov 0  }
   0x2 LB: > { %s30_s30 = sadd.s32 1, %s2415_s28  ;;  %p1992_p0 = scmp.ge.s32.totalorder %s2419_s29, 1  ;;  %s2419_s29 = sphi %s2475_s29, %s18_s29   ;;  %s2415_s28 = sphi %s2473_s28, %s3107_s28   ;;  %s2411_s27 = sphi %s2471_s27, %s3106_s27  }
   0x3   : > { %p32_p1 = scmp.ge.s32.totalorder %s30_s30, 2  ;;  %p305_p2 = scmp.lt.s32.totalorder %s2419_s29, 3 }
   0x5   : > { %s3109_s30 = smov (%p32_p1, %s30_s30), 0  ;;  %p306_p3 = pnand %p1992_p0, %p305_p2 }
   0x6   : > { %p360_p4 = scmp.lt.s32.totalorder (!%p306_p3), %s2411_s27, 1 }
   0x7   : > { %309 = sbr.rel (%p306_p3) target bundleno = 540 (0x21c), region = 52 }
   0xc   : > { %v406_v0 = vlaneseq  ;;  %v2421_v1 = vmov 1983009808   ;;  %v2422_v3 = vmov 0   ;;  %s3111_s27 = smov (!%p360_p4, %s2411_s27), 1  ;;  %vm423_vm0 = vcmask 1041408   ;;  %v2267_v15 = vld [vmem:[%s3099_s2] sm:$0xff]  }
   0xd   : > { %v404_v2 = vunpack.c.l.s4 %v2421_v1  ;;  %468 = vmatprep.mubr.bf16.mxu0 %v2422_v3  ;;  %511 = vmatprep.mubr.bf16.mxu1 %v2422_v3  ;;  %s2028_s9 = sshll.u32 %s3111_s27, 3  ;;  %vm419_vm1 = vcmask 31744   ;;  %v2423_v16 = vmov 0.0   ;;  %vm2424_vm2 = vmmov 0   ;;  %v2530_v44 = vld [vmem:[%s3100_s3] sm:$0xff]   ;;  %s2027_s17 = sshll.u32 %s3111_s27, 7 }
   0xe   : > { %v407_v4 = vshrl.u32 %v406_v0, 7  ;;  %s374_s12 = scalar_lea.vmem %s3098_s1, %s2028_s9  ;;  %v2425_v17 = vmov 1934713408   ;;  %s2647_s20 = scalar_lea.vmem %s3097_s0, %s2027_s17 }
   0xf   : > { %v405_v5 = vunpack.c.0.s8 %v404_v2  ;;  %v395_v7 = vld [vmem:[%s374_s12] sm:$0xff]  ;;  %v557_v18 = vunpack.c.l.s4 %v2425_v17  ;;  %s2029_s11 = sshll.u32 %s3111_s27, 8 }
  0x10   : > { %v402_v9 = vcombine.high %v395_v7, %v395_v7  ;;  %s2936_s13 = scalar_lea.vmem %s3105_s8, %s2029_s11 }
  0x11   : > { %v2495_v6 = vsub.s32 %v405_v5, %v407_v4  ;;  %v558_v22 = vunpack.c.0.s8 %v557_v18 }
  0x13   : > { %v409_v8 = vrot.slane %v395_v7, %v2495_v6  ;;  %v416_v12 = vrot.slane %v402_v9, %v2495_v6  ;;  %v2516_v30 = vsub.s32 %v558_v22, %v407_v4 }
  0x15   : > { %v417_v10 = vcombine.high %v409_v8, %v409_v8  ;;  %v425_v11 = vsel %vm423_vm0, %v409_v8, 0  ;;  %v418_v13 = vcombine.high %v416_v12, %v416_v12  ;;  %v431_v14 = vsel %vm423_vm0, %v416_v12, 0 }
  0x17   : > { %2000 = vmatprep.subr.msk.bf16.mxu0 %vm423_vm0, %v417_v10  ;;  %2002 = vmatprep.subr.msk.bf16.mxu1 %vm423_vm0, %v418_v13 }
  0x18   : > { %451 = vmatpush1.bf16.msra.mxu0 %v425_v11  ;;  %494 = vmatpush1.bf16.msra.mxu1 %v431_v14 }
  0x19   : > { %2141 = vmatprep.subr.bf16.mxu0 %v2423_v16  ;;  %2147 = vmatprep.subr.bf16.mxu1 %v2423_v16 }
  0x1b   : > { %2001 = vmatmul.mubr.msk.bf16.vlgmr.msra.gmra.mxu0 %vm419_vm1, %v2267_v15  ;;  %2003 = vmatmul.mubr.msk.bf16.vlgmr.msra.gmra.mxu1 %vm419_vm1, %v2267_v15 }
  0x1c   : > { %2143 = vmatprep.mubr.msk.bf16.mxu0 %vm2424_vm2, %v2423_v16  ;;  %2149 = vmatprep.mubr.msk.bf16.mxu1 %vm2424_vm2, %v2423_v16 }
  0xdb   : > { %v470_v19 = vpop.f32.mrf.mxu0  ;;  %v513_v20 = vpop.f32.mrf.mxu1 }
  0xdc   : > { %v522_v21 = vcombine.low %v470_v19, %v513_v20  ;;  %v523_v27 = vcombine.high %v470_v19, %v513_v20 }
  0xdd   : > { %v472_v23 = vpop.f32.mrf.mxu0  ;;  %v515_v24 = vpop.f32.mrf.mxu1 }
  0xde   : > { %v538_v25 = vcombine.low %v472_v23, %v515_v24  ;;  %v539_v26 = vcombine.high %v472_v23, %v515_v24  ;;  %v530_v28 = vrot.slane %v522_v21, %v2495_v6  ;;  %v537_v34 = vrot.slane %v523_v27, %v2495_v6 }
  0xdf   : > { %v2524_v41 = vpop.f32.mrf.mxu1  ;;  %v2532_v46 = vpop.f32.mrf.mxu0 }
  0xe0   : > { %v546_v29 = vrot.slane %v538_v25, %v2495_v6  ;;  %v553_v31 = vrot.slane %v539_v26, %v2495_v6  ;;  %v590_v57 = vcombine.low %v2532_v46, %v2524_v41  ;;  %v591_v12 = vcombine.high %v2532_v46, %v2524_v41  ;;  %v2659_v41 = vld [vmem:[%s2647_s20 + $0x78] sm:$0xff]  }
  0xe1   : > { %v519_v50 = vpop.f32.mrf.mxu1  ;;  %v476_v52 = vpop.f32.mrf.mxu0 }
  0xe2   : > { %v554_v32 = vcombine.low %v530_v28, %v546_v29  ;;  %v555_v33 = vcombine.high %v530_v28, %v546_v29  ;;  %v570_v37 = vcombine.low %v537_v34, %v553_v31  ;;  %v571_v53 = vcombine.high %v537_v34, %v553_v31 }
  0xe3   : > { %v606_v54 = vcombine.low %v476_v52, %v519_v50  ;;  %v598_v62 = vrot.slane %v590_v57, %v2495_v6  ;;  %v607_v8 = vcombine.high %v476_v52, %v519_v50  ;;  %v605_v18 = vrot.slane %v591_v12, %v2495_v6  ;;  %v2097_v57 = vld [vmem:[%s2647_s20 + $0x20] sm:$0xff]  }
  0xe4   : > { %v562_v35 = vrot.slane %v554_v32, %v2516_v30  ;;  %v569_v36 = vrot.slane %v555_v33, %v2516_v30  ;;  %v578_v49 = vrot.slane %v570_v37, %v2516_v30  ;;  %v585_v61 = vrot.slane %v571_v53, %v2516_v30 }
  0xe5   : > { %v614_v59 = vrot.slane %v606_v54, %v2495_v6  ;;  %v621_v14 = vrot.slane %v607_v8, %v2495_v6  ;;  %v2096_v54 = vld [vmem:[%s2647_s20 + $0x18] sm:$0xff]   ;;  %v2049_v8 = vunpack.c.h.bf16 %v2097_v57 }
  0xe6   : > { %v658_v38 = vpack.c.bf16 %v562_v35, %v562_v35  ;;  %v586_v39 = vcombine.high %v562_v35, %v2423_v16  ;;  %v587_v40 = vcombine.high %v569_v36, %v2423_v16  ;;  %v660_v45 = vpack.c.bf16 %v569_v36, %v569_v36 }
  0xe7   : > { %v588_v56 = vcombine.high %v578_v49, %v2423_v16  ;;  %v662_v58 = vpack.c.bf16 %v578_v49, %v578_v49  ;;  %v622_v0 = vcombine.low %v598_v62, %v614_v59  ;;  %v589_v2 = vcombine.high %v585_v61, %v2423_v16  ;;  %v2094_v49 = vld [vmem:[%s2647_s20 + $0x8] sm:$0xff]  }
  0xe8   : > { %v685_v42 = vsel %vm423_vm0, %v658_v38, 0  ;;  %v659_v43 = vpack.c.bf16 %v586_v39, %v586_v39  ;;  %v661_v48 = vpack.c.bf16 %v587_v40, %v587_v40  ;;  %v773_v51 = vsel %vm423_vm0, %v660_v45, 0  ;;  %v2650_v39 = vld [vmem:[%s2647_s20 + $0x70] sm:$0xff]   ;;  %v2656_v40 = vld [vmem:[%s3101_s4] ss:$0 sm:$0xff] }
  0xe9   : > { %2142 = vmatpush3.bf16.msra.mxu0 %v685_v42  ;;  %v663_v60 = vpack.c.bf16 %v588_v56, %v588_v56  ;;  %v861_v63 = vsel %vm423_vm0, %v662_v58, 0  ;;  %v664_v3 = vpack.c.bf16 %v585_v61, %v585_v61  ;;  %v665_v4 = vpack.c.bf16 %v589_v2, %v589_v2  ;;  %v2098_v58 = vld [vmem:[%s2647_s20 + $0x28] sm:$0xff]   ;;  %v2100_v2 = vld [vmem:[%s2647_s20 + $0x38] sm:$0xff]  }
  0xea   : > { %v729_v47 = vsel %vm423_vm0, %v659_v43, 0  ;;  %2153 = vmatprep.subr.bf16.mxu0 %v2423_v16  ;;  %v817_v55 = vsel %vm423_vm0, %v661_v48, 0  ;;  %v630_v5 = vrot.slane %v622_v0, %v2516_v30  ;;  %v623_v9 = vcombine.high %v598_v62, %v614_v59  ;;  %v2031_v48 = vld [vmem:[%s2647_s20] sm:$0xff]  }
  0xeb   : > { %2148 = vmatpush3.bf16.msra.mxu1 %v729_v47  ;;  %v905_v1 = vsel %vm423_vm0, %v663_v60, 0  ;;  %v949_v7 = vsel %vm423_vm0, %v664_v3, 0  ;;  %v993_v10 = vsel %vm423_vm0, %v665_v4, 0  ;;  %v638_v20 = vcombine.low %v605_v18, %v621_v14 }
  0xec   : > { %2144 = vmatmul.mubr.msk.bf16.vlgmr.msra.gmra.mxu0 %vm419_vm1, %v2530_v44  ;;  %2159 = vmatprep.subr.bf16.mxu1 %v2423_v16  ;;  %v654_v11 = vcombine.high %v630_v5, %v2423_v16  ;;  %v666_v13 = vpack.c.bf16 %v630_v5, %v630_v5  ;;  %v637_v17 = vrot.slane %v623_v9, %v2516_v30  ;;  %v2093_v43 = vunpack.c.h.bf16 %v2659_v41 }
  0xed   : > { %2154 = vmatpush3.bf16.msra.mxu0 %v773_v51  ;;  %2155 = vmatprep.mubr.msk.bf16.mxu0 %vm2424_vm2, %v2423_v16  ;;  %v646_v24 = vrot.slane %v638_v20, %v2516_v30  ;;  %v639_v26 = vcombine.high %v605_v18, %v621_v14  ;;  %v2032_v50 = vunpack.c.l.bf16 %v2031_v48  ;;  %v2095_v51 = vld [vmem:[%s2647_s20 + $0x10] sm:$0xff]   ;;  %v2036_v52 = vunpack.c.l.bf16 %v2094_v49 }
  0xee   : > { %2150 = vmatmul.mubr.msk.bf16.vlgmr.msra.gmra.mxu1 %vm419_vm1, %v2530_v44  ;;  %2165 = vmatprep.subr.bf16.mxu0 %v2423_v16  ;;  %v667_v15 = vpack.c.bf16 %v654_v11, %v654_v11  ;;  %v1037_v19 = vsel %vm423_vm0, %v666_v13, 0  ;;  %v655_v22 = vcombine.high %v637_v17, %v2423_v16  ;;  %v668_v6 = vpack.c.bf16 %v637_v17, %v637_v17 }
  0xef   : > { %2160 = vmatpush3.bf16.msra.mxu1 %v817_v55  ;;  %2161 = vmatprep.mubr.msk.bf16.mxu1 %vm2424_vm2, %v2423_v16  ;;  %v656_v28 = vcombine.high %v646_v24, %v2423_v16  ;;  %v670_v29 = vpack.c.bf16 %v646_v24, %v646_v24  ;;  %v653_v32 = vrot.slane %v639_v26, %v2516_v30  ;;  %v2033_v53 = vunpack.c.h.bf16 %v2031_v48 }
  0xf0   : > { %2171 = vmatprep.subr.bf16.mxu1 %v2423_v16  ;;  %v1081_v21 = vsel %vm423_vm0, %v667_v15, 0  ;;  %v669_v23 = vpack.c.bf16 %v655_v22, %v655_v22  ;;  %v1125_v25 = vsel %vm423_vm0, %v668_v6, 0  ;;  %v1568_v46 = vmul.f32 %v2093_v43, %v2656_v40 }
  0xf1   : > { %v671_v31 = vpack.c.bf16 %v656_v28, %v656_v28  ;;  %v1213_v33 = vsel %vm423_vm0, %v670_v29, 0  ;;  %v657_v35 = vcombine.high %v653_v32, %v2423_v16  ;;  %v672_v30 = vpack.c.bf16 %v653_v32, %v653_v32 }
  0xf2   : > { %v1169_v27 = vsel %vm423_vm0, %v669_v23, 0  ;;  %v2037_v55 = vunpack.c.h.bf16 %v2094_v49  ;;  %v2040_v56 = vunpack.c.l.bf16 %v2095_v51  ;;  %v1537_v59 = vmul.f32 %v2032_v50, %v2656_v40  ;;  %v2102_v23 = vld [vmem:[%s2647_s20 + $0x48] sm:$0xff]   ;;  %v2739_v49 = vld [vmem:[%s3104_s7] ss:$0 sm:$0xff] }
  0xf3   : > { %v1257_v34 = vsel %vm423_vm0, %v671_v31, 0  ;;  %v673_v36 = vpack.c.bf16 %v657_v35, %v657_v35  ;;  %v1301_v37 = vsel %vm423_vm0, %v672_v30, 0  ;;  %v2044_v60 = vunpack.c.l.bf16 %v2096_v54 }
  0xf4   : > { %2156 = vmatmul.mubr.msk.bf16.vlgmr.msra.gmra.mxu0 %vm419_vm1, %v2530_v44  ;;  %v1539_v61 = vmul.f32 %v2036_v52, %v2656_v40  ;;  %v1538_v62 = vmul.f32 %v2033_v53, %v2656_v40  ;;  %v2045_v0 = vunpack.c.h.bf16 %v2096_v54  ;;  %v2048_v3 = vunpack.c.l.bf16 %v2097_v57 }
  0xf5   : > { %2166 = vmatpush3.bf16.msra.mxu0 %v861_v63  ;;  %2167 = vmatprep.mubr.msk.bf16.mxu0 %vm2424_vm2, %v2423_v16  ;;  %v1345_v38 = vsel %vm423_vm0, %v673_v36, 0  ;;  %v2041_v63 = vunpack.c.h.bf16 %v2095_v51  ;;  %v2052_v4 = vunpack.c.l.bf16 %v2098_v58  ;;  %v1540_v5 = vmul.f32 %v2037_v55, %v2656_v40 }
  0xf6   : > { %2162 = vmatmul.mubr.msk.bf16.vlgmr.msra.gmra.mxu1 %vm419_vm1, %v2530_v44  ;;  %2177 = vmatprep.subr.bf16.mxu0 %v2423_v16  ;;  %v2053_v9 = vunpack.c.h.bf16 %v2098_v58  ;;  %v1543_v11 = vmul.f32 %v2044_v60, %v2656_v40  ;;  %v2060_v13 = vunpack.c.l.bf16 %v2100_v2  ;;  %v1544_v18 = vmul.f32 %v2045_v0, %v2656_v40  ;;  %v2756_v58 = vld [vmem:[%s2647_s20 + $0x60] sm:$0xff]  }
  0xf7   : > { %2172 = vmatpush3.bf16.msra.mxu1 %v905_v1  ;;  %2173 = vmatprep.mubr.msk.bf16.mxu1 %vm2424_vm2, %v2423_v16  ;;  %v2099_v1 = vld [vmem:[%s2647_s20 + $0x30] sm:$0xff]   ;;  %v1542_v17 = vmul.f32 %v2041_v63, %v2656_v40  ;;  %v1545_v20 = vmul.f32 %v2048_v3, %v2656_v40  ;;  %v2061_v6 = vunpack.c.h.bf16 %v2100_v2  ;;  %v1546_v26 = vmul.f32 %v2049_v8, %v2656_v40 }
  0xf8   : > { %2183 = vmatprep.subr.bf16.mxu1 %v2423_v16  ;;  %v2056_v12 = vunpack.c.l.bf16 %v2099_v1  ;;  %v2057_v22 = vunpack.c.h.bf16 %v2099_v1  ;;  %v1551_v31 = vmul.f32 %v2060_v13, %v2656_v40  ;;  %v2068_v36 = vunpack.c.l.bf16 %v2102_v23 }
  0xf9   : > { %v1552_v43 = vmul.f32 %v2061_v6, %v2656_v40  ;;  %v2069_v52 = vunpack.c.h.bf16 %v2102_v23 }
  0xfa   : > { %v1549_v29 = vmul.f32 %v2056_v12, %v2656_v40  ;;  %v2080_v12 = vunpack.c.l.bf16 %v2756_v58 }
  0xfb   : > { %v1556_v8 = vmul.f32 %v2069_v52, %v2656_v40 }
  0xfc   : > { %2168 = vmatmul.mubr.msk.bf16.vlgmr.msra.gmra.mxu0 %vm419_vm1, %v2530_v44 }
  0xfd   : > { %2178 = vmatpush3.bf16.msra.mxu0 %v949_v7  ;;  %2179 = vmatprep.mubr.msk.bf16.mxu0 %vm2424_vm2, %v2423_v16  ;;  %v1541_v7 = vmul.f32 %v2040_v56, %v2656_v40 }
  0xfe   : > { %2174 = vmatmul.mubr.msk.bf16.vlgmr.msra.gmra.mxu1 %vm419_vm1, %v2530_v44  ;;  %2189 = vmatprep.subr.bf16.mxu0 %v2423_v16 }
  0xff   : > { %2184 = vmatpush3.bf16.msra.mxu1 %v993_v10  ;;  %2185 = vmatprep.mubr.msk.bf16.mxu1 %vm2424_vm2, %v2423_v16 }
 0x100   : > { %2195 = vmatprep.subr.bf16.mxu1 %v2423_v16 }
 0x104   : > { %2180 = vmatmul.mubr.msk.bf16.vlgmr.msra.gmra.mxu0 %vm419_vm1, %v2530_v44 }
 0x105   : > { %2190 = vmatpush3.bf16.msra.mxu0 %v1037_v19  ;;  %2191 = vmatprep.mubr.msk.bf16.mxu0 %vm2424_vm2, %v2423_v16  ;;  %v2101_v19 = vld [vmem:[%s2647_s20 + $0x40] sm:$0xff]  }
 0x106   : > { %2186 = vmatmul.mubr.msk.bf16.vlgmr.msra.gmra.mxu1 %vm419_vm1, %v2530_v44  ;;  %2201 = vmatprep.subr.bf16.mxu0 %v2423_v16  ;;  %v2064_v32 = vunpack.c.l.bf16 %v2101_v19 }
 0x107   : > { %2196 = vmatpush3.bf16.msra.mxu1 %v1081_v21  ;;  %2197 = vmatprep.mubr.msk.bf16.mxu1 %vm2424_vm2, %v2423_v16  ;;  %v1547_v21 = vmul.f32 %v2052_v4, %v2656_v40 }
 0x108   : > { %2207 = vmatprep.subr.bf16.mxu1 %v2423_v16  ;;  %v1553_v57 = vmul.f32 %v2064_v32, %v2656_v40  ;;  %v2793_v32 = vld [vmem:[%s2647_s20 + $0x68] sm:$0xff]  }
 0x10c   : > { %2192 = vmatmul.mubr.msk.bf16.vlgmr.msra.gmra.mxu0 %vm419_vm1, %v2530_v44 }
 0x10d   : > { %2202 = vmatpush3.bf16.msra.mxu0 %v1125_v25  ;;  %2203 = vmatprep.mubr.msk.bf16.mxu0 %vm2424_vm2, %v2423_v16 }
 0x10e   : > { %2198 = vmatmul.mubr.msk.bf16.vlgmr.msra.gmra.mxu1 %vm419_vm1, %v2530_v44  ;;  %2213 = vmatprep.subr.bf16.mxu0 %v2423_v16 }
 0x10f   : > { %2208 = vmatpush3.bf16.msra.mxu1 %v1169_v27  ;;  %2209 = vmatprep.mubr.msk.bf16.mxu1 %vm2424_vm2, %v2423_v16  ;;  %v1548_v27 = vmul.f32 %v2053_v9, %v2656_v40 }
 0x110   : > { %2219 = vmatprep.subr.bf16.mxu1 %v2423_v16 }
 0x114   : > { %2204 = vmatmul.mubr.msk.bf16.vlgmr.msra.gmra.mxu0 %vm419_vm1, %v2530_v44 }
 0x115   : > { %2214 = vmatpush3.bf16.msra.mxu0 %v1213_v33  ;;  %2215 = vmatprep.mubr.msk.bf16.mxu0 %vm2424_vm2, %v2423_v16  ;;  %v2103_v33 = vld [vmem:[%s2647_s20 + $0x50] sm:$0xff]  }
 0x116   : > { %2210 = vmatmul.mubr.msk.bf16.vlgmr.msra.gmra.mxu1 %vm419_vm1, %v2530_v44  ;;  %2225 = vmatprep.subr.bf16.mxu0 %v2423_v16  ;;  %v2072_v53 = vunpack.c.l.bf16 %v2103_v33  ;;  %v2073_v0 = vunpack.c.h.bf16 %v2103_v33 }
 0x117   : > { %2220 = vmatpush3.bf16.msra.mxu1 %v1257_v34  ;;  %2221 = vmatprep.mubr.msk.bf16.mxu1 %vm2424_vm2, %v2423_v16  ;;  %v2719_v34 = vld [vmem:[%s3103_s6] ss:$0 sm:$0xff] }
 0x118   : > { %2231 = vmatprep.subr.bf16.mxu1 %v2423_v16  ;;  %v1557_v9 = vmul.f32 %v2072_v53, %v2656_v40 }
 0x11c   : > { %2216 = vmatmul.mubr.msk.bf16.vlgmr.msra.gmra.mxu0 %vm419_vm1, %v2530_v44 }
 0x11d   : > { %2226 = vmatpush3.bf16.msra.mxu0 %v1301_v37  ;;  %2227 = vmatprep.mubr.msk.bf16.mxu0 %vm2424_vm2, %v2423_v16  ;;  %v2065_v37 = vunpack.c.h.bf16 %v2101_v19 }
 0x11e   : > { %2222 = vmatmul.mubr.msk.bf16.vlgmr.msra.gmra.mxu1 %vm419_vm1, %v2530_v44 }
 0x11f   : > { %2232 = vmatpush3.bf16.msra.mxu1 %v1345_v38  ;;  %2233 = vmatprep.mubr.msk.bf16.mxu1 %vm2424_vm2, %v2423_v16  ;;  %v2089_v16 = vunpack.c.h.bf16 %v2650_v39 }
 0x121   : > { %v1566_v42 = vmul.f32 %v2089_v16, %v2656_v40 }
 0x124   : > { %2228 = vmatmul.mubr.msk.bf16.vlgmr.msra.gmra.mxu0 %vm419_vm1, %v2530_v44 }
 0x126   : > { %2234 = vmatmul.mubr.msk.bf16.vlgmr.msra.gmra.mxu1 %vm419_vm1, %v2530_v44  ;;  %v2666_v44 = vld [vmem:[%s3102_s5] ss:$0 sm:$0xff] }
 0x127   : > { %v2669_v45 = vadd.f32 %v2666_v44, %v1566_v42  ;;  %v2673_v47 = vadd.f32 %v2666_v44, %v1568_v46  ;;  %v1576_v10 = vadd.f32 %v2666_v44, %v1537_v59  ;;  %v2691_v14 = vadd.f32 %v2666_v44, %v1539_v61  ;;  %v2104_v46 = vld [vmem:[%s2647_s20 + $0x58] sm:$0xff]  }
 0x128   : > { %v2694_v15 = vadd.f32 %v2666_v44, %v1538_v62  ;;  %v2703_v24 = vadd.f32 %v2666_v44, %v1540_v5  ;;  %v2706_v25 = vadd.f32 %v2666_v44, %v1541_v7  ;;  %v2711_v28 = vadd.f32 %v2666_v44, %v1543_v11 }
 0x129   : > { %v2722_v35 = vadd.f32 %v2666_v44, %v1542_v17  ;;  %v2725_v30 = vadd.f32 %v2666_v44, %v1544_v18  ;;  %v2728_v38 = vadd.f32 %v2666_v44, %v1545_v20  ;;  %v2731_v16 = vadd.f32 %v2666_v44, %v1547_v21 }
 0x12a   : > { %v1550_v42 = vmul.f32 %v2057_v22, %v2656_v40  ;;  %v2742_v50 = vadd.f32 %v2666_v44, %v1546_v26  ;;  %v2745_v51 = vadd.f32 %v2666_v44, %v1548_v27  ;;  %v2749_v55 = vadd.f32 %v2666_v44, %v1549_v29 }
 0x12b   : > { %v2752_v56 = vadd.f32 %v2666_v44, %v1551_v31  ;;  %v1555_v61 = vmul.f32 %v2068_v36, %v2656_v40  ;;  %v1554_v62 = vmul.f32 %v2065_v37, %v2656_v40  ;;  %v2076_v63 = vunpack.c.l.bf16 %v2104_v46 }
 0x12c   : > { %v2763_v3 = vadd.f32 %v2666_v44, %v1550_v42  ;;  %v2766_v4 = vadd.f32 %v2666_v44, %v1552_v43  ;;  %v2077_v11 = vunpack.c.h.bf16 %v2104_v46  ;;  %v2776_v19 = vadd.f32 %v2666_v44, %v1553_v57 }
 0x12d   : > { %v2779_v22 = vadd.f32 %v2666_v44, %v1555_v61  ;;  %v2782_v6 = vadd.f32 %v2666_v44, %v1554_v62  ;;  %v1559_v23 = vmul.f32 %v2076_v63, %v2656_v40  ;;  %v2796_v37 = vadd.f32 %v2666_v44, %v1556_v8 }
 0x12e   : > { %v2799_v42 = vadd.f32 %v2666_v44, %v1557_v9  ;;  %v1560_v43 = vmul.f32 %v2077_v11, %v2656_v40  ;;  %v1561_v46 = vmul.f32 %v2080_v12, %v2656_v40  ;;  %v2084_v62 = vunpack.c.l.bf16 %v2793_v32 }
 0x130   : > { %v2823_v8 = vadd.f32 %v2666_v44, %v1560_v43  ;;  %v2826_v9 = vadd.f32 %v2666_v44, %v1561_v46  ;;  %v2085_v46 = vunpack.c.h.bf16 %v2793_v32 }
 0x1ac   : > { %v721_v48 = vpop.f32.mrf.mxu0 }
 0x1ad   : > { %v1395_v54 = vmul.f32 %v2719_v34, %v721_v48 }
 0x1ae   : > { %v2145_v59 = vpop.f32.mrf.mxu0  ;;  %v765_v60 = vpop.f32.mrf.mxu1 }
 0x1af   : > { %v1434_v1 = vadd.f32 %v2739_v49, %v1395_v54  ;;  %v1397_v2 = vmul.f32 %v2719_v34, %v765_v60  ;;  %v2810_v60 = vadd.f32 %v2666_v44, %v1559_v23  ;;  %v1563_v23 = vmul.f32 %v2084_v62, %v2656_v40 }
 0x1b0   : > { %v724_v5 = vpop.f32.mrf.mxu0  ;;  %v2151_v7 = vpop.f32.mrf.mxu1 }
 0x1b1   : > { %v2771_v13 = vadd.f32 %v1576_v10, %v1434_v1  ;;  %v1436_v17 = vadd.f32 %v2739_v49, %v1397_v2  ;;  %v1396_v18 = vmul.f32 %v2719_v34, %v724_v5  ;;  %v1558_v10 = vmul.f32 %v2073_v0, %v2656_v40 }
 0x1b2   : > { %v2146_v20 = vpop.f32.mrf.mxu0  ;;  %v768_v21 = vpop.f32.mrf.mxu1  ;;  %v2851_v62 = vadd.f32 %v2666_v44, %v1563_v23 }
 0x1b3   : > { %v1640_v26 = vsub.f32 0.0, %v2771_v13  ;;  %v2788_v27 = vadd.f32 %v2691_v14, %v1436_v17  ;;  %v1435_v29 = vadd.f32 %v2739_v49, %v1396_v18  ;;  %v1398_v31 = vmul.f32 %v2719_v34, %v768_v21 }
 0x1b4   : > { %v2152_v33 = vpop.f32.mrf.mxu1  ;;  %v809_v36 = vpop.f32.mrf.mxu0  ;;  %v2813_v61 = vadd.f32 %v2666_v44, %v1558_v10  ;;  %v2081_v10 = vunpack.c.h.bf16 %v2756_v58 }
 0x1b5   : > { %v1672_v14 = vmul.f32 1.442695, %v1640_v26  ;;  %v1642_v48 = vsub.f32 0.0, %v2788_v27  ;;  %v2805_v52 = vadd.f32 %v2694_v15, %v1435_v29  ;;  %v1437_v53 = vadd.f32 %v2739_v49, %v1398_v31 }
 0x1b6   : > { %v1399_v54 = vmul.f32 %v2719_v34, %v809_v36  ;;  %v2157_v57 = vpop.f32.mrf.mxu0  ;;  %v853_v59 = vpop.f32.mrf.mxu1  ;;  %v1562_v32 = vmul.f32 %v2081_v10, %v2656_v40 }
 0x1b7   : > { %2269 = vpow2.f32 %v1672_v14  ;;  %v1676_v63 = vmul.f32 1.442695, %v1642_v48  ;;  %v1641_v0 = vsub.f32 0.0, %v2805_v52  ;;  %v2818_v15 = vadd.f32 %v2703_v24, %v1437_v53 }
 0x1b8   : > { %v1438_v1 = vadd.f32 %v2739_v49, %v1399_v54  ;;  %v1401_v2 = vmul.f32 %v2719_v34, %v853_v59  ;;  %v812_v5 = vpop.f32.mrf.mxu0  ;;  %v2163_v7 = vpop.f32.mrf.mxu1  ;;  %v2088_v14 = vunpack.c.l.bf16 %v2650_v39  ;;  %v2869_v10 = vadd.f32 %v2666_v44, %v1562_v32 }
 0x1b9   : > { %2271 = vpow2.f32 %v1676_v63  ;;  %v1674_v11 = vmul.f32 1.442695, %v1641_v0  ;;  %v1643_v12 = vsub.f32 0.0, %v2818_v15  ;;  %v1400_v17 = vmul.f32 %v2719_v34, %v812_v5 }
 0x1ba   : > { %v2831_v24 = vadd.f32 %v2706_v25, %v1438_v1  ;;  %v1440_v18 = vadd.f32 %v2739_v49, %v1401_v2  ;;  %v2158_v20 = vpop.f32.mrf.mxu0  ;;  %v856_v21 = vpop.f32.mrf.mxu1  ;;  %v1564_v7 = vmul.f32 %v2085_v46, %v2656_v40 }
 0x1bb   : > { %2273 = vpow2.f32 %v1674_v11  ;;  %v1678_v26 = vmul.f32 1.442695, %v1643_v12  ;;  %v1439_v29 = vadd.f32 %v2739_v49, %v1400_v17  ;;  %v1402_v31 = vmul.f32 %v2719_v34, %v856_v21 }
 0x1bc   : > { %v1644_v33 = vsub.f32 0.0, %v2831_v24  ;;  %v2840_v36 = vadd.f32 %v2711_v28, %v1440_v18  ;;  %v2164_v25 = vpop.f32.mrf.mxu1  ;;  %v897_v43 = vpop.f32.mrf.mxu0  ;;  %v1565_v11 = vmul.f32 %v2088_v14, %v2656_v40 }
 0x1bd   : > { %2275 = vpow2.f32 %v1678_v26  ;;  %v2845_v58 = vadd.f32 %v2722_v35, %v1439_v29  ;;  %v1441_v48 = vadd.f32 %v2739_v49, %v1402_v31  ;;  %v1403_v53 = vmul.f32 %v2719_v34, %v897_v43 }
 0x1be   : > { %v1680_v54 = vmul.f32 1.442695, %v1644_v33  ;;  %v1646_v57 = vsub.f32 0.0, %v2840_v36  ;;  %v2169_v59 = vpop.f32.mrf.mxu0  ;;  %v941_v28 = vpop.f32.mrf.mxu1  ;;  %v2092_v26 = vunpack.c.l.bf16 %v2659_v41 }
 0x1bf   : > { %v1645_v39 = vsub.f32 0.0, %v2845_v58  ;;  %v2856_v63 = vadd.f32 %v2725_v30, %v1441_v48  ;;  %v1442_v35 = vadd.f32 %v2739_v49, %v1403_v53  ;;  %v1405_v0 = vmul.f32 %v2719_v34, %v941_v28 }
 0x1c0   : > { %2277 = vpow2.f32 %v1680_v54  ;;  %v1684_v1 = vmul.f32 1.442695, %v1646_v57  ;;  %v900_v2 = vpop.f32.mrf.mxu0  ;;  %v2175_v5 = vpop.f32.mrf.mxu1  ;;  %v2879_v48 = vadd.f32 %v2666_v44, %v1564_v7  ;;  %v2882_v53 = vadd.f32 %v2666_v44, %v1565_v11 }
 0x1c1   : > { %v1682_v12 = vmul.f32 1.442695, %v1645_v39  ;;  %v1647_v17 = vsub.f32 0.0, %v2856_v63  ;;  %v2864_v18 = vadd.f32 %v2728_v38, %v1442_v35  ;;  %v1444_v30 = vadd.f32 %v2739_v49, %v1405_v0 }
 0x1c2   : > { %2279 = vpow2.f32 %v1684_v1  ;;  %v1404_v20 = vmul.f32 %v2719_v34, %v900_v2  ;;  %v2170_v21 = vpop.f32.mrf.mxu0  ;;  %v944_v23 = vpop.f32.mrf.mxu1  ;;  %v1567_v0 = vmul.f32 %v2092_v26, %v2656_v40 }
 0x1c3   : > { %2281 = vpow2.f32 %v1682_v12  ;;  %v1686_v29 = vmul.f32 1.442695, %v1647_v17  ;;  %v1648_v31 = vsub.f32 0.0, %v2864_v18  ;;  %v2874_v33 = vadd.f32 %v2731_v16, %v1444_v30 }
 0x1c4   : > { %v2270_v38 = vpop.eup %2269  ;;  %v1443_v25 = vadd.f32 %v2739_v49, %v1404_v20  ;;  %v1406_v43 = vmul.f32 %v2719_v34, %v944_v23  ;;  %v2176_v46 = vpop.f32.mrf.mxu1 }
 0x1c5   : > { %v985_v14 = vpop.f32.mrf.mxu0  ;;  %v1736_v41 = vadd.f32 1.0, %v2270_v38  ;;  %2283 = vpow2.f32 %v1686_v29  ;;  %v1688_v54 = vmul.f32 1.442695, %v1648_v31  ;;  %v1650_v57 = vsub.f32 0.0, %v2874_v33 }
 0x1c6   : > { %v2272_v16 = vpop.eup %2271  ;;  %v2886_v59 = vadd.f32 %v2742_v50, %v1443_v25  ;;  %v1445_v28 = vadd.f32 %v2739_v49, %v1406_v43  ;;  %v1407_v32 = vmul.f32 %v2719_v34, %v985_v14  ;;  %v1029_v35 = vpop.f32.mrf.mxu1 }
 0x1c7   : > { %v2181_v39 = vpop.f32.mrf.mxu0  ;;  %2285 = vrcp.f32 %v1736_v41  ;;  %v1738_v1 = vadd.f32 1.0, %v2272_v16  ;;  %v1692_v2 = vmul.f32 1.442695, %v1650_v57  ;;  %v1409_v5 = vmul.f32 %v2719_v34, %v1029_v35 }
 0x1c8   : > { %v2274_v7 = vpop.eup %2273  ;;  %2287 = vpow2.f32 %v1688_v54  ;;  %v1649_v11 = vsub.f32 0.0, %v2886_v59  ;;  %v2894_v50 = vadd.f32 %v2745_v51, %v1445_v28  ;;  %v1446_v12 = vadd.f32 %v2739_v49, %v1407_v32  ;;  %v2187_v30 = vpop.f32.mrf.mxu1 }
 0x1c9   : > { %v988_v17 = vpop.f32.mrf.mxu0  ;;  %2289 = vrcp.f32 %v1738_v1  ;;  %v1737_v20 = vadd.f32 1.0, %v2274_v7  ;;  %v1448_v40 = vadd.f32 %v2739_v49, %v1409_v5 }
 0x1ca   : > { %v1408_v21 = vmul.f32 %v2719_v34, %v988_v17  ;;  %v2276_v23 = vpop.eup %2275  ;;  %2291 = vpow2.f32 %v1692_v2  ;;  %v1690_v26 = vmul.f32 1.442695, %v1649_v11  ;;  %v1651_v29 = vsub.f32 0.0, %v2894_v50  ;;  %v1032_v38 = vpop.f32.mrf.mxu1 }
 0x1cb   : > { %v2901_v31 = vadd.f32 %v2749_v55, %v1446_v12  ;;  %v2182_v51 = vpop.f32.mrf.mxu0  ;;  %2293 = vrcp.f32 %v1737_v20  ;;  %v1739_v25 = vadd.f32 1.0, %v2276_v23  ;;  %v2904_v43 = vadd.f32 %v2752_v56, %v1448_v40 }
 0x1cc   : > { %v1447_v46 = vadd.f32 %v2739_v49, %v1408_v21  ;;  %2295 = vpow2.f32 %v1690_v26  ;;  %v1694_v14 = vmul.f32 1.442695, %v1651_v29  ;;  %v1410_v54 = vmul.f32 %v2719_v34, %v1032_v38  ;;  %v2188_v57 = vpop.f32.mrf.mxu1 }
 0x1cd   : > { %v1652_v41 = vsub.f32 0.0, %v2901_v31  ;;  %v1073_v16 = vpop.f32.mrf.mxu0  ;;  %v2278_v28 = vpop.eup %2277  ;;  %2297 = vrcp.f32 %v1739_v25  ;;  %v1654_v55 = vsub.f32 0.0, %v2904_v43 }
 0x1ce   : > { %v2911_v32 = vadd.f32 %v2763_v3, %v1447_v46  ;;  %v1411_v56 = vmul.f32 %v2719_v34, %v1073_v16  ;;  %v1740_v39 = vadd.f32 1.0, %v2278_v28  ;;  %2299 = vpow2.f32 %v1694_v14  ;;  %v1117_v5 = vpop.f32.mrf.mxu1 }
 0x1cf   : > { %v1696_v35 = vmul.f32 1.442695, %v1652_v41  ;;  %v1449_v1 = vadd.f32 %v2739_v49, %v1410_v54  ;;  %v2193_v2 = vpop.f32.mrf.mxu0  ;;  %v2280_v7 = vpop.eup %2279  ;;  %v1413_v17 = vmul.f32 %v2719_v34, %v1117_v5  ;;  %v2919_v3 = vadd.f32 %v2666_v44, %v1567_v0 }
 0x1d0   : > { %v1653_v11 = vsub.f32 0.0, %v2911_v32  ;;  %v1450_v12 = vadd.f32 %v2739_v49, %v1411_v56  ;;  %v2282_v30 = vpop.eup %2281  ;;  %2301 = vrcp.f32 %v1740_v39  ;;  %v1742_v20 = vadd.f32 1.0, %v2280_v7  ;;  %v2199_v26 = vpop.f32.mrf.mxu1 }
 0x1d1   : > { %v1700_v40 = vmul.f32 1.442695, %v1654_v55  ;;  %v2922_v21 = vadd.f32 %v2766_v4, %v1449_v1  ;;  %v1076_v23 = vpop.f32.mrf.mxu0  ;;  %v1741_v29 = vadd.f32 1.0, %v2282_v30  ;;  %2303 = vpow2.f32 %v1696_v35 }
 0x1d2   : > { %v1698_v51 = vmul.f32 1.442695, %v1653_v11  ;;  %v2926_v38 = vadd.f32 %v2776_v19, %v1450_v12  ;;  %v2284_v25 = vpop.eup %2283  ;;  %2305 = vrcp.f32 %v1742_v20  ;;  %v1452_v0 = vadd.f32 %v2739_v49, %v1413_v17  ;;  %v1120_v4 = vpop.f32.mrf.mxu1 }
 0x1d3   : > { %v1655_v44 = vsub.f32 0.0, %v2922_v21  ;;  %v1412_v46 = vmul.f32 %v2719_v34, %v1076_v23  ;;  %v2194_v14 = vpop.f32.mrf.mxu0  ;;  %2307 = vrcp.f32 %v1741_v29  ;;  %v1743_v41 = vadd.f32 1.0, %v2284_v25 }
 0x1d4   : > { %v1656_v54 = vsub.f32 0.0, %v2926_v38  ;;  %v1414_v57 = vmul.f32 %v2719_v34, %v1120_v4  ;;  %v2286_v16 = vpop.eup %2285  ;;  %2309 = vpow2.f32 %v1700_v40  ;;  %v2939_v28 = vadd.f32 %v2779_v22, %v1452_v0  ;;  %v2200_v56 = vpop.f32.mrf.mxu1 }
 0x1d5   : > { %v1702_v19 = vmul.f32 1.442695, %v1655_v44  ;;  %v1451_v55 = vadd.f32 %v2739_v49, %v1412_v46  ;;  %v1161_v39 = vpop.f32.mrf.mxu0  ;;  %v2288_v35 = vpop.eup %2287  ;;  %v1800_v1 = vmul.f32 %v2286_v16, %v2771_v13  ;;  %2311 = vrcp.f32 %v1743_v41 }
 0x1d6   : > { %v1704_v2 = vmul.f32 1.442695, %v1656_v54  ;;  %v1453_v5 = vadd.f32 %v2739_v49, %v1414_v57  ;;  %v2290_v7 = vpop.eup %2289  ;;  %v1744_v11 = vadd.f32 1.0, %v2288_v35  ;;  %2313 = vpow2.f32 %v1698_v51  ;;  %v1205_v30 = vpop.f32.mrf.mxu1 }
 0x1d7   : > { %v1658_v12 = vsub.f32 0.0, %v2939_v28  ;;  %v2946_v22 = vadd.f32 %v2782_v6, %v1451_v55  ;;  %v2205_v17 = vpop.f32.mrf.mxu0  ;;  %v2292_v20 = vpop.eup %2291  ;;  %1832 = vst [vmem:[%s2936_s13] sm:$0xff] %v1800_v1  ;;  %v1802_v40 = vmul.f32 %v2290_v7, %v2788_v27  ;;  %2315 = vpow2.f32 %v1702_v19 }
 0x1d8   : > { %v2951_v13 = vadd.f32 %v2796_v37, %v1453_v5  ;;  %v1415_v23 = vmul.f32 %v2719_v34, %v1161_v39  ;;  %v2294_v26 = vpop.eup %2293  ;;  %2317 = vrcp.f32 %v1744_v11  ;;  %v1746_v29 = vadd.f32 1.0, %v2292_v20  ;;  %v2211_v44 = vpop.f32.mrf.mxu1 }
 0x1d9   : > { %v1708_v51 = vmul.f32 1.442695, %v1658_v12  ;;  %v1657_v6 = vsub.f32 0.0, %v2946_v22  ;;  %v1164_v25 = vpop.f32.mrf.mxu0  ;;  %v2296_v0 = vpop.eup %2295  ;;  %1834 = vst [vmem:[%s2936_s13 + $0x10] sm:$0xff] %v1802_v40  ;;  %v1801_v46 = vmul.f32 %v2294_v26, %v2805_v52  ;;  %2319 = vpow2.f32 %v1704_v2 }
 0x1da   : > { %v1659_v27 = vsub.f32 0.0, %v2951_v13  ;;  %v1454_v37 = vadd.f32 %v2739_v49, %v1415_v23  ;;  %v2298_v14 = vpop.eup %2297  ;;  %2321 = vrcp.f32 %v1746_v29  ;;  %v1745_v4 = vadd.f32 1.0, %v2296_v0  ;;  %v1208_v16 = vpop.f32.mrf.mxu1 }
 0x1db   : > { %v1706_v41 = vmul.f32 1.442695, %v1657_v6  ;;  %v1417_v54 = vmul.f32 %v2719_v34, %v1205_v30  ;;  %v2206_v57 = vpop.f32.mrf.mxu0  ;;  %v2300_v19 = vpop.eup %2299  ;;  %1833 = vst [vmem:[%s2936_s13 + $0x8] sm:$0xff] %v1801_v46  ;;  %v1803_v55 = vmul.f32 %v2298_v14, %v2818_v15  ;;  %2323 = vpow2.f32 %v1708_v51 }
 0x1dc   : > { %v1710_v52 = vmul.f32 1.442695, %v1659_v27  ;;  %v2963_v56 = vadd.f32 %v2799_v42, %v1454_v37  ;;  %2325 = vrcp.f32 %v1745_v4  ;;  %v1747_v39 = vadd.f32 1.0, %v2300_v19  ;;  %v2212_v2 = vpop.f32.mrf.mxu1 }
 0x1dd   : > { %v1456_v35 = vadd.f32 %v2739_v49, %v1417_v54  ;;  %v1416_v1 = vmul.f32 %v2719_v34, %v1164_v25  ;;  %v1249_v5 = vpop.f32.mrf.mxu0  ;;  %v2302_v7 = vpop.eup %2301  ;;  %1835 = vst [vmem:[%s2936_s13 + $0x18] sm:$0xff] %v1803_v55  ;;  %2327 = vpow2.f32 %v1706_v41  ;;  %v1418_v15 = vmul.f32 %v2719_v34, %v1208_v16 }
 0x1de   : > { %v1660_v11 = vsub.f32 0.0, %v2963_v56  ;;  %v1419_v12 = vmul.f32 %v2719_v34, %v1249_v5  ;;  %v2304_v42 = vpop.eup %2303  ;;  %v1804_v17 = vmul.f32 %v2302_v7, %v2831_v24  ;;  %2329 = vrcp.f32 %v1747_v39  ;;  %v1293_v23 = vpop.f32.mrf.mxu1 }
 0x1df   : > { %v2973_v30 = vadd.f32 %v2810_v60, %v1456_v35  ;;  %v1455_v20 = vadd.f32 %v2739_v49, %v1416_v1  ;;  %v2217_v40 = vpop.f32.mrf.mxu0  ;;  %v2306_v26 = vpop.eup %2305  ;;  %v1748_v29 = vadd.f32 1.0, %v2304_v42  ;;  %2331 = vpow2.f32 %v1710_v52 }
 0x1e0   : > { %v1712_v51 = vmul.f32 1.442695, %v1660_v11  ;;  %v1457_v6 = vadd.f32 %v2739_v49, %v1418_v15  ;;  %v2308_v25 = vpop.eup %2307  ;;  %1836 = vst [vmem:[%s2936_s13 + $0x20] sm:$0xff] %v1804_v17  ;;  %v1806_v44 = vmul.f32 %v2306_v26, %v2840_v36  ;;  %v1458_v0 = vadd.f32 %v2739_v49, %v1419_v12  ;;  %v2223_v27 = vpop.f32.mrf.mxu1 }
 0x1e1   : > { %v1662_v24 = vsub.f32 0.0, %v2973_v30  ;;  %v2981_v60 = vadd.f32 %v2813_v61, %v1455_v20  ;;  %v1252_v46 = vpop.f32.mrf.mxu0  ;;  %v2310_v37 = vpop.eup %2309  ;;  %v1805_v14 = vmul.f32 %v2308_v25, %v2845_v58  ;;  %2333 = vrcp.f32 %v1748_v29 }
 0x1e2   : > { %v2986_v4 = vadd.f32 %v2823_v8, %v1457_v6  ;;  %v1421_v41 = vmul.f32 %v2719_v34, %v1293_v23  ;;  %v2312_v36 = vpop.eup %2311  ;;  %1838 = vst [vmem:[%s2936_s13 + $0x30] sm:$0xff] %v1806_v44  ;;  %v1750_v54 = vadd.f32 1.0, %v2310_v37  ;;  %2335 = vpow2.f32 %v1712_v51  ;;  %v1296_v19 = vpop.f32.mrf.mxu1 }
 0x1e3   : > { %v1716_v61 = vmul.f32 1.442695, %v1662_v24  ;;  %v1661_v57 = vsub.f32 0.0, %v2981_v60  ;;  %v2218_v16 = vpop.f32.mrf.mxu0  ;;  %v2314_v55 = vpop.eup %2313  ;;  %1837 = vst [vmem:[%s2936_s13 + $0x28] sm:$0xff] %v1805_v14  ;;  %v1807_v58 = vmul.f32 %v2312_v36, %v2856_v63  ;;  %v2995_v8 = vadd.f32 %v2826_v9, %v1458_v0 }
 0x1e4   : > { %v1663_v52 = vsub.f32 0.0, %v2986_v4  ;;  %v1460_v39 = vadd.f32 %v2739_v49, %v1421_v41  ;;  %v2316_v35 = vpop.eup %2315  ;;  %2337 = vrcp.f32 %v1750_v54  ;;  %v1749_v1 = vadd.f32 1.0, %v2314_v55  ;;  %v2224_v7 = vpop.f32.mrf.mxu1 }
 0x1e5   : > { %v1714_v2 = vmul.f32 1.442695, %v1661_v57  ;;  %v1420_v5 = vmul.f32 %v2719_v34, %v1252_v46  ;;  %v1337_v11 = vpop.f32.mrf.mxu0  ;;  %v2318_v15 = vpop.eup %2317  ;;  %1839 = vst [vmem:[%s2936_s13 + $0x38] sm:$0xff] %v1807_v58  ;;  %v1751_v12 = vadd.f32 1.0, %v2316_v35  ;;  %2339 = vpow2.f32 %v1716_v61 }
 0x1e6   : > { %v1718_v63 = vmul.f32 1.442695, %v1663_v52  ;;  %v1664_v42 = vsub.f32 0.0, %v2995_v8  ;;  %v2320_v9 = vpop.eup %2319  ;;  %v1808_v17 = vmul.f32 %v2318_v15, %v2864_v18  ;;  %2341 = vrcp.f32 %v1749_v1  ;;  %v1381_v26 = vpop.f32.mrf.mxu1 }
 0x1e7   : > { %v3003_v20 = vadd.f32 %v2851_v62, %v1460_v39  ;;  %v1459_v40 = vadd.f32 %v2739_v49, %v1420_v5  ;;  %v2229_v23 = vpop.f32.mrf.mxu0  ;;  %v2322_v29 = vpop.eup %2321  ;;  %2343 = vrcp.f32 %v1751_v12  ;;  %v1752_v51 = vadd.f32 1.0, %v2320_v9 }
 0x1e8   : > { %v1720_v6 = vmul.f32 1.442695, %v1664_v42  ;;  %v1422_v25 = vmul.f32 %v2719_v34, %v1296_v19  ;;  %v2324_v44 = vpop.eup %2323  ;;  %1840 = vst [vmem:[%s2936_s13 + $0x40] sm:$0xff] %v1808_v17  ;;  %v1810_v24 = vmul.f32 %v2322_v29, %v2874_v33  ;;  %2345 = vpow2.f32 %v1714_v2  ;;  %v2235_v46 = vpop.f32.mrf.mxu1 }
 0x1e9   : > { %v1666_v18 = vsub.f32 0.0, %v3003_v20  ;;  %v3011_v62 = vadd.f32 %v2869_v10, %v1459_v40  ;;  %v1340_v0 = vpop.f32.mrf.mxu0  ;;  %v2326_v27 = vpop.eup %2325  ;;  %2347 = vrcp.f32 %v1752_v51  ;;  %v1754_v37 = vadd.f32 1.0, %v2324_v44 }
 0x1ea   : > { %v1461_v14 = vadd.f32 %v2739_v49, %v1422_v25  ;;  %v1423_v41 = vmul.f32 %v2719_v34, %v1337_v11  ;;  %v2328_v36 = vpop.eup %2327  ;;  %1842 = vst [vmem:[%s2936_s13 + $0x50] sm:$0xff] %v1810_v24  ;;  %v1809_v33 = vmul.f32 %v2326_v27, %v2886_v59  ;;  %2349 = vpow2.f32 %v1718_v63  ;;  %v1384_v10 = vpop.f32.mrf.mxu1 }
 0x1eb   : > { %v1724_v54 = vmul.f32 1.442695, %v1666_v18  ;;  %v1665_v61 = vsub.f32 0.0, %v3011_v62  ;;  %v2230_v57 = vpop.f32.mrf.mxu0  ;;  %v2330_v16 = vpop.eup %2329  ;;  %2351 = vrcp.f32 %v1754_v37  ;;  %v1753_v19 = vadd.f32 1.0, %v2328_v36 }
 0x1ec   : > { %v3019_v55 = vadd.f32 %v2879_v48, %v1461_v14  ;;  %v1462_v58 = vadd.f32 %v2739_v49, %v1423_v41  ;;  %v2332_v52 = vpop.eup %2331  ;;  %1841 = vst [vmem:[%s2936_s13 + $0x48] sm:$0xff] %v1809_v33  ;;  %v1811_v39 = vmul.f32 %v2330_v16, %v2894_v50  ;;  %2353 = vpow2.f32 %v1720_v6  ;;  %v2236_v1 = vpop.f32.mrf.mxu1 }
 0x1ed   : > { %v1722_v59 = vmul.f32 1.442695, %v1665_v61  ;;  %v1425_v35 = vmul.f32 %v2719_v34, %v1381_v26  ;;  %2355 = vrcp.f32 %v1753_v19  ;;  %v1755_v2 = vadd.f32 1.0, %v2332_v52 }
 0x1ee   : > { %v1667_v5 = vsub.f32 0.0, %v3019_v55  ;;  %v3027_v7 = vadd.f32 %v2882_v53, %v1462_v58  ;;  %v2334_v48 = vpop.eup %2333  ;;  %1843 = vst [vmem:[%s2936_s13 + $0x58] sm:$0xff] %v1811_v39  ;;  %2357 = vpow2.f32 %v1724_v54  ;;  %v1424_v50 = vmul.f32 %v2719_v34, %v1340_v0 }
 0x1ef   : > { %v1464_v11 = vadd.f32 %v2739_v49, %v1425_v35  ;;  %v1426_v15 = vmul.f32 %v2719_v34, %v1384_v10  ;;  %v2336_v12 = vpop.eup %2335  ;;  %v1812_v63 = vmul.f32 %v2334_v48, %v2901_v31  ;;  %2359 = vrcp.f32 %v1755_v2 }
 0x1f0   : > { %v1726_v42 = vmul.f32 1.442695, %v1667_v5  ;;  %v1668_v9 = vsub.f32 0.0, %v3027_v7  ;;  %v1756_v17 = vadd.f32 1.0, %v2336_v12  ;;  %2361 = vpow2.f32 %v1722_v59 }
 0x1f1   : > { %v3036_v53 = vadd.f32 %v2919_v3, %v1464_v11  ;;  %v1463_v40 = vadd.f32 %v2739_v49, %v1424_v50  ;;  %v2338_v23 = vpop.eup %2337  ;;  %1844 = vst [vmem:[%s2936_s13 + $0x60] sm:$0xff] %v1812_v63  ;;  %v1465_v34 = vadd.f32 %v2739_v49, %v1426_v15 }
 0x1f2   : > { %2363 = vpow2.f32 %v1726_v42  ;;  %v1728_v26 = vmul.f32 1.442695, %v1668_v9  ;;  %v2340_v29 = vpop.eup %2339  ;;  %v1814_v31 = vmul.f32 %v2338_v23, %v2904_v43 }
 0x1f3   : > { %2365 = vrcp.f32 %v1756_v17  ;;  %v1670_v51 = vsub.f32 0.0, %v3036_v53  ;;  %v3044_v6 = vadd.f32 %v2669_v45, %v1463_v40  ;;  %v2342_v3 = vpop.eup %2341  ;;  %v1758_v25 = vadd.f32 1.0, %v2340_v29 }
 0x1f4   : > { %2367 = vpow2.f32 %v1728_v26  ;;  %v3047_v44 = vadd.f32 %v2673_v47, %v1465_v34  ;;  %v2344_v24 = vpop.eup %2343  ;;  %1846 = vst [vmem:[%s2936_s13 + $0x70] sm:$0xff] %v1814_v31  ;;  %v1813_v49 = vmul.f32 %v2342_v3, %v2911_v32 }
 0x1f5   : > { %v1732_v18 = vmul.f32 1.442695, %v1670_v51  ;;  %v1669_v43 = vsub.f32 0.0, %v3044_v6  ;;  %v2346_v0 = vpop.eup %2345  ;;  %v1815_v46 = vmul.f32 %v2344_v24, %v2922_v21  ;;  %2369 = vrcp.f32 %v1758_v25 }
 0x1f6   : > { %v1671_v45 = vsub.f32 0.0, %v3047_v44  ;;  %v2348_v27 = vpop.eup %2347  ;;  %1845 = vst [vmem:[%s2936_s13 + $0x68] sm:$0xff] %v1813_v49  ;;  %v1757_v37 = vadd.f32 1.0, %v2346_v0 }
 0x1f7   : > { %2371 = vpow2.f32 %v1732_v18  ;;  %v1730_v47 = vmul.f32 1.442695, %v1669_v43  ;;  %v2350_v14 = vpop.eup %2349  ;;  %1847 = vst [vmem:[%s2936_s13 + $0x78] sm:$0xff] %v1815_v46  ;;  %v1816_v32 = vmul.f32 %v2348_v27, %v2926_v38 }
 0x1f8   : > { %v1734_v41 = vmul.f32 1.442695, %v1671_v45  ;;  %v2352_v36 = vpop.eup %2351  ;;  %2373 = vrcp.f32 %v1757_v37  ;;  %v1759_v33 = vadd.f32 1.0, %v2350_v14 }
 0x1f9   : > { %v2354_v21 = vpop.eup %2353  ;;  %1848 = vst [vmem:[%s2936_s13 + $0x80] sm:$0xff] %v1816_v32  ;;  %v1818_v54 = vmul.f32 %v2352_v36, %v2939_v28  ;;  %2375 = vpow2.f32 %v1730_v47 }
 0x1fa   : > { %v2356_v61 = vpop.eup %2355  ;;  %2377 = vrcp.f32 %v1759_v33  ;;  %v1760_v10 = vadd.f32 1.0, %v2354_v21 }
 0x1fb   : > { %v2358_v57 = vpop.eup %2357  ;;  %1850 = vst [vmem:[%s2936_s13 + $0x90] sm:$0xff] %v1818_v54  ;;  %v1817_v16 = vmul.f32 %v2356_v61, %v2946_v22  ;;  %2379 = vpow2.f32 %v1734_v41 }
 0x1fc   : > { %v2360_v38 = vpop.eup %2359  ;;  %2381 = vrcp.f32 %v1760_v10  ;;  %v1762_v19 = vadd.f32 1.0, %v2358_v57 }
 0x1fd   : > { %v2362_v58 = vpop.eup %2361  ;;  %1849 = vst [vmem:[%s2936_s13 + $0x88] sm:$0xff] %v1817_v16  ;;  %v1819_v52 = vmul.f32 %v2360_v38, %v2951_v13 }
 0x1fe   : > { %2383 = vrcp.f32 %v1762_v19  ;;  %v1761_v28 = vadd.f32 1.0, %v2362_v58 }
 0x1ff   : > { %v2364_v39 = vpop.eup %2363  ;;  %1851 = vst [vmem:[%s2936_s13 + $0x98] sm:$0xff] %v1819_v52 }
 0x200   : > { %v2366_v59 = vpop.eup %2365  ;;  %v1763_v35 = vadd.f32 1.0, %v2364_v39  ;;  %2385 = vrcp.f32 %v1761_v28 }
 0x201   : > { %v2368_v1 = vpop.eup %2367  ;;  %v1820_v2 = vmul.f32 %v2366_v59, %v2963_v56 }
 0x202   : > { %2387 = vrcp.f32 %v1763_v35  ;;  %v1764_v22 = vadd.f32 1.0, %v2368_v1  ;;  %v2370_v5 = vpop.eup %2369 }
 0x203   : > { %1852 = vst [vmem:[%s2936_s13 + $0xa0] sm:$0xff] %v1820_v2  ;;  %v1822_v11 = vmul.f32 %v2370_v5, %v2973_v30 }
 0x204   : > { %v2372_v48 = vpop.eup %2371  ;;  %2389 = vrcp.f32 %v1764_v22 }
 0x205   : > { %v1766_v13 = vadd.f32 1.0, %v2372_v48  ;;  %v2374_v50 = vpop.eup %2373  ;;  %1854 = vst [vmem:[%s2936_s13 + $0xb0] sm:$0xff] %v1822_v11 }
 0x206   : > { %v2376_v15 = vpop.eup %2375  ;;  %v1821_v12 = vmul.f32 %v2374_v50, %v2981_v60 }
 0x207   : > { %2391 = vrcp.f32 %v1766_v13  ;;  %v2378_v56 = vpop.eup %2377  ;;  %v1765_v63 = vadd.f32 1.0, %v2376_v15 }
 0x208   : > { %v2380_v42 = vpop.eup %2379  ;;  %1853 = vst [vmem:[%s2936_s13 + $0xa8] sm:$0xff] %v1821_v12  ;;  %v1823_v9 = vmul.f32 %v2378_v56, %v2986_v4 }
 0x209   : > { %v2382_v17 = vpop.eup %2381  ;;  %2393 = vrcp.f32 %v1765_v63  ;;  %v1767_v30 = vadd.f32 1.0, %v2380_v42 }
 0x20a   : > { %1855 = vst [vmem:[%s2936_s13 + $0xb8] sm:$0xff] %v1823_v9  ;;  %v1824_v40 = vmul.f32 %v2382_v17, %v2995_v8 }
 0x20b   : > { %v2384_v23 = vpop.eup %2383  ;;  %2395 = vrcp.f32 %v1767_v30 }
 0x20c   : > { %1856 = vst [vmem:[%s2936_s13 + $0xc0] sm:$0xff] %v1824_v40  ;;  %v1826_v60 = vmul.f32 %v2384_v23, %v3003_v20 }
 0x20d   : > { %v2386_v26 = vpop.eup %2385 }
 0x20e   : > { %1858 = vst [vmem:[%s2936_s13 + $0xd0] sm:$0xff] %v1826_v60  ;;  %v1825_v4 = vmul.f32 %v2386_v26, %v3011_v62 }
 0x20f   : > { %v2388_v34 = vpop.eup %2387 }
 0x210   : > { %v1827_v29 = vmul.f32 %v2388_v34, %v3019_v55  ;;  %1857 = vst [vmem:[%s2936_s13 + $0xc8] sm:$0xff] %v1825_v4 }
 0x211   : > { %v2390_v31 = vpop.eup %2389 }
 0x212   : > { %1859 = vst [vmem:[%s2936_s13 + $0xd8] sm:$0xff] %v1827_v29  ;;  %v1828_v8 = vmul.f32 %v2390_v31, %v3027_v7 }
 0x214   : > { %v2392_v51 = vpop.eup %2391  ;;  %1860 = vst [vmem:[%s2936_s13 + $0xe0] sm:$0xff] %v1828_v8 }
 0x215   : > { %v1830_v3 = vmul.f32 %v2392_v51, %v3036_v53 }
 0x216   : > { %v2394_v25 = vpop.eup %2393 }
 0x217   : > { %1862 = vst [vmem:[%s2936_s13 + $0xf0] sm:$0xff] %v1830_v3  ;;  %v1829_v20 = vmul.f32 %v2394_v25, %v3044_v6 }
 0x218   : > { %v2396_v24 = vpop.eup %2395 }
 0x219   : > { %1861 = vst [vmem:[%s2936_s13 + $0xe8] sm:$0xff] %v1829_v20  ;;  %v1831_v49 = vmul.f32 %v2396_v24, %v3047_v44 }
 0x21b   : > { %1863 = vst [vmem:[%s2936_s13 + $0xf8] sm:$0xff] %v1831_v49 }
 0x21c PF: > { %s18_s29 = sadd.s32 1, %s2419_s29   ;;  %s3106_s27 = smov %s2415_s28 }
 0x21d   : > { %p15_p5 = scmp.ge.s32.totalorder %s18_s29, 4   ;;  %s3107_s28 = smov %s3109_s30 }
 0x21f   :  { %17 = sbr.rel (!%p15_p5) target bundleno = 2 (0x2), region = 88 }

</bundles_post_ra>
